<compile_context>
chip_gen: v7x
topology: tpu7x:2x2x1
jax: 0.10.0
libtpu: 0.0.40
codegen_flags: <defaults>
</compile_context>

<pallas_src>
import jax
import jax.numpy as jnp
from jax.experimental import pallas as pl
from jax.experimental.pallas import tpu as pltpu

BN_EPS = 1e-4
K_IN = 28 * 28          # 784, fixed by x.view(-1, 28*28)
K_PAD = 896             # 7 * 128: lane-aligned layer-1 contraction
OUT_PAD = 128           # lane-dense logits / log-softmax / output store


def _sign_pm1(v):
    # BinaryConnectDeterministic: +1 if v >= 0 else -1 (f32; cast at use site)
    return jnp.where(v >= 0, 1.0, -1.0)


def binmnist_kernel(
    x_ref,
    w1_ref, b1_ref, g1_ref, be1_ref,
    w2_hbm, b2_ref, g2_ref, be2_ref,
    w3_hbm, b3_ref, g3_ref, be3_ref,
    w4_hbm, b4_ref,
    o_ref,
    wbuf, w4buf, sem,
):
    act_dtype = wbuf.dtype
    is_int = jnp.issubdtype(act_dtype, jnp.integer)
    acc_dtype = jnp.int32 if is_int else jnp.float32

    # ---- Stream layer-2/3/4 weights (P4): issue all HBM->VMEM DMAs up front;
    # the DMA engine drains them in layer order while the MXU works on layers
    # 1/2/3, hiding the weight transfer behind compute. ----
    cp_w2 = pltpu.make_async_copy(w2_hbm, wbuf.at[0], sem.at[0])
    cp_w3 = pltpu.make_async_copy(w3_hbm, wbuf.at[1], sem.at[1])
    cp_w4 = pltpu.make_async_copy(w4_hbm, w4buf, sem.at[2])
    cp_w2.start()
    cp_w3.start()
    cp_w4.start()

    def bn_sign(h, g_ref, be_ref):
        # Single-pass training-mode BatchNorm1d (biased var) folded with sign():
        #   sign(g*(h-mean)*rsqrt(var+eps) + beta)
        #     == sign(g*h + (beta*sqrt(var+eps) - g*mean))    (rsqrt > 0)
        # s1/s2 stats mean the (B,U) "h - mean" temp is never materialized.
        inv_b = 1.0 / h.shape[0]
        s1 = jnp.sum(h, axis=0, keepdims=True)
        s2 = jnp.sum(h * h, axis=0, keepdims=True)
        mean = s1 * inv_b
        var = jnp.maximum(s2 * inv_b - mean * mean, 0.0)
        thresh = be_ref[...] * jnp.sqrt(var + BN_EPS) - g_ref[...] * mean
        y = g_ref[...] * h + thresh
        sel = _sign_pm1(y)
        if is_int:
            return sel.astype(jnp.int32).astype(act_dtype)    # +/-1 int8
        return sel.astype(act_dtype)                          # +/-1 bf16 (exact)

    # ---- Layer 1: bf16x2 split of the real-valued input against +/-1 bf16 W1
    # (two bf16 MXU passes, f32 accumulation; no in-kernel f32 W1 copy). ----
    x = x_ref[...]                                            # (B, K_PAD) f32
    x_hi = x.astype(jnp.bfloat16)
    x_lo = (x - x_hi.astype(jnp.float32)).astype(jnp.bfloat16)
    w1 = w1_ref[...]                                          # (K_PAD, U) bf16 +/-1
    acc1 = (jnp.dot(x_hi, w1, preferred_element_type=jnp.float32)
            + jnp.dot(x_lo, w1, preferred_element_type=jnp.float32))
    h = jnp.maximum(acc1 + b1_ref[...], 0.0)
    hb = bn_sign(h, g1_ref, be1_ref)                          # (B, U) +/-1

    # ---- Layers 2 & 3: +/-1 x +/-1 on the MXU; int8/int32 on v5e/v6e,
    # bf16/f32 elsewhere; both accumulations are exact for sums <= U. ----
    def bin_layer(hb, w, b_ref, g_ref, be_ref):
        acc = jnp.dot(hb, w, preferred_element_type=acc_dtype).astype(jnp.float32)
        hh = jnp.maximum(acc + b_ref[...], 0.0)
        return bn_sign(hh, g_ref, be_ref)

    cp_w2.wait()
    hb = bin_layer(hb, wbuf[0], b2_ref, g2_ref, be2_ref)
    cp_w3.wait()
    hb = bin_layer(hb, wbuf[1], b3_ref, g3_ref, be3_ref)

    # ---- Layer 4 + LogSoftmax over the lane-dense padded width (pad bias is
    # -1e9 and pad weight columns are 0, so padded columns vanish). ----
    cp_w4.wait()
    logits = (jnp.dot(hb, w4buf[...], preferred_element_type=acc_dtype)
              .astype(jnp.float32) + b4_ref[...])             # (B, OUT_PAD)
    m = jnp.max(logits, axis=1, keepdims=True)
    shifted = logits - m
    lse = jnp.log(jnp.sum(jnp.exp(shifted), axis=1, keepdims=True))
    o_ref[...] = shifted - lse


def _tpu_generation():
    try:
        kind = jax.devices()[0].device_kind.lower()
    except Exception:
        return None
    for g in (7, 6, 5, 4, 3, 2):
        if f"v{g}" in kind or f"tpu{g}" in kind:
            return g
    return None


def _physical_vmem_bytes(gen):
    try:
        return int(pltpu.get_tpu_info().vmem_capacity_bytes)
    except Exception:
        pass
    if gen is not None and gen <= 6:
        return 128 << 20      # v4/v5e/v6e: 128 MiB per TensorCore
    return 64 << 20           # v7x / unknown: conservative


def binmnist_forward(x_img, params, use_int8=None):
    """x_img: (B, 1, 28, 28) NCHW; returns (B, out_features) f32 log-probs."""
    B = x_img.shape[0]
    x = x_img.reshape(B, K_IN).astype(jnp.float32)            # x.view(-1, 28*28)

    (w1, b1, g1, be1,
     w2, b2, g2, be2,
     w3, b3, g3, be3,
     w4, b4) = params

    assert w1.shape[0] == K_IN, "forward hard-codes x.view(-1, 28*28)"
    num_units = w1.shape[1]
    out_features = w4.shape[1]
    assert out_features <= OUT_PAD

    gen = _tpu_generation()
    if use_int8 is None:
        # v5e/v6e MXU has a native int8 path (2x bf16 rate, half the bytes);
        # v7x has no int MXU path, so keep bf16 there.
        use_int8 = gen in (5, 6)
    act_dtype = jnp.int8 if use_int8 else jnp.bfloat16

    # Pre-binarize all weights OUTSIDE the kernel; +/-1 is exact in bf16/int8,
    # halving/quartering weight HBM bytes and removing in-kernel binarization.
    wb1 = jnp.pad(_sign_pm1(w1).astype(jnp.bfloat16),
                  ((0, K_PAD - K_IN), (0, 0)))                # zero rows: exact
    wb2 = _sign_pm1(w2).astype(act_dtype)
    wb3 = _sign_pm1(w3).astype(act_dtype)
    wb4 = jnp.zeros((num_units, OUT_PAD), act_dtype).at[:, :out_features].set(
        _sign_pm1(w4).astype(act_dtype))                      # zero pad columns
    b4p = jnp.full((1, OUT_PAD), -1e9, jnp.float32).at[:, :out_features].set(b4)

    x_pad = jnp.pad(x, ((0, 0), (0, K_PAD - K_IN)))           # zero cols: exact

    operands = (x_pad,
                wb1, b1, g1, be1,
                wb2, b2, g2, be2,
                wb3, b3, g3, be3,
                wb4, b4p)

    vmem = pl.BlockSpec(memory_space=pltpu.MemorySpace.VMEM)
    hbm = pl.BlockSpec(memory_space=pl.ANY)                   # streamed in-kernel
    in_specs = [vmem,
                vmem, vmem, vmem, vmem,
                hbm, vmem, vmem, vmem,
                hbm, vmem, vmem, vmem,
                hbm, vmem]

    # VMEM budget from actual residency, capped at 85% of physical VMEM
    # (headroom for compiler-internal scratch; per-generation, no 64 MiB clamp
    # on v5e/v6e).
    act_isz = jnp.dtype(act_dtype).itemsize
    resident = sum(int(a.size) * a.dtype.itemsize
                   for a, s in zip(operands, in_specs) if s is vmem)
    resident += B * OUT_PAD * 4                                # output
    resident += (2 * num_units * num_units + num_units * OUT_PAD) * act_isz
    resident += 8 * B * max(K_PAD, num_units) * 4              # f32 act slabs
    cap = int(0.85 * _physical_vmem_bytes(gen))
    vmem_limit = int(min(max(resident + (8 << 20), 16 << 20), cap))

    out = pl.pallas_call(
        binmnist_kernel,
        out_shape=jax.ShapeDtypeStruct((B, OUT_PAD), jnp.float32),
        in_specs=in_specs,
        out_specs=vmem,
        scratch_shapes=[
            pltpu.VMEM((2, num_units, num_units), act_dtype),  # W2 / W3 slots
            pltpu.VMEM((num_units, OUT_PAD), act_dtype),       # W4
            pltpu.SemaphoreType.DMA((3,)),
        ],
        compiler_params=pltpu.CompilerParams(vmem_limit_bytes=vmem_limit),
    )(*operands)

    return out[:, :out_features]


def init_params(key, in_features, out_features, num_units):
    """Deterministic init mirroring nn.Linear / BatchNorm1d defaults."""
    keys = jax.random.split(key, 8)

    def linear(kw, kb, fan_in, fan_out):
        bound = 1.0 / jnp.sqrt(fan_in)
        # stored already transposed: (in, out)
        w = jax.random.uniform(kw, (fan_in, fan_out), jnp.float32, -bound, bound)
        b = jax.random.uniform(kb, (1, fan_out), jnp.float32, -bound, bound)
        return w, b

    w1, b1 = linear(keys[0], keys[1], in_features, num_units)
    w2, b2 = linear(keys[2], keys[3], num_units, num_units)
    w3, b3 = linear(keys[4], keys[5], num_units, num_units)
    w4, b4 = linear(keys[6], keys[7], num_units, out_features)

    def bn(f):
        return jnp.ones((1, f), jnp.float32), jnp.zeros((1, f), jnp.float32)

    g1, be1 = bn(num_units)
    g2, be2 = bn(num_units)
    g3, be3 = bn(num_units)

    return (w1, b1, g1, be1, w2, b2, g2, be2, w3, b3, g3, be3, w4, b4)


if __name__ == "__main__":
    key = jax.random.PRNGKey(0)
    k_x, k_p = jax.random.split(key)

    B = 16                          # multiple of 16: clean bf16/int8 sublane packing
    in_features = K_IN              # fixed by x.view(-1, 28*28)
    out_features = 10
    num_units = 256                 # small stand-in for the 2048 default

    x = jax.random.normal(k_x, (B, 1, 28, 28), dtype=jnp.float32)
    params = init_params(k_p, in_features, out_features, num_units)

    try:
        out = binmnist_forward(x, params)              # auto dtype per generation
    except Exception:
        # Safety net: portable bf16 specialization for layers 2-4.
        out = binmnist_forward(x, params, use_int8=False)
    out = jax.block_until_ready(out)

    assert out.shape == (B, out_features)
    # log-softmax rows should sum to ~1 in prob space
    assert bool(jnp.all(jnp.abs(jnp.sum(jnp.exp(out), axis=1) - 1.0) < 1e-3))
    print("KERNEL_OK")
</pallas_src>

<mosaic_0001>
module attributes {stable_mosaic.version = 11 : i64} {
  func.func @binmnist_kernel(%arg0: memref<16x896xf32, #tpu.memory_space<vmem>>, %arg1: memref<896x256xbf16, #tpu.memory_space<vmem>>, %arg2: memref<1x256xf32, #tpu.memory_space<vmem>>, %arg3: memref<1x256xf32, #tpu.memory_space<vmem>>, %arg4: memref<1x256xf32, #tpu.memory_space<vmem>>, %arg5: memref<256x256xbf16, #tpu.memory_space<any>>, %arg6: memref<1x256xf32, #tpu.memory_space<vmem>>, %arg7: memref<1x256xf32, #tpu.memory_space<vmem>>, %arg8: memref<1x256xf32, #tpu.memory_space<vmem>>, %arg9: memref<256x256xbf16, #tpu.memory_space<any>>, %arg10: memref<1x256xf32, #tpu.memory_space<vmem>>, %arg11: memref<1x256xf32, #tpu.memory_space<vmem>>, %arg12: memref<1x256xf32, #tpu.memory_space<vmem>>, %arg13: memref<256x128xbf16, #tpu.memory_space<any>>, %arg14: memref<1x128xf32, #tpu.memory_space<vmem>>, %arg15: memref<16x128xf32, #tpu.memory_space<vmem>>, %arg16: memref<2x256x256xbf16, #tpu.memory_space<vmem>>, %arg17: memref<256x128xbf16, #tpu.memory_space<vmem>>, %arg18: memref<3x!tpu.dma_semaphore, #tpu.memory_space<semaphore_mem>>) attributes {dimension_semantics = [], scalar_prefetch = 0 : i64, scratch_operands = 3 : i64, tpu.core_type = #tpu.core_type<tc>} {
    %c0_i32 = arith.constant 0 : i32
    %c0_i32_0 = arith.constant 0 : i32
    %c0_i32_1 = arith.constant 0 : i32
    %c0_i32_2 = arith.constant 0 : i32
    %0 = tpu.memref_slice %arg16[%c0_i32, %c0_i32_1, %c0_i32_2] : memref<2x256x256xbf16, #tpu.memory_space<vmem>> -> memref<1x256x256xbf16, #tpu.memory_space<vmem>>
    %1 = tpu.memref_squeeze %0 : memref<1x256x256xbf16, #tpu.memory_space<vmem>> -> memref<256x256xbf16, #tpu.memory_space<vmem>>
    %2 = tpu.memref_slice %arg18[%c0_i32_0] : memref<3x!tpu.dma_semaphore, #tpu.memory_space<semaphore_mem>> -> memref<1x!tpu.dma_semaphore, #tpu.memory_space<semaphore_mem>>
    %3 = tpu.memref_squeeze %2 : memref<1x!tpu.dma_semaphore, #tpu.memory_space<semaphore_mem>> -> memref<!tpu.dma_semaphore, #tpu.memory_space<semaphore_mem>>
    tpu.enqueue_dma source(%arg5 : memref<256x256xbf16, #tpu.memory_space<any>>) target(%1 : memref<256x256xbf16, #tpu.memory_space<vmem>>) target_semaphore(%3 : memref<!tpu.dma_semaphore, #tpu.memory_space<semaphore_mem>>)
    %c1_i32 = arith.constant 1 : i32
    %c1_i32_3 = arith.constant 1 : i32
    %c0_i32_4 = arith.constant 0 : i32
    %c0_i32_5 = arith.constant 0 : i32
    %4 = tpu.memref_slice %arg16[%c1_i32, %c0_i32_4, %c0_i32_5] : memref<2x256x256xbf16, #tpu.memory_space<vmem>> -> memref<1x256x256xbf16, #tpu.memory_space<vmem>>
    %5 = tpu.memref_squeeze %4 : memref<1x256x256xbf16, #tpu.memory_space<vmem>> -> memref<256x256xbf16, #tpu.memory_space<vmem>>
    %6 = tpu.memref_slice %arg18[%c1_i32_3] : memref<3x!tpu.dma_semaphore, #tpu.memory_space<semaphore_mem>> -> memref<1x!tpu.dma_semaphore, #tpu.memory_space<semaphore_mem>>
    %7 = tpu.memref_squeeze %6 : memref<1x!tpu.dma_semaphore, #tpu.memory_space<semaphore_mem>> -> memref<!tpu.dma_semaphore, #tpu.memory_space<semaphore_mem>>
    tpu.enqueue_dma source(%arg9 : memref<256x256xbf16, #tpu.memory_space<any>>) target(%5 : memref<256x256xbf16, #tpu.memory_space<vmem>>) target_semaphore(%7 : memref<!tpu.dma_semaphore, #tpu.memory_space<semaphore_mem>>)
    %c2_i32 = arith.constant 2 : i32
    %8 = tpu.memref_slice %arg18[%c2_i32] : memref<3x!tpu.dma_semaphore, #tpu.memory_space<semaphore_mem>> -> memref<1x!tpu.dma_semaphore, #tpu.memory_space<semaphore_mem>>
    %9 = tpu.memref_squeeze %8 : memref<1x!tpu.dma_semaphore, #tpu.memory_space<semaphore_mem>> -> memref<!tpu.dma_semaphore, #tpu.memory_space<semaphore_mem>>
    tpu.enqueue_dma source(%arg13 : memref<256x128xbf16, #tpu.memory_space<any>>) target(%arg17 : memref<256x128xbf16, #tpu.memory_space<vmem>>) target_semaphore(%9 : memref<!tpu.dma_semaphore, #tpu.memory_space<semaphore_mem>>)
    %c0 = arith.constant 0 : index
    %c0_6 = arith.constant 0 : index
    %10 = vector.load %arg0[%c0, %c0_6] : memref<16x896xf32, #tpu.memory_space<vmem>>, vector<16x896xf32>
    %11 = arith.truncf %10 : vector<16x896xf32> to vector<16x896xbf16>
    %12 = arith.extf %11 : vector<16x896xbf16> to vector<16x896xf32>
    %13 = arith.subf %10, %12 : vector<16x896xf32>
    %14 = arith.truncf %13 : vector<16x896xf32> to vector<16x896xbf16>
    %c0_7 = arith.constant 0 : index
    %c0_8 = arith.constant 0 : index
    %15 = vector.load %arg1[%c0_7, %c0_8] : memref<896x256xbf16, #tpu.memory_space<vmem>>, vector<896x256xbf16>
    %cst = arith.constant dense<0.000000e+00> : vector<16x256xf32>
    %16 = tpu.matmul %11, %15, %cst {dimension_numbers = #tpu.dot_dimension_numbers<[1], [0], [0], [1], [0, 0, 1, 1], [], []>} : vector<16x896xbf16>, vector<896x256xbf16>, vector<16x256xf32> -> vector<16x256xf32>
    %cst_9 = arith.constant dense<0.000000e+00> : vector<16x256xf32>
    %17 = tpu.matmul %14, %15, %cst_9 {dimension_numbers = #tpu.dot_dimension_numbers<[1], [0], [0], [1], [0, 0, 1, 1], [], []>} : vector<16x896xbf16>, vector<896x256xbf16>, vector<16x256xf32> -> vector<16x256xf32>
    %18 = arith.addf %16, %17 : vector<16x256xf32>
    %c0_10 = arith.constant 0 : index
    %c0_11 = arith.constant 0 : index
    %19 = vector.load %arg2[%c0_10, %c0_11] : memref<1x256xf32, #tpu.memory_space<vmem>>, vector<1x256xf32>
    %20 = vector.broadcast %19 : vector<1x256xf32> to vector<16x256xf32>
    %21 = arith.addf %18, %20 : vector<16x256xf32>
    %cst_12 = arith.constant 0.000000e+00 : f32
    %22 = vector.broadcast %cst_12 : f32 to vector<16x256xf32>
    %23 = arith.maximumf %21, %22 : vector<16x256xf32>
    %cst_13 = arith.constant dense<0.000000e+00> : vector<256xf32>
    %24 = vector.multi_reduction <add>, %23, %cst_13 [0] : vector<16x256xf32> to vector<256xf32>
    %25 = vector.shape_cast %24 : vector<256xf32> to vector<1x256xf32>
    %26 = arith.mulf %23, %23 : vector<16x256xf32>
    %cst_14 = arith.constant dense<0.000000e+00> : vector<256xf32>
    %27 = vector.multi_reduction <add>, %26, %cst_14 [0] : vector<16x256xf32> to vector<256xf32>
    %28 = vector.shape_cast %27 : vector<256xf32> to vector<1x256xf32>
    %cst_15 = arith.constant 6.250000e-02 : f32
    %29 = vector.broadcast %cst_15 : f32 to vector<1x256xf32>
    %30 = arith.mulf %25, %29 : vector<1x256xf32>
    %cst_16 = arith.constant 6.250000e-02 : f32
    %31 = vector.broadcast %cst_16 : f32 to vector<1x256xf32>
    %32 = arith.mulf %28, %31 : vector<1x256xf32>
    %33 = arith.mulf %30, %30 : vector<1x256xf32>
    %34 = arith.subf %32, %33 : vector<1x256xf32>
    %cst_17 = arith.constant 0.000000e+00 : f32
    %35 = vector.broadcast %cst_17 : f32 to vector<1x256xf32>
    %36 = arith.maximumf %34, %35 : vector<1x256xf32>
    %c0_18 = arith.constant 0 : index
    %c0_19 = arith.constant 0 : index
    %37 = vector.load %arg4[%c0_18, %c0_19] : memref<1x256xf32, #tpu.memory_space<vmem>>, vector<1x256xf32>
    %cst_20 = arith.constant 9.99999974E-5 : f32
    %38 = vector.broadcast %cst_20 : f32 to vector<1x256xf32>
    %39 = arith.addf %36, %38 : vector<1x256xf32>
    %40 = math.sqrt %39 : vector<1x256xf32>
    %41 = arith.mulf %37, %40 : vector<1x256xf32>
    %c0_21 = arith.constant 0 : index
    %c0_22 = arith.constant 0 : index
    %42 = vector.load %arg3[%c0_21, %c0_22] : memref<1x256xf32, #tpu.memory_space<vmem>>, vector<1x256xf32>
    %43 = arith.mulf %42, %30 : vector<1x256xf32>
    %44 = arith.subf %41, %43 : vector<1x256xf32>
    %c0_23 = arith.constant 0 : index
    %c0_24 = arith.constant 0 : index
    %45 = vector.load %arg3[%c0_23, %c0_24] : memref<1x256xf32, #tpu.memory_space<vmem>>, vector<1x256xf32>
    %46 = vector.broadcast %45 : vector<1x256xf32> to vector<16x256xf32>
    %47 = arith.mulf %46, %23 : vector<16x256xf32>
    %48 = vector.broadcast %44 : vector<1x256xf32> to vector<16x256xf32>
    %49 = arith.addf %47, %48 : vector<16x256xf32>
    %cst_25 = arith.constant 0.000000e+00 : f32
    %50 = vector.broadcast %cst_25 : f32 to vector<16x256xf32>
    %51 = arith.cmpf oge, %49, %50 : vector<16x256xf32>
    %cst_26 = arith.constant 1.000000e+00 : f32
    %cst_27 = arith.constant -1.000000e+00 : f32
    %52 = vector.broadcast %cst_26 : f32 to vector<16x256xf32>
    %53 = vector.broadcast %cst_27 : f32 to vector<16x256xf32>
    %54 = arith.select %51, %52, %53 : vector<16x256xi1>, vector<16x256xf32>
    %55 = arith.truncf %54 : vector<16x256xf32> to vector<16x256xbf16>
    %c0_i32_28 = arith.constant 0 : i32
    %c0_i32_29 = arith.constant 0 : i32
    %c0_i32_30 = arith.constant 0 : i32
    %c0_i32_31 = arith.constant 0 : i32
    %56 = tpu.memref_slice %arg16[%c0_i32_28, %c0_i32_30, %c0_i32_31] : memref<2x256x256xbf16, #tpu.memory_space<vmem>> -> memref<1x256x256xbf16, #tpu.memory_space<vmem>>
    %57 = tpu.memref_squeeze %56 : memref<1x256x256xbf16, #tpu.memory_space<vmem>> -> memref<256x256xbf16, #tpu.memory_space<vmem>>
    %58 = tpu.memref_slice %arg18[%c0_i32_29] : memref<3x!tpu.dma_semaphore, #tpu.memory_space<semaphore_mem>> -> memref<1x!tpu.dma_semaphore, #tpu.memory_space<semaphore_mem>>
    %59 = tpu.memref_squeeze %58 : memref<1x!tpu.dma_semaphore, #tpu.memory_space<semaphore_mem>> -> memref<!tpu.dma_semaphore, #tpu.memory_space<semaphore_mem>>
    tpu.wait_dma2 semaphore(%59 : memref<!tpu.dma_semaphore, #tpu.memory_space<semaphore_mem>>) src(%arg5 : memref<256x256xbf16, #tpu.memory_space<any>>) dst(%57 : memref<256x256xbf16, #tpu.memory_space<vmem>>)
    %c0_32 = arith.constant 0 : index
    %c0_33 = arith.constant 0 : index
    %c0_34 = arith.constant 0 : index
    %60 = vector.load %arg16[%c0_32, %c0_33, %c0_34] : memref<2x256x256xbf16, #tpu.memory_space<vmem>>, vector<1x256x256xbf16>
    %61 = vector.shape_cast %60 : vector<1x256x256xbf16> to vector<256x256xbf16>
    %cst_35 = arith.constant dense<0.000000e+00> : vector<16x256xf32>
    %62 = tpu.matmul %55, %61, %cst_35 {dimension_numbers = #tpu.dot_dimension_numbers<[1], [0], [0], [1], [0, 0, 1, 1], [], []>} : vector<16x256xbf16>, vector<256x256xbf16>, vector<16x256xf32> -> vector<16x256xf32>
    %c0_36 = arith.constant 0 : index
    %c0_37 = arith.constant 0 : index
    %63 = vector.load %arg6[%c0_36, %c0_37] : memref<1x256xf32, #tpu.memory_space<vmem>>, vector<1x256xf32>
    %64 = vector.broadcast %63 : vector<1x256xf32> to vector<16x256xf32>
    %65 = arith.addf %62, %64 : vector<16x256xf32>
    %cst_38 = arith.constant 0.000000e+00 : f32
    %66 = vector.broadcast %cst_38 : f32 to vector<16x256xf32>
    %67 = arith.maximumf %65, %66 : vector<16x256xf32>
    %cst_39 = arith.constant dense<0.000000e+00> : vector<256xf32>
    %68 = vector.multi_reduction <add>, %67, %cst_39 [0] : vector<16x256xf32> to vector<256xf32>
    %69 = vector.shape_cast %68 : vector<256xf32> to vector<1x256xf32>
    %70 = arith.mulf %67, %67 : vector<16x256xf32>
    %cst_40 = arith.constant dense<0.000000e+00> : vector<256xf32>
    %71 = vector.multi_reduction <add>, %70, %cst_40 [0] : vector<16x256xf32> to vector<256xf32>
    %72 = vector.shape_cast %71 : vector<256xf32> to vector<1x256xf32>
    %cst_41 = arith.constant 6.250000e-02 : f32
    %73 = vector.broadcast %cst_41 : f32 to vector<1x256xf32>
    %74 = arith.mulf %69, %73 : vector<1x256xf32>
    %cst_42 = arith.constant 6.250000e-02 : f32
    %75 = vector.broadcast %cst_42 : f32 to vector<1x256xf32>
    %76 = arith.mulf %72, %75 : vector<1x256xf32>
    %77 = arith.mulf %74, %74 : vector<1x256xf32>
    %78 = arith.subf %76, %77 : vector<1x256xf32>
    %cst_43 = arith.constant 0.000000e+00 : f32
    %79 = vector.broadcast %cst_43 : f32 to vector<1x256xf32>
    %80 = arith.maximumf %78, %79 : vector<1x256xf32>
    %c0_44 = arith.constant 0 : index
    %c0_45 = arith.constant 0 : index
    %81 = vector.load %arg8[%c0_44, %c0_45] : memref<1x256xf32, #tpu.memory_space<vmem>>, vector<1x256xf32>
    %cst_46 = arith.constant 9.99999974E-5 : f32
    %82 = vector.broadcast %cst_46 : f32 to vector<1x256xf32>
    %83 = arith.addf %80, %82 : vector<1x256xf32>
    %84 = math.sqrt %83 : vector<1x256xf32>
    %85 = arith.mulf %81, %84 : vector<1x256xf32>
    %c0_47 = arith.constant 0 : index
    %c0_48 = arith.constant 0 : index
    %86 = vector.load %arg7[%c0_47, %c0_48] : memref<1x256xf32, #tpu.memory_space<vmem>>, vector<1x256xf32>
    %87 = arith.mulf %86, %74 : vector<1x256xf32>
    %88 = arith.subf %85, %87 : vector<1x256xf32>
    %c0_49 = arith.constant 0 : index
    %c0_50 = arith.constant 0 : index
    %89 = vector.load %arg7[%c0_49, %c0_50] : memref<1x256xf32, #tpu.memory_space<vmem>>, vector<1x256xf32>
    %90 = vector.broadcast %89 : vector<1x256xf32> to vector<16x256xf32>
    %91 = arith.mulf %90, %67 : vector<16x256xf32>
    %92 = vector.broadcast %88 : vector<1x256xf32> to vector<16x256xf32>
    %93 = arith.addf %91, %92 : vector<16x256xf32>
    %cst_51 = arith.constant 0.000000e+00 : f32
    %94 = vector.broadcast %cst_51 : f32 to vector<16x256xf32>
    %95 = arith.cmpf oge, %93, %94 : vector<16x256xf32>
    %cst_52 = arith.constant 1.000000e+00 : f32
    %cst_53 = arith.constant -1.000000e+00 : f32
    %96 = vector.broadcast %cst_52 : f32 to vector<16x256xf32>
    %97 = vector.broadcast %cst_53 : f32 to vector<16x256xf32>
    %98 = arith.select %95, %96, %97 : vector<16x256xi1>, vector<16x256xf32>
    %99 = arith.truncf %98 : vector<16x256xf32> to vector<16x256xbf16>
    %c1_i32_54 = arith.constant 1 : i32
    %c1_i32_55 = arith.constant 1 : i32
    %c0_i32_56 = arith.constant 0 : i32
    %c0_i32_57 = arith.constant 0 : i32
    %100 = tpu.memref_slice %arg16[%c1_i32_54, %c0_i32_56, %c0_i32_57] : memref<2x256x256xbf16, #tpu.memory_space<vmem>> -> memref<1x256x256xbf16, #tpu.memory_space<vmem>>
    %101 = tpu.memref_squeeze %100 : memref<1x256x256xbf16, #tpu.memory_space<vmem>> -> memref<256x256xbf16, #tpu.memory_space<vmem>>
    %102 = tpu.memref_slice %arg18[%c1_i32_55] : memref<3x!tpu.dma_semaphore, #tpu.memory_space<semaphore_mem>> -> memref<1x!tpu.dma_semaphore, #tpu.memory_space<semaphore_mem>>
    %103 = tpu.memref_squeeze %102 : memref<1x!tpu.dma_semaphore, #tpu.memory_space<semaphore_mem>> -> memref<!tpu.dma_semaphore, #tpu.memory_space<semaphore_mem>>
    tpu.wait_dma2 semaphore(%103 : memref<!tpu.dma_semaphore, #tpu.memory_space<semaphore_mem>>) src(%arg9 : memref<256x256xbf16, #tpu.memory_space<any>>) dst(%101 : memref<256x256xbf16, #tpu.memory_space<vmem>>)
    %c1 = arith.constant 1 : index
    %c0_58 = arith.constant 0 : index
    %c0_59 = arith.constant 0 : index
    %104 = vector.load %arg16[%c1, %c0_58, %c0_59] : memref<2x256x256xbf16, #tpu.memory_space<vmem>>, vector<1x256x256xbf16>
    %105 = vector.shape_cast %104 : vector<1x256x256xbf16> to vector<256x256xbf16>
    %cst_60 = arith.constant dense<0.000000e+00> : vector<16x256xf32>
    %106 = tpu.matmul %99, %105, %cst_60 {dimension_numbers = #tpu.dot_dimension_numbers<[1], [0], [0], [1], [0, 0, 1, 1], [], []>} : vector<16x256xbf16>, vector<256x256xbf16>, vector<16x256xf32> -> vector<16x256xf32>
    %c0_61 = arith.constant 0 : index
    %c0_62 = arith.constant 0 : index
    %107 = vector.load %arg10[%c0_61, %c0_62] : memref<1x256xf32, #tpu.memory_space<vmem>>, vector<1x256xf32>
    %108 = vector.broadcast %107 : vector<1x256xf32> to vector<16x256xf32>
    %109 = arith.addf %106, %108 : vector<16x256xf32>
    %cst_63 = arith.constant 0.000000e+00 : f32
    %110 = vector.broadcast %cst_63 : f32 to vector<16x256xf32>
    %111 = arith.maximumf %109, %110 : vector<16x256xf32>
    %cst_64 = arith.constant dense<0.000000e+00> : vector<256xf32>
    %112 = vector.multi_reduction <add>, %111, %cst_64 [0] : vector<16x256xf32> to vector<256xf32>
    %113 = vector.shape_cast %112 : vector<256xf32> to vector<1x256xf32>
    %114 = arith.mulf %111, %111 : vector<16x256xf32>
    %cst_65 = arith.constant dense<0.000000e+00> : vector<256xf32>
    %115 = vector.multi_reduction <add>, %114, %cst_65 [0] : vector<16x256xf32> to vector<256xf32>
    %116 = vector.shape_cast %115 : vector<256xf32> to vector<1x256xf32>
    %cst_66 = arith.constant 6.250000e-02 : f32
    %117 = vector.broadcast %cst_66 : f32 to vector<1x256xf32>
    %118 = arith.mulf %113, %117 : vector<1x256xf32>
    %cst_67 = arith.constant 6.250000e-02 : f32
    %119 = vector.broadcast %cst_67 : f32 to vector<1x256xf32>
    %120 = arith.mulf %116, %119 : vector<1x256xf32>
    %121 = arith.mulf %118, %118 : vector<1x256xf32>
    %122 = arith.subf %120, %121 : vector<1x256xf32>
    %cst_68 = arith.constant 0.000000e+00 : f32
    %123 = vector.broadcast %cst_68 : f32 to vector<1x256xf32>
    %124 = arith.maximumf %122, %123 : vector<1x256xf32>
    %c0_69 = arith.constant 0 : index
    %c0_70 = arith.constant 0 : index
    %125 = vector.load %arg12[%c0_69, %c0_70] : memref<1x256xf32, #tpu.memory_space<vmem>>, vector<1x256xf32>
    %cst_71 = arith.constant 9.99999974E-5 : f32
    %126 = vector.broadcast %cst_71 : f32 to vector<1x256xf32>
    %127 = arith.addf %124, %126 : vector<1x256xf32>
    %128 = math.sqrt %127 : vector<1x256xf32>
    %129 = arith.mulf %125, %128 : vector<1x256xf32>
    %c0_72 = arith.constant 0 : index
    %c0_73 = arith.constant 0 : index
    %130 = vector.load %arg11[%c0_72, %c0_73] : memref<1x256xf32, #tpu.memory_space<vmem>>, vector<1x256xf32>
    %131 = arith.mulf %130, %118 : vector<1x256xf32>
    %132 = arith.subf %129, %131 : vector<1x256xf32>
    %c0_74 = arith.constant 0 : index
    %c0_75 = arith.constant 0 : index
    %133 = vector.load %arg11[%c0_74, %c0_75] : memref<1x256xf32, #tpu.memory_space<vmem>>, vector<1x256xf32>
    %134 = vector.broadcast %133 : vector<1x256xf32> to vector<16x256xf32>
    %135 = arith.mulf %134, %111 : vector<16x256xf32>
    %136 = vector.broadcast %132 : vector<1x256xf32> to vector<16x256xf32>
    %137 = arith.addf %135, %136 : vector<16x256xf32>
    %cst_76 = arith.constant 0.000000e+00 : f32
    %138 = vector.broadcast %cst_76 : f32 to vector<16x256xf32>
    %139 = arith.cmpf oge, %137, %138 : vector<16x256xf32>
    %cst_77 = arith.constant 1.000000e+00 : f32
    %cst_78 = arith.constant -1.000000e+00 : f32
    %140 = vector.broadcast %cst_77 : f32 to vector<16x256xf32>
    %141 = vector.broadcast %cst_78 : f32 to vector<16x256xf32>
    %142 = arith.select %139, %140, %141 : vector<16x256xi1>, vector<16x256xf32>
    %143 = arith.truncf %142 : vector<16x256xf32> to vector<16x256xbf16>
    %c2_i32_79 = arith.constant 2 : i32
    %144 = tpu.memref_slice %arg18[%c2_i32_79] : memref<3x!tpu.dma_semaphore, #tpu.memory_space<semaphore_mem>> -> memref<1x!tpu.dma_semaphore, #tpu.memory_space<semaphore_mem>>
    %145 = tpu.memref_squeeze %144 : memref<1x!tpu.dma_semaphore, #tpu.memory_space<semaphore_mem>> -> memref<!tpu.dma_semaphore, #tpu.memory_space<semaphore_mem>>
    tpu.wait_dma2 semaphore(%145 : memref<!tpu.dma_semaphore, #tpu.memory_space<semaphore_mem>>) src(%arg13 : memref<256x128xbf16, #tpu.memory_space<any>>) dst(%arg17 : memref<256x128xbf16, #tpu.memory_space<vmem>>)
    %c0_80 = arith.constant 0 : index
    %c0_81 = arith.constant 0 : index
    %146 = vector.load %arg17[%c0_80, %c0_81] : memref<256x128xbf16, #tpu.memory_space<vmem>>, vector<256x128xbf16>
    %cst_82 = arith.constant dense<0.000000e+00> : vector<16x128xf32>
    %147 = tpu.matmul %143, %146, %cst_82 {dimension_numbers = #tpu.dot_dimension_numbers<[1], [0], [0], [1], [0, 0, 1, 1], [], []>} : vector<16x256xbf16>, vector<256x128xbf16>, vector<16x128xf32> -> vector<16x128xf32>
    %c0_83 = arith.constant 0 : index
    %c0_84 = arith.constant 0 : index
    %148 = vector.load %arg14[%c0_83, %c0_84] : memref<1x128xf32, #tpu.memory_space<vmem>>, vector<1x128xf32>
    %149 = vector.broadcast %148 : vector<1x128xf32> to vector<16x128xf32>
    %150 = arith.addf %147, %149 : vector<16x128xf32>
    %cst_85 = arith.constant dense<0xFF800000> : vector<16xf32>
    %151 = vector.multi_reduction <maximumf>, %150, %cst_85 [1] : vector<16x128xf32> to vector<16xf32>
    %152 = vector.shape_cast %151 : vector<16xf32> to vector<16x1xf32>
    %153 = vector.broadcast %152 : vector<16x1xf32> to vector<16x128xf32>
    %154 = arith.subf %150, %153 : vector<16x128xf32>
    %155 = math.exp %154 : vector<16x128xf32>
    %cst_86 = arith.constant dense<0.000000e+00> : vector<16xf32>
    %156 = vector.multi_reduction <add>, %155, %cst_86 [1] : vector<16x128xf32> to vector<16xf32>
    %157 = vector.shape_cast %156 : vector<16xf32> to vector<16x1xf32>
    %158 = math.log %157 : vector<16x1xf32>
    %159 = vector.broadcast %158 : vector<16x1xf32> to vector<16x128xf32>
    %160 = arith.subf %154, %159 : vector<16x128xf32>
    %c0_87 = arith.constant 0 : index
    %c0_88 = arith.constant 0 : index
    %161 = vector.load %arg15[%c0_87, %c0_88] : memref<16x128xf32, #tpu.memory_space<vmem>>, vector<16x128xf32>
    tpu.vector_store %arg15[%c0_87, %c0_88], %160 {strides = array<i32>} : memref<16x128xf32, #tpu.memory_space<vmem>>, vector<16x128xf32>,
    return
  }
}

module attributes {stable_mosaic.version = 11 : i64} {
  func.func @binmnist_kernel(%arg0: memref<16x896xf32, #tpu.memory_space<vmem>>, %arg1: memref<896x256xbf16, #tpu.memory_space<vmem>>, %arg2: memref<1x256xf32, #tpu.memory_space<vmem>>, %arg3: memref<1x256xf32, #tpu.memory_space<vmem>>, %arg4: memref<1x256xf32, #tpu.memory_space<vmem>>, %arg5: memref<256x256xbf16, #tpu.memory_space<any>>, %arg6: memref<1x256xf32, #tpu.memory_space<vmem>>, %arg7: memref<1x256xf32, #tpu.memory_space<vmem>>, %arg8: memref<1x256xf32, #tpu.memory_space<vmem>>, %arg9: memref<256x256xbf16, #tpu.memory_space<any>>, %arg10: memref<1x256xf32, #tpu.memory_space<vmem>>, %arg11: memref<1x256xf32, #tpu.memory_space<vmem>>, %arg12: memref<1x256xf32, #tpu.memory_space<vmem>>, %arg13: memref<256x128xbf16, #tpu.memory_space<any>>, %arg14: memref<1x128xf32, #tpu.memory_space<vmem>>, %arg15: memref<16x128xf32, #tpu.memory_space<vmem>>, %arg16: memref<2x256x256xbf16, #tpu.memory_space<vmem>>, %arg17: memref<256x128xbf16, #tpu.memory_space<vmem>>, %arg18: memref<3x!tpu.dma_semaphore, #tpu.memory_space<semaphore_mem>>) attributes {dimension_semantics = [], scalar_prefetch = 0 : i64, scratch_operands = 3 : i64, tpu.core_type = #tpu.core_type<tc>} {
    %c0_i32 = arith.constant 0 : i32
    %c0_i32_0 = arith.constant 0 : i32
    %c0_i32_1 = arith.constant 0 : i32
    %c0_i32_2 = arith.constant 0 : i32
    %0 = tpu.memref_slice %arg16[%c0_i32, %c0_i32_1, %c0_i32_2] : memref<2x256x256xbf16, #tpu.memory_space<vmem>> -> memref<1x256x256xbf16, #tpu.memory_space<vmem>>
    %1 = tpu.memref_squeeze %0 : memref<1x256x256xbf16, #tpu.memory_space<vmem>> -> memref<256x256xbf16, #tpu.memory_space<vmem>>
    %2 = tpu.memref_slice %arg18[%c0_i32_0] : memref<3x!tpu.dma_semaphore, #tpu.memory_space<semaphore_mem>> -> memref<1x!tpu.dma_semaphore, #tpu.memory_space<semaphore_mem>>
    %3 = tpu.memref_squeeze %2 : memref<1x!tpu.dma_semaphore, #tpu.memory_space<semaphore_mem>> -> memref<!tpu.dma_semaphore, #tpu.memory_space<semaphore_mem>>
    tpu.enqueue_dma source(%arg5 : memref<256x256xbf16, #tpu.memory_space<any>>) target(%1 : memref<256x256xbf16, #tpu.memory_space<vmem>>) target_semaphore(%3 : memref<!tpu.dma_semaphore, #tpu.memory_space<semaphore_mem>>)
    %c1_i32 = arith.constant 1 : i32
    %c1_i32_3 = arith.constant 1 : i32
    %c0_i32_4 = arith.constant 0 : i32
    %c0_i32_5 = arith.constant 0 : i32
    %4 = tpu.memref_slice %arg16[%c1_i32, %c0_i32_4, %c0_i32_5] : memref<2x256x256xbf16, #tpu.memory_space<vmem>> -> memref<1x256x256xbf16, #tpu.memory_space<vmem>>
    %5 = tpu.memref_squeeze %4 : memref<1x256x256xbf16, #tpu.memory_space<vmem>> -> memref<256x256xbf16, #tpu.memory_space<vmem>>
    %6 = tpu.memref_slice %arg18[%c1_i32_3] : memref<3x!tpu.dma_semaphore, #tpu.memory_space<semaphore_mem>> -> memref<1x!tpu.dma_semaphore, #tpu.memory_space<semaphore_mem>>
    %7 = tpu.memref_squeeze %6 : memref<1x!tpu.dma_semaphore, #tpu.memory_space<semaphore_mem>> -> memref<!tpu.dma_semaphore, #tpu.memory_space<semaphore_mem>>
    tpu.enqueue_dma source(%arg9 : memref<256x256xbf16, #tpu.memory_space<any>>) target(%5 : memref<256x256xbf16, #tpu.memory_space<vmem>>) target_semaphore(%7 : memref<!tpu.dma_semaphore, #tpu.memory_space<semaphore_mem>>)
    %c2_i32 = arith.constant 2 : i32
    %8 = tpu.memref_slice %arg18[%c2_i32] : memref<3x!tpu.dma_semaphore, #tpu.memory_space<semaphore_mem>> -> memref<1x!tpu.dma_semaphore, #tpu.memory_space<semaphore_mem>>
    %9 = tpu.memref_squeeze %8 : memref<1x!tpu.dma_semaphore, #tpu.memory_space<semaphore_mem>> -> memref<!tpu.dma_semaphore, #tpu.memory_space<semaphore_mem>>
    tpu.enqueue_dma source(%arg13 : memref<256x128xbf16, #tpu.memory_space<any>>) target(%arg17 : memref<256x128xbf16, #tpu.memory_space<vmem>>) target_semaphore(%9 : memref<!tpu.dma_semaphore, #tpu.memory_space<semaphore_mem>>)
    %c0 = arith.constant 0 : index
    %c0_6 = arith.constant 0 : index
    %10 = vector.load %arg0[%c0, %c0_6] : memref<16x896xf32, #tpu.memory_space<vmem>>, vector<16x896xf32>
    %11 = arith.truncf %10 : vector<16x896xf32> to vector<16x896xbf16>
    %12 = arith.extf %11 : vector<16x896xbf16> to vector<16x896xf32>
    %13 = arith.subf %10, %12 : vector<16x896xf32>
    %14 = arith.truncf %13 : vector<16x896xf32> to vector<16x896xbf16>
    %c0_7 = arith.constant 0 : index
    %c0_8 = arith.constant 0 : index
    %15 = vector.load %arg1[%c0_7, %c0_8] : memref<896x256xbf16, #tpu.memory_space<vmem>>, vector<896x256xbf16>
    %cst = arith.constant dense<0.000000e+00> : vector<16x256xf32>
    %16 = tpu.matmul %11, %15, %cst {dimension_numbers = #tpu.dot_dimension_numbers<[1], [0], [0], [1], [0, 0, 1, 1], [], []>} : vector<16x896xbf16>, vector<896x256xbf16>, vector<16x256xf32> -> vector<16x256xf32>
    %cst_9 = arith.constant dense<0.000000e+00> : vector<16x256xf32>
    %17 = tpu.matmul %14, %15, %cst_9 {dimension_numbers = #tpu.dot_dimension_numbers<[1], [0], [0], [1], [0, 0, 1, 1], [], []>} : vector<16x896xbf16>, vector<896x256xbf16>, vector<16x256xf32> -> vector<16x256xf32>
    %18 = arith.addf %16, %17 : vector<16x256xf32>
    %c0_10 = arith.constant 0 : index
    %c0_11 = arith.constant 0 : index
    %19 = vector.load %arg2[%c0_10, %c0_11] : memref<1x256xf32, #tpu.memory_space<vmem>>, vector<1x256xf32>
    %20 = vector.broadcast %19 : vector<1x256xf32> to vector<16x256xf32>
    %21 = arith.addf %18, %20 : vector<16x256xf32>
    %cst_12 = arith.constant 0.000000e+00 : f32
    %22 = vector.broadcast %cst_12 : f32 to vector<16x256xf32>
    %23 = arith.maximumf %21, %22 : vector<16x256xf32>
    %cst_13 = arith.constant dense<0.000000e+00> : vector<256xf32>
    %24 = vector.multi_reduction <add>, %23, %cst_13 [0] : vector<16x256xf32> to vector<256xf32>
    %25 = vector.shape_cast %24 : vector<256xf32> to vector<1x256xf32>
    %26 = arith.mulf %23, %23 : vector<16x256xf32>
    %cst_14 = arith.constant dense<0.000000e+00> : vector<256xf32>
    %27 = vector.multi_reduction <add>, %26, %cst_14 [0] : vector<16x256xf32> to vector<256xf32>
    %28 = vector.shape_cast %27 : vector<256xf32> to vector<1x256xf32>
    %cst_15 = arith.constant 6.250000e-02 : f32
    %29 = vector.broadcast %cst_15 : f32 to vector<1x256xf32>
    %30 = arith.mulf %25, %29 : vector<1x256xf32>
    %cst_16 = arith.constant 6.250000e-02 : f32
    %31 = vector.broadcast %cst_16 : f32 to vector<1x256xf32>
    %32 = arith.mulf %28, %31 : vector<1x256xf32>
    %33 = arith.mulf %30, %30 : vector<1x256xf32>
    %34 = arith.subf %32, %33 : vector<1x256xf32>
    %cst_17 = arith.constant 0.000000e+00 : f32
    %35 = vector.broadcast %cst_17 : f32 to vector<1x256xf32>
    %36 = arith.maximumf %34, %35 : vector<1x256xf32>
    %c0_18 = arith.constant 0 : index
    %c0_19 = arith.constant 0 : index
    %37 = vector.load %arg4[%c0_18, %c0_19] : memref<1x256xf32, #tpu.memory_space<vmem>>, vector<1x256xf32>
    %cst_20 = arith.constant 9.99999974E-5 : f32
    %38 = vector.broadcast %cst_20 : f32 to vector<1x256xf32>
    %39 = arith.addf %36, %38 : vector<1x256xf32>
    %40 = math.sqrt %39 : vector<1x256xf32>
    %41 = arith.mulf %37, %40 : vector<1x256xf32>
    %c0_21 = arith.constant 0 : index
    %c0_22 = arith.constant 0 : index
    %42 = vector.load %arg3[%c0_21, %c0_22] : memref<1x256xf32, #tpu.memory_space<vmem>>, vector<1x256xf32>
    %43 = arith.mulf %42, %30 : vector<1x256xf32>
    %44 = arith.subf %41, %43 : vector<1x256xf32>
    %c0_23 = arith.constant 0 : index
    %c0_24 = arith.constant 0 : index
    %45 = vector.load %arg3[%c0_23, %c0_24] : memref<1x256xf32, #tpu.memory_space<vmem>>, vector<1x256xf32>
    %46 = vector.broadcast %45 : vector<1x256xf32> to vector<16x256xf32>
    %47 = arith.mulf %46, %23 : vector<16x256xf32>
    %48 = vector.broadcast %44 : vector<1x256xf32> to vector<16x256xf32>
    %49 = arith.addf %47, %48 : vector<16x256xf32>
    %cst_25 = arith.constant 0.000000e+00 : f32
    %50 = vector.broadcast %cst_25 : f32 to vector<16x256xf32>
    %51 = arith.cmpf oge, %49, %50 : vector<16x256xf32>
    %cst_26 = arith.constant 1.000000e+00 : f32
    %cst_27 = arith.constant -1.000000e+00 : f32
    %52 = vector.broadcast %cst_26 : f32 to vector<16x256xf32>
    %53 = vector.broadcast %cst_27 : f32 to vector<16x256xf32>
    %54 = arith.select %51, %52, %53 : vector<16x256xi1>, vector<16x256xf32>
    %55 = arith.truncf %54 : vector<16x256xf32> to vector<16x256xbf16>
    %c0_i32_28 = arith.constant 0 : i32
    %c0_i32_29 = arith.constant 0 : i32
    %c0_i32_30 = arith.constant 0 : i32
    %c0_i32_31 = arith.constant 0 : i32
    %56 = tpu.memref_slice %arg16[%c0_i32_28, %c0_i32_30, %c0_i32_31] : memref<2x256x256xbf16, #tpu.memory_space<vmem>> -> memref<1x256x256xbf16, #tpu.memory_space<vmem>>
    %57 = tpu.memref_squeeze %56 : memref<1x256x256xbf16, #tpu.memory_space<vmem>> -> memref<256x256xbf16, #tpu.memory_space<vmem>>
    %58 = tpu.memref_slice %arg18[%c0_i32_29] : memref<3x!tpu.dma_semaphore, #tpu.memory_space<semaphore_mem>> -> memref<1x!tpu.dma_semaphore, #tpu.memory_space<semaphore_mem>>
    %59 = tpu.memref_squeeze %58 : memref<1x!tpu.dma_semaphore, #tpu.memory_space<semaphore_mem>> -> memref<!tpu.dma_semaphore, #tpu.memory_space<semaphore_mem>>
    tpu.wait_dma2 semaphore(%59 : memref<!tpu.dma_semaphore, #tpu.memory_space<semaphore_mem>>) src(%arg5 : memref<256x256xbf16, #tpu.memory_space<any>>) dst(%57 : memref<256x256xbf16, #tpu.memory_space<vmem>>)
    %c0_32 = arith.constant 0 : index
    %c0_33 = arith.constant 0 : index
    %c0_34 = arith.constant 0 : index
    %60 = vector.load %arg16[%c0_32, %c0_33, %c0_34] : memref<2x256x256xbf16, #tpu.memory_space<vmem>>, vector<1x256x256xbf16>
    %61 = vector.shape_cast %60 : vector<1x256x256xbf16> to vector<256x256xbf16>
    %cst_35 = arith.constant dense<0.000000e+00> : vector<16x256xf32>
    %62 = tpu.matmul %55, %61, %cst_35 {dimension_numbers = #tpu.dot_dimension_numbers<[1], [0], [0], [1], [0, 0, 1, 1], [], []>} : vector<16x256xbf16>, vector<256x256xbf16>, vector<16x256xf32> -> vector<16x256xf32>
    %c0_36 = arith.constant 0 : index
    %c0_37 = arith.constant 0 : index
    %63 = vector.load %arg6[%c0_36, %c0_37] : memref<1x256xf32, #tpu.memory_space<vmem>>, vector<1x256xf32>
    %64 = vector.broadcast %63 : vector<1x256xf32> to vector<16x256xf32>
    %65 = arith.addf %62, %64 : vector<16x256xf32>
    %cst_38 = arith.constant 0.000000e+00 : f32
    %66 = vector.broadcast %cst_38 : f32 to vector<16x256xf32>
    %67 = arith.maximumf %65, %66 : vector<16x256xf32>
    %cst_39 = arith.constant dense<0.000000e+00> : vector<256xf32>
    %68 = vector.multi_reduction <add>, %67, %cst_39 [0] : vector<16x256xf32> to vector<256xf32>
    %69 = vector.shape_cast %68 : vector<256xf32> to vector<1x256xf32>
    %70 = arith.mulf %67, %67 : vector<16x256xf32>
    %cst_40 = arith.constant dense<0.000000e+00> : vector<256xf32>
    %71 = vector.multi_reduction <add>, %70, %cst_40 [0] : vector<16x256xf32> to vector<256xf32>
    %72 = vector.shape_cast %71 : vector<256xf32> to vector<1x256xf32>
    %cst_41 = arith.constant 6.250000e-02 : f32
    %73 = vector.broadcast %cst_41 : f32 to vector<1x256xf32>
    %74 = arith.mulf %69, %73 : vector<1x256xf32>
    %cst_42 = arith.constant 6.250000e-02 : f32
    %75 = vector.broadcast %cst_42 : f32 to vector<1x256xf32>
    %76 = arith.mulf %72, %75 : vector<1x256xf32>
    %77 = arith.mulf %74, %74 : vector<1x256xf32>
    %78 = arith.subf %76, %77 : vector<1x256xf32>
    %cst_43 = arith.constant 0.000000e+00 : f32
    %79 = vector.broadcast %cst_43 : f32 to vector<1x256xf32>
    %80 = arith.maximumf %78, %79 : vector<1x256xf32>
    %c0_44 = arith.constant 0 : index
    %c0_45 = arith.constant 0 : index
    %81 = vector.load %arg8[%c0_44, %c0_45] : memref<1x256xf32, #tpu.memory_space<vmem>>, vector<1x256xf32>
    %cst_46 = arith.constant 9.99999974E-5 : f32
    %82 = vector.broadcast %cst_46 : f32 to vector<1x256xf32>
    %83 = arith.addf %80, %82 : vector<1x256xf32>
    %84 = math.sqrt %83 : vector<1x256xf32>
    %85 = arith.mulf %81, %84 : vector<1x256xf32>
    %c0_47 = arith.constant 0 : index
    %c0_48 = arith.constant 0 : index
    %86 = vector.load %arg7[%c0_47, %c0_48] : memref<1x256xf32, #tpu.memory_space<vmem>>, vector<1x256xf32>
    %87 = arith.mulf %86, %74 : vector<1x256xf32>
    %88 = arith.subf %85, %87 : vector<1x256xf32>
    %c0_49 = arith.constant 0 : index
    %c0_50 = arith.constant 0 : index
    %89 = vector.load %arg7[%c0_49, %c0_50] : memref<1x256xf32, #tpu.memory_space<vmem>>, vector<1x256xf32>
    %90 = vector.broadcast %89 : vector<1x256xf32> to vector<16x256xf32>
    %91 = arith.mulf %90, %67 : vector<16x256xf32>
    %92 = vector.broadcast %88 : vector<1x256xf32> to vector<16x256xf32>
    %93 = arith.addf %91, %92 : vector<16x256xf32>
    %cst_51 = arith.constant 0.000000e+00 : f32
    %94 = vector.broadcast %cst_51 : f32 to vector<16x256xf32>
    %95 = arith.cmpf oge, %93, %94 : vector<16x256xf32>
    %cst_52 = arith.constant 1.000000e+00 : f32
    %cst_53 = arith.constant -1.000000e+00 : f32
    %96 = vector.broadcast %cst_52 : f32 to vector<16x256xf32>
    %97 = vector.broadcast %cst_53 : f32 to vector<16x256xf32>
    %98 = arith.select %95, %96, %97 : vector<16x256xi1>, vector<16x256xf32>
    %99 = arith.truncf %98 : vector<16x256xf32> to vector<16x256xbf16>
    %c1_i32_54 = arith.constant 1 : i32
    %c1_i32_55 = arith.constant 1 : i32
    %c0_i32_56 = arith.constant 0 : i32
    %c0_i32_57 = arith.constant 0 : i32
    %100 = tpu.memref_slice %arg16[%c1_i32_54, %c0_i32_56, %c0_i32_57] : memref<2x256x256xbf16, #tpu.memory_space<vmem>> -> memref<1x256x256xbf16, #tpu.memory_space<vmem>>
    %101 = tpu.memref_squeeze %100 : memref<1x256x256xbf16, #tpu.memory_space<vmem>> -> memref<256x256xbf16, #tpu.memory_space<vmem>>
    %102 = tpu.memref_slice %arg18[%c1_i32_55] : memref<3x!tpu.dma_semaphore, #tpu.memory_space<semaphore_mem>> -> memref<1x!tpu.dma_semaphore, #tpu.memory_space<semaphore_mem>>
    %103 = tpu.memref_squeeze %102 : memref<1x!tpu.dma_semaphore, #tpu.memory_space<semaphore_mem>> -> memref<!tpu.dma_semaphore, #tpu.memory_space<semaphore_mem>>
    tpu.wait_dma2 semaphore(%103 : memref<!tpu.dma_semaphore, #tpu.memory_space<semaphore_mem>>) src(%arg9 : memref<256x256xbf16, #tpu.memory_space<any>>) dst(%101 : memref<256x256xbf16, #tpu.memory_space<vmem>>)
    %c1 = arith.constant 1 : index
    %c0_58 = arith.constant 0 : index
    %c0_59 = arith.constant 0 : index
    %104 = vector.load %arg16[%c1, %c0_58, %c0_59] : memref<2x256x256xbf16, #tpu.memory_space<vmem>>, vector<1x256x256xbf16>
    %105 = vector.shape_cast %104 : vector<1x256x256xbf16> to vector<256x256xbf16>
    %cst_60 = arith.constant dense<0.000000e+00> : vector<16x256xf32>
    %106 = tpu.matmul %99, %105, %cst_60 {dimension_numbers = #tpu.dot_dimension_numbers<[1], [0], [0], [1], [0, 0, 1, 1], [], []>} : vector<16x256xbf16>, vector<256x256xbf16>, vector<16x256xf32> -> vector<16x256xf32>
    %c0_61 = arith.constant 0 : index
    %c0_62 = arith.constant 0 : index
    %107 = vector.load %arg10[%c0_61, %c0_62] : memref<1x256xf32, #tpu.memory_space<vmem>>, vector<1x256xf32>
    %108 = vector.broadcast %107 : vector<1x256xf32> to vector<16x256xf32>
    %109 = arith.addf %106, %108 : vector<16x256xf32>
    %cst_63 = arith.constant 0.000000e+00 : f32
    %110 = vector.broadcast %cst_63 : f32 to vector<16x256xf32>
    %111 = arith.maximumf %109, %110 : vector<16x256xf32>
    %cst_64 = arith.constant dense<0.000000e+00> : vector<256xf32>
    %112 = vector.multi_reduction <add>, %111, %cst_64 [0] : vector<16x256xf32> to vector<256xf32>
    %113 = vector.shape_cast %112 : vector<256xf32> to vector<1x256xf32>
    %114 = arith.mulf %111, %111 : vector<16x256xf32>
    %cst_65 = arith.constant dense<0.000000e+00> : vector<256xf32>
    %115 = vector.multi_reduction <add>, %114, %cst_65 [0] : vector<16x256xf32> to vector<256xf32>
    %116 = vector.shape_cast %115 : vector<256xf32> to vector<1x256xf32>
    %cst_66 = arith.constant 6.250000e-02 : f32
    %117 = vector.broadcast %cst_66 : f32 to vector<1x256xf32>
    %118 = arith.mulf %113, %117 : vector<1x256xf32>
    %cst_67 = arith.constant 6.250000e-02 : f32
    %119 = vector.broadcast %cst_67 : f32 to vector<1x256xf32>
    %120 = arith.mulf %116, %119 : vector<1x256xf32>
    %121 = arith.mulf %118, %118 : vector<1x256xf32>
    %122 = arith.subf %120, %121 : vector<1x256xf32>
    %cst_68 = arith.constant 0.000000e+00 : f32
    %123 = vector.broadcast %cst_68 : f32 to vector<1x256xf32>
    %124 = arith.maximumf %122, %123 : vector<1x256xf32>
    %c0_69 = arith.constant 0 : index
    %c0_70 = arith.constant 0 : index
    %125 = vector.load %arg12[%c0_69, %c0_70] : memref<1x256xf32, #tpu.memory_space<vmem>>, vector<1x256xf32>
    %cst_71 = arith.constant 9.99999974E-5 : f32
    %126 = vector.broadcast %cst_71 : f32 to vector<1x256xf32>
    %127 = arith.addf %124, %126 : vector<1x256xf32>
    %128 = math.sqrt %127 : vector<1x256xf32>
    %129 = arith.mulf %125, %128 : vector<1x256xf32>
    %c0_72 = arith.constant 0 : index
    %c0_73 = arith.constant 0 : index
    %130 = vector.load %arg11[%c0_72, %c0_73] : memref<1x256xf32, #tpu.memory_space<vmem>>, vector<1x256xf32>
    %131 = arith.mulf %130, %118 : vector<1x256xf32>
    %132 = arith.subf %129, %131 : vector<1x256xf32>
    %c0_74 = arith.constant 0 : index
    %c0_75 = arith.constant 0 : index
    %133 = vector.load %arg11[%c0_74, %c0_75] : memref<1x256xf32, #tpu.memory_space<vmem>>, vector<1x256xf32>
    %134 = vector.broadcast %133 : vector<1x256xf32> to vector<16x256xf32>
    %135 = arith.mulf %134, %111 : vector<16x256xf32>
    %136 = vector.broadcast %132 : vector<1x256xf32> to vector<16x256xf32>
    %137 = arith.addf %135, %136 : vector<16x256xf32>
    %cst_76 = arith.constant 0.000000e+00 : f32
    %138 = vector.broadcast %cst_76 : f32 to vector<16x256xf32>
    %139 = arith.cmpf oge, %137, %138 : vector<16x256xf32>
    %cst_77 = arith.constant 1.000000e+00 : f32
    %cst_78 = arith.constant -1.000000e+00 : f32
    %140 = vector.broadcast %cst_77 : f32 to vector<16x256xf32>
    %141 = vector.broadcast %cst_78 : f32 to vector<16x256xf32>
    %142 = arith.select %139, %140, %141 : vector<16x256xi1>, vector<16x256xf32>
    %143 = arith.truncf %142 : vector<16x256xf32> to vector<16x256xbf16>
    %c2_i32_79 = arith.constant 2 : i32
    %144 = tpu.memref_slice %arg18[%c2_i32_79] : memref<3x!tpu.dma_semaphore, #tpu.memory_space<semaphore_mem>> -> memref<1x!tpu.dma_semaphore, #tpu.memory_space<semaphore_mem>>
    %145 = tpu.memref_squeeze %144 : memref<1x!tpu.dma_semaphore, #tpu.memory_space<semaphore_mem>> -> memref<!tpu.dma_semaphore, #tpu.memory_space<semaphore_mem>>
    tpu.wait_dma2 semaphore(%145 : memref<!tpu.dma_semaphore, #tpu.memory_space<semaphore_mem>>) src(%arg13 : memref<256x128xbf16, #tpu.memory_space<any>>) dst(%arg17 : memref<256x128xbf16, #tpu.memory_space<vmem>>)
    %c0_80 = arith.constant 0 : index
    %c0_81 = arith.constant 0 : index
    %146 = vector.load %arg17[%c0_80, %c0_81] : memref<256x128xbf16, #tpu.memory_space<vmem>>, vector<256x128xbf16>
    %cst_82 = arith.constant dense<0.000000e+00> : vector<16x128xf32>
    %147 = tpu.matmul %143, %146, %cst_82 {dimension_numbers = #tpu.dot_dimension_numbers<[1], [0], [0], [1], [0, 0, 1, 1], [], []>} : vector<16x256xbf16>, vector<256x128xbf16>, vector<16x128xf32> -> vector<16x128xf32>
    %c0_83 = arith.constant 0 : index
    %c0_84 = arith.constant 0 : index
    %148 = vector.load %arg14[%c0_83, %c0_84] : memref<1x128xf32, #tpu.memory_space<vmem>>, vector<1x128xf32>
    %149 = vector.broadcast %148 : vector<1x128xf32> to vector<16x128xf32>
    %150 = arith.addf %147, %149 : vector<16x128xf32>
    %cst_85 = arith.constant dense<0xFF800000> : vector<16xf32>
    %151 = vector.multi_reduction <maximumf>, %150, %cst_85 [1] : vector<16x128xf32> to vector<16xf32>
    %152 = vector.shape_cast %151 : vector<16xf32> to vector<16x1xf32>
    %153 = vector.broadcast %152 : vector<16x1xf32> to vector<16x128xf32>
    %154 = arith.subf %150, %153 : vector<16x128xf32>
    %155 = math.exp %154 : vector<16x128xf32>
    %cst_86 = arith.constant dense<0.000000e+00> : vector<16xf32>
    %156 = vector.multi_reduction <add>, %155, %cst_86 [1] : vector<16x128xf32> to vector<16xf32>
    %157 = vector.shape_cast %156 : vector<16xf32> to vector<16x1xf32>
    %158 = math.log %157 : vector<16x1xf32>
    %159 = vector.broadcast %158 : vector<16x1xf32> to vector<16x128xf32>
    %160 = arith.subf %154, %159 : vector<16x128xf32>
    %c0_87 = arith.constant 0 : index
    %c0_88 = arith.constant 0 : index
    %161 = vector.load %arg15[%c0_87, %c0_88] : memref<16x128xf32, #tpu.memory_space<vmem>>, vector<16x128xf32>
    tpu.vector_store %arg15[%c0_87, %c0_88], %160 {strides = array<i32>} : memref<16x128xf32, #tpu.memory_space<vmem>>, vector<16x128xf32>,
    return
  }
}

</mosaic_0001>

<bundles_post_ra>
// kernel: tpu_custom_call.1
= control target key start
LH: loop header
LB: loop body
LE: loop exit
PB: predicated region body
PF: predicated region fallthrough
CT: control target
= control target key end

     0   :  { %20 = vsyncpa [#allocation6], 0  ;;  %s3238_s0 = inlined_call_operand.hbm [shape: f32[16,896], index: 0, kind: input, shape index: {}]   ;;  %s3239_s1 = inlined_call_operand.hbm [shape: bf16[896,256], index: 1, kind: input, shape index: {}]   ;;  %s3240_s2 = inlined_call_operand.vmem [shape: f32[1,256], index: 2, kind: input, shape index: {}]   ;;  %s3241_s3 = inlined_call_operand.vmem [shape: f32[1,256], index: 3, kind: input, shape index: {}]   ;;  %s3242_s4 = inlined_call_operand.vmem [shape: f32[1,256], index: 4, kind: input, shape index: {}]   ;;  %s3243_s5 = inlined_call_operand.hbm [shape: bf16[256,256], index: 5, kind: input, shape index: {}]   ;;  %s3244_s6 = inlined_call_operand.vmem [shape: f32[1,256], index: 6, kind: input, shape index: {}]   ;;  %s3245_s7 = inlined_call_operand.vmem [shape: f32[1,256], index: 7, kind: input, shape index: {}]   ;;  %s3246_s8 = inlined_call_operand.vmem [shape: f32[1,256], index: 8, kind: input, shape index: {}]   ;;  %s3247_s9 = inlined_call_operand.hbm [shape: bf16[256,256], index: 9, kind: input, shape index: {}]   ;;  %s3248_s10 = inlined_call_operand.vmem [shape: f32[1,256], index: 10, kind: input, shape index: {}]   ;;  %s3249_s11 = inlined_call_operand.vmem [shape: f32[1,256], index: 11, kind: input, shape index: {}]   ;;  %s3250_s12 = inlined_call_operand.vmem [shape: f32[1,256], index: 12, kind: input, shape index: {}]   ;;  %s3251_s13 = inlined_call_operand.hbm [shape: bf16[256,128], index: 13, kind: input, shape index: {}]   ;;  %s3252_s14 = inlined_call_operand.vmem [shape: f32[1,128], index: 14, kind: input, shape index: {}]   ;;  %s3253_s15 = inlined_call_operand.hbm [shape: f32[16,128], index: 15, kind: output, shape index: {}]  }
   0x1   :  { %21 = vsyncpa [#allocation9], 0 }
   0x2   :  { %22 = vsyncpa [#allocation7], 0  ;;  %s2460_s18 = smov [#allocation5]   ;;  %s2360_s22 = scalar_lea.hbm %s3238_s0, 1792 }
   0x3   :  { %s28_s19 = sshll.u32 %s2460_s18, 4  ;;  %p2361_p0 = scmp.ne.s32.totalorder %s3238_s0, %s2360_s22  ;;  %s29_s19 = int_to_ptr.vmem [resolvable:$true] %s28_s19 }
   0x4   :  { %p2364_p1 = scmp.lt.u32.totalorder %s2360_s22, %s3238_s0 }
   0x6   :  { %p2366_p2 = pnand %p2364_p1, %p2361_p0 }
   0x8   :  { %2369 = shalt.err (!%p2366_p2)
}
   0x9   :  { %s2370_s27 = scalar_lea.vmem %s29_s19, 1792  ;;  %p2375_p4 = scmp.lt.s32.totalorder %s29_s19, %s29_s19 }
   0xa   :  { %p2371_p3 = scmp.ne.s32.totalorder %s29_s19, %s2370_s27  ;;  %p2376_p5 = scmp.lt.s32.totalorder %s2370_s27, %s2370_s27 }
   0xc   :  { %p2377_p6 = por %p2376_p5, %p2375_p4 }
   0xe   :  { %p2378_p7 = pnand %p2377_p6, %p2371_p3 }
  0x10   :  { %2381 = shalt.err (!%p2378_p7)
}
  0x11   :  { %s2461_s28 = smov 896   ;;  %s2462_s29 = smov 56  }
  0x12   :  { %34 = dma.hbm_to_vmem [thread:$0]  %s3238_s0, 1792, %s29_s19, [#allocation6], %s2461_s28, %s2461_s28, %s2462_s29  }
  0x13   :  { %s2463_s17 = smov [#allocation8]   ;;  %s2382_s22 = scalar_lea.hbm %s3239_s1, 14336 }
  0x14   :  { %s40_s18 = sshll.u32 %s2463_s17, 4  ;;  %p2383_p8 = scmp.ne.s32.totalorder %s3239_s1, %s2382_s22  ;;  %s41_s18 = int_to_ptr.vmem [resolvable:$true] %s40_s18 }
  0x15   :  { %p2386_p9 = scmp.lt.u32.totalorder %s2382_s22, %s3239_s1 }
  0x17   :  { %p2388_p10 = pnand %p2386_p9, %p2383_p8 }
  0x19   :  { %2391 = shalt.err (!%p2388_p10)
}
  0x1a   :  { %s2392_s27 = scalar_lea.vmem %s41_s18, 14336  ;;  %p2397_p12 = scmp.lt.s32.totalorder %s41_s18, %s41_s18 }
  0x1b   :  { %p2393_p11 = scmp.ne.s32.totalorder %s41_s18, %s2392_s27  ;;  %p2398_p13 = scmp.lt.s32.totalorder %s2392_s27, %s2392_s27 }
  0x1d   :  { %p2399_p0 = por %p2398_p13, %p2397_p12 }
  0x1f   :  { %p2400_p1 = pnand %p2399_p0, %p2393_p11 }
  0x21   :  { %2403 = shalt.err (!%p2400_p1)
}
  0x22   :  { %s2464_s0 = smov 128   ;;  %s3254_s19 = smov 8  }
  0x23   :  { %46 = dma.hbm_to_vmem [thread:$0]  %s3239_s1, 14336, %s41_s18, [#allocation9], %s2464_s0, %s2464_s0, %s3254_s19  }
  0x24   :  { %2448 = dma.done.wait [#allocation6], 1792  }
  0x25   :  { %2449 = vsyncadd [#allocation6], 4294965504 }
  0x26   :  { %2450 = dma.done.wait [#allocation9], 14336  }
  0x27   :  { %2451 = vsyncadd [#allocation9], 4294952960  ;;  %s78_s30 = sld [smem:[#allocation0]]   ;;  %98 = sst [smem:[#allocation12 + $0x4]] %s2464_s0 }
  0x28   :  { %102 = sst [smem:[#allocation12 + $0x6]] %s2464_s0  ;;  %s2466_s16 = smov [#allocation2]  }
  0x29   :  { %s86_s17 = sshll.u32 %s2466_s16, 4  ;;  %s2467_s20 = smov 256   ;;  %s87_s17 = int_to_ptr.vmem [resolvable:$true] %s86_s17 }
  0x2a   :  { %90 = sst [smem:[#allocation12]] %s2467_s20  ;;  %s2468_s21 = smov 2  }
  0x2b   :  { %92 = sst [smem:[#allocation12 + $0x1]] %s2467_s20  ;;  %s2469_s22 = smov 64  }
  0x2c   :  { %94 = sst [smem:[#allocation12 + $0x2]] %s2468_s21  ;;  %s2470_s23 = smov 4  }
  0x2d   :  { %96 = sst [smem:[#allocation12 + $0x3]] %s2469_s22  ;;  %s1981_s1 = sshll.u32 %s78_s30, 26 }
  0x2e   :  { %100 = sst [smem:[#allocation12 + $0x5]] %s2468_s21  ;;  %s1982_s18 = sadd.s32 134217728, %s1981_s1 }
  0x2f   :  { %104 = sst [smem:[#allocation12 + $0x7]] %s2469_s22  ;;  %s2471_s24 = smov [#allocation4]  }
  0x30   :  { %106 = sst [smem:[#allocation12 + $0x8]] %s2470_s23  ;;  %s2472_s25 = smov [#allocation11]  }
  0x31   :  { %108 = dma.general %s3243_s5, 4096, %s87_s17, %s2471_s24, %s2472_s25, [#allocation12], %s1982_s18, 0  }
  0x32   :  { %126 = sst [smem:[#allocation14]] %s2467_s20  ;;  %s2473_s28 = smov [#allocation2 + $0x100]  }
  0x33   :  { %128 = sst [smem:[#allocation14 + $0x1]] %s2467_s20  ;;  %s122_s29 = sshll.u32 %s2473_s28, 4  ;;  %s123_s29 = int_to_ptr.vmem [resolvable:$true] %s122_s29 }
  0x34   :  { %130 = sst [smem:[#allocation14 + $0x2]] %s2468_s21  ;;  %s2474_s30 = smov [#allocation4 + $0x1]  }
  0x35   :  { %132 = sst [smem:[#allocation14 + $0x3]] %s2469_s22  ;;  %s2475_s16 = smov [#allocation13]  }
  0x36   :  { %134 = sst [smem:[#allocation14 + $0x4]] %s2464_s0  ;;  %s2477_s5 = smov [#allocation3]  }
  0x37   :  { %136 = sst [smem:[#allocation14 + $0x5]] %s2468_s21  ;;  %s2404_s20 = scalar_lea.hbm %s3251_s13, 2048 }
  0x38   :  { %138 = sst [smem:[#allocation14 + $0x6]] %s2464_s0  ;;  %p2405_p2 = scmp.ne.s32.totalorder %s3251_s13, %s2404_s20 }
  0x39   :  { %140 = sst [smem:[#allocation14 + $0x7]] %s2469_s22  ;;  %p2408_p3 = scmp.lt.u32.totalorder %s2404_s20, %s3251_s13 }
  0x3a   :  { %142 = sst [smem:[#allocation14 + $0x8]] %s2470_s23 }
  0x3b   :  { %144 = dma.general %s3247_s9, 4096, %s123_s29, %s2474_s30, %s2475_s16, [#allocation14], %s1982_s18, 0  }
  0x3c   :  { %v2598_v0 = vld [vmem:[#allocation8 + $0x204] ss:$8 sps:$4 sm:$0xff]   ;;  %v2600_v1 = vld [vmem:[#allocation8 + $0x200] ss:$8 sps:$4 sm:$0xff]   ;;  %v2603_v2 = vld [vmem:[#allocation8 + $0x214] ss:$8 sps:$4 sm:$0xff]   ;;  %p2410_p4 = pnand %p2408_p3, %p2405_p2 }
  0x3d   :  { %971 = vmatprep.subr.bf16.mxu0 %v2598_v0  ;;  %v2606_v3 = vld [vmem:[#allocation8 + $0x210] ss:$8 sps:$4 sm:$0xff]   ;;  %v2609_v4 = vld [vmem:[#allocation8 + $0x224] ss:$8 sps:$4 sm:$0xff]   ;;  %v2612_v5 = vld [vmem:[#allocation8 + $0x220] ss:$8 sps:$4 sm:$0xff]  }
  0x3e   :  { %972 = vmatpush1.bf16.msra.mxu0 %v2600_v1  ;;  %v2615_v6 = vld [vmem:[#allocation8 + $0x234] ss:$8 sps:$4 sm:$0xff]   ;;  %v2618_v7 = vld [vmem:[#allocation8 + $0x230] ss:$8 sps:$4 sm:$0xff]   ;;  %v2621_v8 = vld [vmem:[#allocation8 + $0x244] ss:$8 sps:$4 sm:$0xff]  }
  0x3f   :  { %973 = vmatprep.subr.bf16.mxu0 %v2603_v2  ;;  %v2624_v9 = vld [vmem:[#allocation8 + $0x240] ss:$8 sps:$4 sm:$0xff]   ;;  %v2627_v10 = vld [vmem:[#allocation8 + $0x254] ss:$8 sps:$4 sm:$0xff]   ;;  %v2630_v11 = vld [vmem:[#allocation8 + $0x250] ss:$8 sps:$4 sm:$0xff]  }
  0x40   :  { %v2633_v12 = vld [vmem:[#allocation8 + $0x264] ss:$8 sps:$4 sm:$0xff]   ;;  %v162_v13 = vld [vmem:[#allocation5 + $0x28] sm:$0xff]  ;;  %v169_v14 = vld [vmem:[#allocation5 + $0x60] sm:$0xff]  ;;  %s153_s9 = sshll.u32 %s2477_s5, 4  ;;  %s154_s9 = int_to_ptr.vmem [resolvable:$true] %s153_s9 }
  0x41   :  { %v2635_v15 = vpack.c.bf16 %v169_v14, %v162_v13  ;;  %v2638_v16 = vld [vmem:[#allocation8 + $0x260] ss:$8 sps:$4 sm:$0xff]   ;;  %v2641_v17 = vld [vmem:[#allocation8 + $0x274] ss:$8 sps:$4 sm:$0xff]   ;;  %v2646_v22 = vld [vmem:[#allocation8 + $0x270] ss:$8 sps:$4 sm:$0xff]  }
  0x42   :  { %974 = vmatpush1.bf16.msra.mxu0 %v2606_v3  ;;  %3289 = vst [vmem:[#allocation25_spill] sm:$0xff] %v2641_v17  ;;  %3290 = vst [vmem:[#allocation26_spill] sm:$0xff] %v2646_v22  ;;  %v2649_v23 = vld [vmem:[#allocation8 + $0x284] ss:$8 sps:$4 sm:$0xff]   ;;  %v2652_v25 = vld [vmem:[#allocation8 + $0x280] ss:$8 sps:$4 sm:$0xff]  }
  0x43   :  { %975 = vmatprep.subr.bf16.mxu0 %v2609_v4  ;;  %v183_v18 = vunpack.c.l.bf16 %v2635_v15  ;;  %v190_v19 = vunpack.c.h.bf16 %v2635_v15  ;;  %3291 = vst [vmem:[#allocation27_spill] sm:$0xff] %v2649_v23  ;;  %3292 = vst [vmem:[#allocation28_spill] sm:$0xff] %v2652_v25  ;;  %v2655_v26 = vld [vmem:[#allocation8 + $0x294] ss:$8 sps:$4 sm:$0xff]   ;;  %v2657_v27 = vld [vmem:[#allocation8 + $0x290] ss:$8 sps:$4 sm:$0xff]  }
  0x44   :  { %3293 = vst [vmem:[#allocation29_spill] sm:$0xff] %v2655_v26  ;;  %3294 = vst [vmem:[#allocation30_spill] sm:$0xff] %v2657_v27  ;;  %v2659_v28 = vld [vmem:[#allocation8 + $0x4] ss:$8 sps:$4 sm:$0xff]   ;;  %v2662_v29 = vld [vmem:[#allocation8] ss:$8 sps:$4 sm:$0xff]  }
  0x45   :  { %v197_v20 = vsub.f32 %v162_v13, %v183_v18  ;;  %v204_v21 = vsub.f32 %v169_v14, %v190_v19  ;;  %v2665_v30 = vld [vmem:[#allocation8 + $0x2a4] ss:$8 sps:$4 sm:$0xff]   ;;  %v2667_v31 = vld [vmem:[#allocation8 + $0x14] ss:$8 sps:$4 sm:$0xff]   ;;  %885 = vmatprep.subr.bf16.mxu1 %v2659_v28  ;;  %v2671_v32 = vld [vmem:[#allocation8 + $0x2a0] ss:$8 sps:$4 sm:$0xff]  }
  0x46   :  { %976 = vmatpush1.bf16.msra.mxu0 %v2612_v5  ;;  %3295 = vst [vmem:[#allocation31_spill] sm:$0xff] %v2665_v30  ;;  %886 = vmatpush1.bf16.msra.mxu1 %v2662_v29  ;;  %3296 = vst [vmem:[#allocation32_spill] sm:$0xff] %v2671_v32  ;;  %v2675_v33 = vld [vmem:[#allocation8 + $0x10] ss:$8 sps:$4 sm:$0xff]   ;;  %v2678_v34 = vld [vmem:[#allocation8 + $0x2b4] ss:$8 sps:$4 sm:$0xff]  }
  0x47   :  { %977 = vmatprep.subr.bf16.mxu0 %v2615_v6  ;;  %v211_v24 = vpack.c.bf16 %v204_v21, %v197_v20  ;;  %887 = vmatprep.subr.bf16.mxu1 %v2667_v31  ;;  %3297 = vst [vmem:[#allocation33_spill] sm:$0xff] %v2678_v34  ;;  %v2680_v35 = vld [vmem:[#allocation8 + $0x24] ss:$8 sps:$4 sm:$0xff]   ;;  %v2683_v36 = vld [vmem:[#allocation8 + $0x2b0] ss:$8 sps:$4 sm:$0xff]  }
  0x48   :  { %3298 = vst [vmem:[#allocation34_spill] sm:$0xff] %v2683_v36  ;;  %v2687_v37 = vld [vmem:[#allocation8 + $0x20] ss:$8 sps:$4 sm:$0xff]   ;;  %v2690_v38 = vld [vmem:[#allocation8 + $0x2c4] ss:$8 sps:$4 sm:$0xff]   ;;  %v161_v41 = vld [vmem:[#allocation5 + $0x20] sm:$0xff] }
  0x49   :  { %1003 = vmatprep.mubr.bf16.mxu0 %v211_v24  ;;  %3299 = vst [vmem:[#allocation35_spill] sm:$0xff] %v2690_v38  ;;  %v2692_v39 = vld [vmem:[#allocation8 + $0x34] ss:$8 sps:$4 sm:$0xff]   ;;  %v2694_v40 = vld [vmem:[#allocation8 + $0x2c0] ss:$8 sps:$4 sm:$0xff]  }
  0x4a   :  { %978 = vmatpush1.bf16.msra.mxu0 %v2618_v7  ;;  %888 = vmatpush1.bf16.msra.mxu1 %v2675_v33  ;;  %3300 = vst [vmem:[#allocation36_spill] sm:$0xff] %v2694_v40  ;;  %v168_v42 = vld [vmem:[#allocation5 + $0x58] sm:$0xff]  ;;  %v2699_v43 = vld [vmem:[#allocation8 + $0x30] ss:$8 sps:$4 sm:$0xff]   ;;  %v2702_v44 = vld [vmem:[#allocation8 + $0x2d4] ss:$8 sps:$4 sm:$0xff]  }
  0x4b   :  { %979 = vmatprep.subr.bf16.mxu0 %v2621_v8  ;;  %889 = vmatprep.subr.bf16.mxu1 %v2680_v35  ;;  %3301 = vst [vmem:[#allocation37_spill] sm:$0xff] %v2702_v44  ;;  %v2704_v45 = vld [vmem:[#allocation8 + $0x44] ss:$8 sps:$4 sm:$0xff]   ;;  %v2707_v46 = vld [vmem:[#allocation8 + $0x2d0] ss:$8 sps:$4 sm:$0xff]   ;;  %v2709_v47 = vpack.c.bf16 %v168_v42, %v161_v41 }
  0x4c   :  { %3302 = vst [vmem:[#allocation38_spill] sm:$0xff] %v2707_v46  ;;  %v2713_v48 = vld [vmem:[#allocation8 + $0x40] ss:$8 sps:$4 sm:$0xff]   ;;  %v2716_v49 = vld [vmem:[#allocation8 + $0x2e4] ss:$8 sps:$4 sm:$0xff]   ;;  %v158_v56 = vld [vmem:[#allocation5 + $0x8] sm:$0xff] }
  0x4d   :  { %3303 = vst [vmem:[#allocation39_spill] sm:$0xff] %v2709_v47  ;;  %3304 = vst [vmem:[#allocation40_spill] sm:$0xff] %v2716_v49  ;;  %v2718_v50 = vld [vmem:[#allocation8 + $0x54] ss:$8 sps:$4 sm:$0xff]   ;;  %v2720_v51 = vld [vmem:[#allocation8 + $0x2e0] ss:$8 sps:$4 sm:$0xff]   ;;  %v182_v53 = vunpack.c.l.bf16 %v2709_v47  ;;  %v189_v54 = vunpack.c.h.bf16 %v2709_v47 }
  0x4e   :  { %980 = vmatpush1.bf16.msra.mxu0 %v2624_v9  ;;  %890 = vmatpush1.bf16.msra.mxu1 %v2687_v37  ;;  %3305 = vst [vmem:[#allocation41_spill] sm:$0xff] %v2720_v51  ;;  %v2723_v52 = vld [vmem:[#allocation8 + $0x2f4] ss:$8 sps:$4 sm:$0xff]   ;;  %v2729_v55 = vld [vmem:[#allocation8 + $0x50] ss:$8 sps:$4 sm:$0xff]  }
  0x4f   :  { %981 = vmatprep.subr.bf16.mxu0 %v2627_v10  ;;  %891 = vmatprep.subr.bf16.mxu1 %v2692_v39  ;;  %3306 = vst [vmem:[#allocation42_spill] sm:$0xff] %v2723_v52  ;;  %v165_v57 = vld [vmem:[#allocation5 + $0x40] sm:$0xff]  ;;  %v2732_v58 = vld [vmem:[#allocation8 + $0x64] ss:$8 sps:$4 sm:$0xff]   ;;  %v196_v61 = vsub.f32 %v161_v41, %v182_v53  ;;  %v203_v62 = vsub.f32 %v168_v42, %v189_v54  ;;  %v2743_v14 = vld [vmem:[#allocation8 + $0x60] ss:$8 sps:$4 sm:$0xff]  }
  0x50   :  { %v2734_v59 = vpack.c.bf16 %v165_v57, %v158_v56  ;;  %v2737_v60 = vld [vmem:[#allocation8 + $0x2f0] ss:$8 sps:$4 sm:$0xff]   ;;  %v2746_v18 = vld [vmem:[#allocation8 + $0x304] ss:$8 sps:$4 sm:$0xff]   ;;  %v2748_v19 = vld [vmem:[#allocation8 + $0x74] ss:$8 sps:$4 sm:$0xff]  }
  0x51   :  { %3307 = vst [vmem:[#allocation43_spill] sm:$0xff] %v2737_v60  ;;  %3308 = vst [vmem:[#allocation44_spill] sm:$0xff] %v2746_v18  ;;  %v2751_v24 = vld [vmem:[#allocation8 + $0x300] ss:$8 sps:$4 sm:$0xff]   ;;  %v210_v41 = vpack.c.bf16 %v203_v62, %v196_v61  ;;  %v2755_v53 = vld [vmem:[#allocation8 + $0x70] ss:$8 sps:$4 sm:$0xff]  }
  0x52   :  { %982 = vmatpush1.bf16.msra.mxu0 %v2630_v11  ;;  %892 = vmatpush1.bf16.msra.mxu1 %v2699_v43  ;;  %v179_v63 = vunpack.c.l.bf16 %v2734_v59  ;;  %v186_v13 = vunpack.c.h.bf16 %v2734_v59  ;;  %3309 = vst [vmem:[#allocation45_spill] sm:$0xff] %v2751_v24  ;;  %v2758_v54 = vld [vmem:[#allocation8 + $0x314] ss:$8 sps:$4 sm:$0xff]   ;;  %v2760_v47 = vld [vmem:[#allocation8 + $0x84] ss:$8 sps:$4 sm:$0xff]  }
  0x53   :  { %983 = vmatprep.subr.bf16.mxu0 %v2633_v12  ;;  %893 = vmatprep.subr.bf16.mxu1 %v2704_v45  ;;  %3310 = vst [vmem:[#allocation46_spill] sm:$0xff] %v2758_v54  ;;  %v2768_v61 = vld [vmem:[#allocation8 + $0x80] ss:$8 sps:$4 sm:$0xff]   ;;  %v2771_v62 = vld [vmem:[#allocation8 + $0x324] ss:$8 sps:$4 sm:$0xff]  }
  0x54   :  { %v193_v20 = vsub.f32 %v158_v56, %v179_v63  ;;  %v200_v21 = vsub.f32 %v165_v57, %v186_v13  ;;  %v2763_v56 = vld [vmem:[#allocation8 + $0x310] ss:$8 sps:$4 sm:$0xff]   ;;  %v3256_v57 = vmov 0   ;;  %3312 = vst [vmem:[#allocation48_spill] sm:$0xff] %v2771_v62  ;;  %v2773_v63 = vld [vmem:[#allocation8 + $0x94] ss:$8 sps:$4 sm:$0xff]  }
  0x55   :  { %3311 = vst [vmem:[#allocation47_spill] sm:$0xff] %v2763_v56  ;;  %v2775_v13 = vld [vmem:[#allocation8 + $0x320] ss:$8 sps:$4 sm:$0xff]  }
  0x56   :  { %984 = vmatpush1.bf16.msra.mxu0 %v2638_v16  ;;  %894 = vmatpush1.bf16.msra.mxu1 %v2713_v48  ;;  %v207_v42 = vpack.c.bf16 %v200_v21, %v193_v20  ;;  %3313 = vst [vmem:[#allocation49_spill] sm:$0xff] %v2775_v13  ;;  %v2778_v20 = vld [vmem:[#allocation8 + $0x334] ss:$8 sps:$4 sm:$0xff]   ;;  %v2782_v21 = vld [vmem:[#allocation8 + $0x90] ss:$8 sps:$4 sm:$0xff]  }
  0x57   :  { %985 = vmatprep.subr.bf16.mxu0 %v2641_v17  ;;  %895 = vmatprep.subr.bf16.mxu1 %v2718_v50  ;;  %3314 = vst [vmem:[#allocation50_spill] sm:$0xff] %v2778_v20 }
  0x58   :  { %917 = vmatprep.mubr.bf16.mxu1 %v207_v42  ;;  %v2790_v42 = vld [vmem:[#allocation8 + $0x330] ss:$8 sps:$4 sm:$0xff]  }
  0x59   :  { %3315 = vst [vmem:[#allocation51_spill] sm:$0xff] %v2790_v42 }
  0x5a   :  { %986 = vmatpush1.bf16.msra.mxu0 %v2646_v22  ;;  %896 = vmatpush1.bf16.msra.mxu1 %v2729_v55 }
  0x5b   :  { %987 = vmatprep.subr.bf16.mxu0 %v2649_v23  ;;  %897 = vmatprep.subr.bf16.mxu1 %v2732_v58 }
  0x5e   :  { %988 = vmatpush1.bf16.msra.mxu0 %v2652_v25  ;;  %898 = vmatpush1.bf16.msra.mxu1 %v2743_v14  ;;  %v2848_v25 = vld [vmem:[#allocation8 + $0xe0] ss:$8 sps:$4 sm:$0xff]  }
  0x5f   :  { %989 = vmatprep.subr.bf16.mxu0 %v2655_v26  ;;  %899 = vmatprep.subr.bf16.mxu1 %v2748_v19 }
  0x62   :  { %990 = vmatpush1.bf16.msra.mxu0 %v2657_v27  ;;  %900 = vmatpush1.bf16.msra.mxu1 %v2755_v53 }
  0x63   :  { %991 = vmatprep.subr.bf16.mxu0 %v2665_v30  ;;  %901 = vmatprep.subr.bf16.mxu1 %v2760_v47 }
  0x66   :  { %992 = vmatpush1.bf16.msra.mxu0 %v2671_v32  ;;  %902 = vmatpush1.bf16.msra.mxu1 %v2768_v61  ;;  %v2839_v32 = vld [vmem:[#allocation8 + $0xe4] ss:$8 sps:$4 sm:$0xff]  }
  0x67   :  { %993 = vmatprep.subr.bf16.mxu0 %v2678_v34  ;;  %903 = vmatprep.subr.bf16.mxu1 %v2773_v63  ;;  %v2834_v34 = vld [vmem:[#allocation8 + $0xd0] ss:$8 sps:$4 sm:$0xff]  }
  0x6a   :  { %994 = vmatpush1.bf16.msra.mxu0 %v2683_v36  ;;  %904 = vmatpush1.bf16.msra.mxu1 %v2782_v21 }
  0x6b   :  { %995 = vmatprep.subr.bf16.mxu0 %v2690_v38 }
  0x6e   :  { %996 = vmatpush1.bf16.msra.mxu0 %v2694_v40 }
  0x6f   :  { %997 = vmatprep.subr.bf16.mxu0 %v2702_v44  ;;  %v2823_v44 = vld [vmem:[#allocation8 + $0xd4] ss:$8 sps:$4 sm:$0xff]  }
  0x72   :  { %998 = vmatpush1.bf16.msra.mxu0 %v2707_v46  ;;  %v164_v46 = vld [vmem:[#allocation5 + $0x38] sm:$0xff] }
  0x73   :  { %999 = vmatprep.subr.bf16.mxu0 %v2716_v49  ;;  %v157_v49 = vld [vmem:[#allocation5] sm:$0xff] }
  0x74   :  { %v2828_v36 = vpack.c.bf16 %v164_v46, %v157_v49 }
  0x76   :  { %1000 = vmatpush1.bf16.msra.mxu0 %v2720_v51  ;;  %v178_v30 = vunpack.c.l.bf16 %v2828_v36 }
  0x77   :  { %1001 = vmatprep.subr.bf16.mxu0 %v2723_v52  ;;  %v2812_v52 = vld [vmem:[#allocation8 + $0x350] ss:$8 sps:$4 sm:$0xff]  }
  0x78   :  { %3319 = vst [vmem:[#allocation55_spill] sm:$0xff] %v2812_v52  ;;  %v192_v23 = vsub.f32 %v157_v49, %v178_v30  ;;  %v2892_v30 = vld [vmem:[#allocation8 + $0x144] ss:$8 sps:$4 sm:$0xff]   ;;  %v2917_v49 = vld [vmem:[#allocation8 + $0x160] ss:$8 sps:$4 sm:$0xff]  }
  0x7a   :  { %1002 = vmatpush1.bf16.msra.mxu0 %v2737_v60  ;;  %v2807_v60 = vld [vmem:[#allocation8 + $0x354] ss:$8 sps:$4 sm:$0xff]  }
  0x7b   :  { %1014 = vmatprep.subr.bf16.mxu0 %v2746_v18  ;;  %v2804_v18 = vld [vmem:[#allocation8 + $0xb0] ss:$8 sps:$4 sm:$0xff]   ;;  %3318 = vst [vmem:[#allocation54_spill] sm:$0xff] %v2807_v60 }
  0x7d   :  { %1004 = vmatmul.mubr.bf16.vlgmr.msra.gmra.mrb[0].mxu0 %v210_v41  ;;  %v2784_v41 = vld [vmem:[#allocation8 + $0xa4] ss:$8 sps:$4 sm:$0xff]  }
  0x7e   :  { %1015 = vmatpush1.bf16.msra.mxu0 %v2751_v24  ;;  %1046 = vmatprep.mubr.bf16.mxu0 %v3256_v57  ;;  %v2792_v57 = vld [vmem:[#allocation8 + $0xa0] ss:$8 sps:$4 sm:$0xff]  }
  0x7f   :  { %1016 = vmatprep.subr.bf16.mxu0 %v2758_v54  ;;  %905 = vmatprep.subr.bf16.mxu1 %v2784_v41  ;;  %v2795_v54 = vld [vmem:[#allocation8 + $0x344] ss:$8 sps:$4 sm:$0xff]   ;;  %v2800_v24 = vld [vmem:[#allocation8 + $0x340] ss:$8 sps:$4 sm:$0xff]  }
  0x80   :  { %3316 = vst [vmem:[#allocation52_spill] sm:$0xff] %v2795_v54  ;;  %906 = vmatpush1.bf16.msra.mxu1 %v2792_v57  ;;  %3317 = vst [vmem:[#allocation53_spill] sm:$0xff] %v2800_v24 }
  0x82   :  { %1017 = vmatpush1.bf16.msra.mxu0 %v2763_v56  ;;  %v2797_v56 = vld [vmem:[#allocation8 + $0xb4] ss:$8 sps:$4 sm:$0xff]  }
  0x83   :  { %1018 = vmatprep.subr.bf16.mxu0 %v2771_v62  ;;  %907 = vmatprep.subr.bf16.mxu1 %v2797_v56  ;;  %v163_v62 = vld [vmem:[#allocation5 + $0x30] sm:$0xff] }
  0x84   :  { %908 = vmatpush1.bf16.msra.mxu1 %v2804_v18 }
  0x86   :  { %1019 = vmatpush1.bf16.msra.mxu0 %v2775_v13  ;;  %v170_v13 = vld [vmem:[#allocation5 + $0x68] sm:$0xff] }
  0x87   :  { %1020 = vmatprep.subr.bf16.mxu0 %v2778_v20  ;;  %v2809_v20 = vld [vmem:[#allocation8 + $0xc4] ss:$8 sps:$4 sm:$0xff]   ;;  %v2814_v51 = vpack.c.bf16 %v170_v13, %v163_v62 }
  0x88   :  { %909 = vmatprep.subr.bf16.mxu1 %v2809_v20 }
  0x89   :  { %3320 = vst [vmem:[#allocation56_spill] sm:$0xff] %v2814_v51  ;;  %v184_v40 = vunpack.c.l.bf16 %v2814_v51  ;;  %v191_v38 = vunpack.c.h.bf16 %v2814_v51  ;;  %v185_v51 = vunpack.c.h.bf16 %v2828_v36 }
  0x8a   :  { %1021 = vmatpush1.bf16.msra.mxu0 %v2790_v42  ;;  %v2818_v42 = vld [vmem:[#allocation8 + $0xc0] ss:$8 sps:$4 sm:$0xff]  }
  0x8b   :  { %1022 = vmatprep.subr.bf16.mxu0 %v2795_v54  ;;  %v2821_v54 = vld [vmem:[#allocation8 + $0x364] ss:$8 sps:$4 sm:$0xff]   ;;  %910 = vmatpush1.bf16.msra.mxu1 %v2818_v42  ;;  %v198_v27 = vsub.f32 %v163_v62, %v184_v40  ;;  %v205_v26 = vsub.f32 %v170_v13, %v191_v38  ;;  %v199_v22 = vsub.f32 %v164_v46, %v185_v51  ;;  %v2856_v38 = vld [vmem:[#allocation8 + $0xf0] ss:$8 sps:$4 sm:$0xff]   ;;  %v2936_v13 = vld [vmem:[#allocation8 + $0x194] ss:$8 sps:$4 sm:$0xff]  }
  0x8c   :  { %3321 = vst [vmem:[#allocation57_spill] sm:$0xff] %v2821_v54  ;;  %911 = vmatprep.subr.bf16.mxu1 %v2823_v44  ;;  %v2859_v40 = vld [vmem:[#allocation8 + $0x104] ss:$8 sps:$4 sm:$0xff]  }
  0x8d   :  { %v212_v17 = vpack.c.bf16 %v205_v26, %v198_v27  ;;  %v206_v62 = vpack.c.bf16 %v199_v22, %v192_v23  ;;  %v2865_v26 = vld [vmem:[#allocation8 + $0x100] ss:$8 sps:$4 sm:$0xff]   ;;  %v2868_v27 = vld [vmem:[#allocation8 + $0x114] ss:$8 sps:$4 sm:$0xff]   ;;  %v2876_v22 = vld [vmem:[#allocation8 + $0x124] ss:$8 sps:$4 sm:$0xff]  }
  0x8e   :  { %1023 = vmatpush1.bf16.msra.mxu0 %v2800_v24  ;;  %v2832_v24 = vld [vmem:[#allocation8 + $0x360] ss:$8 sps:$4 sm:$0xff]  }
  0x8f   :  { %1024 = vmatprep.subr.bf16.mxu0 %v2807_v60  ;;  %v2837_v60 = vld [vmem:[#allocation8 + $0x374] ss:$8 sps:$4 sm:$0xff]   ;;  %912 = vmatpush1.bf16.msra.mxu1 %v2834_v34  ;;  %v2881_v23 = vld [vmem:[#allocation8 + $0x120] ss:$8 sps:$4 sm:$0xff]  }
  0x90   :  { %913 = vmatprep.subr.bf16.mxu1 %v2839_v32 }
  0x92   :  { %1025 = vmatpush1.bf16.msra.mxu0 %v2812_v52  ;;  %v2846_v52 = vld [vmem:[#allocation8 + $0x370] ss:$8 sps:$4 sm:$0xff]  }
  0x93   :  { %1026 = vmatprep.subr.bf16.mxu0 %v2821_v54  ;;  %v2851_v54 = vld [vmem:[#allocation8 + $0xf4] ss:$8 sps:$4 sm:$0xff]   ;;  %914 = vmatpush1.bf16.msra.mxu1 %v2848_v25 }
  0x94   :  { %915 = vmatprep.subr.bf16.mxu1 %v2851_v54 }
  0x96   :  { %1027 = vmatpush1.bf16.msra.mxu0 %v2832_v24 }
  0x97   :  { %1028 = vmatprep.subr.bf16.mxu0 %v2837_v60  ;;  %916 = vmatpush1.bf16.msra.mxu1 %v2856_v38 }
  0x98   :  { %928 = vmatprep.subr.bf16.mxu1 %v2859_v40 }
  0x9a   :  { %1029 = vmatpush1.bf16.msra.mxu0 %v2846_v52  ;;  %918 = vmatmul.mubr.bf16.vlgmr.msra.gmra.mrb[0].mxu1 %v206_v62  ;;  %v2328_v62 = vld [vmem:[#allocation8 + $0x1c0] ss:$8 sps:$4 sm:$0xff]  }
  0x9b   :  { %1057 = vmatprep.subr.bf16.mxu0 %v2659_v28  ;;  %929 = vmatpush1.bf16.msra.mxu1 %v2865_v26  ;;  %v2884_v28 = vld [vmem:[#allocation8 + $0x134] ss:$8 sps:$4 sm:$0xff]  }
  0x9c   :  { %930 = vmatprep.subr.bf16.mxu1 %v2868_v27 }
  0x9d   :  { %1047 = vmatmul.mubr.bf16.vlgmr.msra.gmra.mrb[0].mxu0 %v212_v17  ;;  %v2873_v17 = vld [vmem:[#allocation8 + $0x110] ss:$8 sps:$4 sm:$0xff]  }
  0x9e   :  { %1058 = vmatpush1.bf16.msra.mxu0 %v2662_v29  ;;  %1089 = vmatprep.mubr.bf16.mxu0 %v2734_v59  ;;  %v2889_v29 = vld [vmem:[#allocation8 + $0x130] ss:$8 sps:$4 sm:$0xff]  }
  0x9f   :  { %1059 = vmatprep.subr.bf16.mxu0 %v2667_v31  ;;  %931 = vmatpush1.bf16.msra.mxu1 %v2873_v17  ;;  %v2897_v31 = vld [vmem:[#allocation8 + $0x140] ss:$8 sps:$4 sm:$0xff]   ;;  %v2925_v59 = vld [vmem:[#allocation8 + $0x170] ss:$8 sps:$4 sm:$0xff]  }
  0xa0   :  { %932 = vmatprep.subr.bf16.mxu1 %v2876_v22 }
  0xa2   :  { %1060 = vmatpush1.bf16.msra.mxu0 %v2675_v33  ;;  %v2900_v33 = vld [vmem:[#allocation8 + $0x154] ss:$8 sps:$4 sm:$0xff]  }
  0xa3   :  { %1061 = vmatprep.subr.bf16.mxu0 %v2680_v35  ;;  %933 = vmatpush1.bf16.msra.mxu1 %v2881_v23  ;;  %v160_v35 = vld [vmem:[#allocation5 + $0x18] sm:$0xff] }
  0xa4   :  { %934 = vmatprep.subr.bf16.mxu1 %v2884_v28 }
  0xa6   :  { %1062 = vmatpush1.bf16.msra.mxu0 %v2687_v37  ;;  %v167_v37 = vld [vmem:[#allocation5 + $0x50] sm:$0xff] }
  0xa7   :  { %1063 = vmatprep.subr.bf16.mxu0 %v2692_v39  ;;  %935 = vmatpush1.bf16.msra.mxu1 %v2889_v29  ;;  %v2905_v39 = vld [vmem:[#allocation8 + $0x150] ss:$8 sps:$4 sm:$0xff]  }
  0xa8   :  { %936 = vmatprep.subr.bf16.mxu1 %v2892_v30 }
  0xaa   :  { %1064 = vmatpush1.bf16.msra.mxu0 %v2699_v43  ;;  %v2907_v43 = vpack.c.bf16 %v167_v37, %v160_v35 }
  0xab   :  { %1065 = vmatprep.subr.bf16.mxu0 %v2704_v45  ;;  %937 = vmatpush1.bf16.msra.mxu1 %v2897_v31  ;;  %v2910_v45 = vld [vmem:[#allocation8 + $0x164] ss:$8 sps:$4 sm:$0xff]  }
  0xac   :  { %938 = vmatprep.subr.bf16.mxu1 %v2900_v33  ;;  %v181_v46 = vunpack.c.l.bf16 %v2907_v43 }
  0xae   :  { %1066 = vmatpush1.bf16.msra.mxu0 %v2713_v48  ;;  %v188_v48 = vunpack.c.h.bf16 %v2907_v43 }
  0xaf   :  { %1067 = vmatprep.subr.bf16.mxu0 %v2718_v50  ;;  %939 = vmatpush1.bf16.msra.mxu1 %v2905_v39  ;;  %v195_v50 = vsub.f32 %v160_v35, %v181_v46  ;;  %v166_v35 = vld [vmem:[#allocation5 + $0x48] sm:$0xff] }
  0xb0   :  { %940 = vmatprep.subr.bf16.mxu1 %v2910_v45  ;;  %v202_v51 = vsub.f32 %v167_v37, %v188_v48 }
  0xb2   :  { %1068 = vmatpush1.bf16.msra.mxu0 %v2729_v55  ;;  %v2920_v55 = vld [vmem:[#allocation8 + $0x174] ss:$8 sps:$4 sm:$0xff]  }
  0xb3   :  { %1069 = vmatprep.subr.bf16.mxu0 %v2732_v58  ;;  %941 = vmatpush1.bf16.msra.mxu1 %v2917_v49  ;;  %v209_v58 = vpack.c.bf16 %v202_v51, %v195_v50 }
  0xb4   :  { %942 = vmatprep.subr.bf16.mxu1 %v2920_v55 }
  0xb5   :  { %960 = vmatprep.mubr.bf16.mxu1 %v209_v58 }
  0xb6   :  { %1070 = vmatpush1.bf16.msra.mxu0 %v2743_v14  ;;  %v2928_v14 = vld [vmem:[#allocation8 + $0x184] ss:$8 sps:$4 sm:$0xff]  }
  0xb7   :  { %1071 = vmatprep.subr.bf16.mxu0 %v2748_v19  ;;  %943 = vmatpush1.bf16.msra.mxu1 %v2925_v59  ;;  %v2933_v19 = vld [vmem:[#allocation8 + $0x180] ss:$8 sps:$4 sm:$0xff]  }
  0xb8   :  { %944 = vmatprep.subr.bf16.mxu1 %v2928_v14 }
  0xba   :  { %1072 = vmatpush1.bf16.msra.mxu0 %v2755_v53  ;;  %v2944_v53 = vld [vmem:[#allocation8 + $0x1a4] ss:$8 sps:$4 sm:$0xff]  }
  0xbb   :  { %1073 = vmatprep.subr.bf16.mxu0 %v2760_v47  ;;  %945 = vmatpush1.bf16.msra.mxu1 %v2933_v19  ;;  %v2941_v47 = vld [vmem:[#allocation8 + $0x190] ss:$8 sps:$4 sm:$0xff]  }
  0xbc   :  { %946 = vmatprep.subr.bf16.mxu1 %v2936_v13 }
  0xbe   :  { %1074 = vmatpush1.bf16.msra.mxu0 %v2768_v61  ;;  %v2949_v61 = vld [vmem:[#allocation8 + $0x1a0] ss:$8 sps:$4 sm:$0xff]  }
  0xbf   :  { %1075 = vmatprep.subr.bf16.mxu0 %v2773_v63  ;;  %947 = vmatpush1.bf16.msra.mxu1 %v2941_v47  ;;  %v2327_v63 = vld [vmem:[#allocation8 + $0x1b4] ss:$8 sps:$4 sm:$0xff]  }
  0xc0   :  { %948 = vmatprep.subr.bf16.mxu1 %v2944_v53 }
  0xc2   :  { %1076 = vmatpush1.bf16.msra.mxu0 %v2782_v21  ;;  %v2325_v21 = vld [vmem:[#allocation8 + $0x1b0] ss:$8 sps:$4 sm:$0xff]  }
  0xc3   :  { %1077 = vmatprep.subr.bf16.mxu0 %v2784_v41  ;;  %949 = vmatpush1.bf16.msra.mxu1 %v2949_v61  ;;  %v2330_v41 = vld [vmem:[#allocation8 + $0x1c4] ss:$8 sps:$4 sm:$0xff]  }
  0xc4   :  { %950 = vmatprep.subr.bf16.mxu1 %v2327_v63 }
  0xc6   :  { %1078 = vmatpush1.bf16.msra.mxu0 %v2792_v57  ;;  %v159_v57 = vld [vmem:[#allocation5 + $0x10] sm:$0xff] }
  0xc7   :  { %1079 = vmatprep.subr.bf16.mxu0 %v2797_v56  ;;  %951 = vmatpush1.bf16.msra.mxu1 %v2325_v21  ;;  %v2333_v56 = vld [vmem:[#allocation8 + $0x1d4] ss:$8 sps:$4 sm:$0xff]   ;;  %v173_v37 = vpack.c.bf16 %v166_v35, %v159_v57 }
  0xc8   :  { %952 = vmatprep.subr.bf16.mxu1 %v2330_v41 }
  0xc9   :  { %v180_v46 = vunpack.c.l.bf16 %v173_v37  ;;  %v187_v48 = vunpack.c.h.bf16 %v173_v37 }
  0xca   :  { %1080 = vmatpush1.bf16.msra.mxu0 %v2804_v18  ;;  %v2331_v18 = vld [vmem:[#allocation8 + $0x1d0] ss:$8 sps:$4 sm:$0xff]  }
  0xcb   :  { %1081 = vmatprep.subr.bf16.mxu0 %v2809_v20  ;;  %953 = vmatpush1.bf16.msra.mxu1 %v2328_v62  ;;  %v2336_v20 = vld [vmem:[#allocation8 + $0x1e4] ss:$8 sps:$4 sm:$0xff]   ;;  %v194_v50 = vsub.f32 %v159_v57, %v180_v46  ;;  %v201_v51 = vsub.f32 %v166_v35, %v187_v48 }
  0xcc   :  { %954 = vmatprep.subr.bf16.mxu1 %v2333_v56 }
  0xce   :  { %1082 = vmatpush1.bf16.msra.mxu0 %v2818_v42  ;;  %v2334_v42 = vld [vmem:[#allocation8 + $0x1e0] ss:$8 sps:$4 sm:$0xff]  }
  0xcf   :  { %1083 = vmatprep.subr.bf16.mxu0 %v2823_v44  ;;  %955 = vmatpush1.bf16.msra.mxu1 %v2331_v18  ;;  %v2339_v44 = vld [vmem:[#allocation8 + $0x1f4] ss:$8 sps:$4 sm:$0xff]  }
  0xd0   :  { %956 = vmatprep.subr.bf16.mxu1 %v2336_v20 }
  0xd2   :  { %1084 = vmatpush1.bf16.msra.mxu0 %v2834_v34  ;;  %v2337_v34 = vld [vmem:[#allocation8 + $0x1f0] ss:$8 sps:$4 sm:$0xff]  }
  0xd3   :  { %1085 = vmatprep.subr.bf16.mxu0 %v2839_v32  ;;  %957 = vmatpush1.bf16.msra.mxu1 %v2334_v42  ;;  %v208_v32 = vpack.c.bf16 %v201_v51, %v194_v50 }
  0xd4   :  { %958 = vmatprep.subr.bf16.mxu1 %v2339_v44 }
  0xd6   :  { %1086 = vmatpush1.bf16.msra.mxu0 %v2848_v25  ;;  %v3337_v25 = vld [vmem:[#allocation41_spill] sm:$0xff] }
  0xd7   :  { %1087 = vmatprep.subr.bf16.mxu0 %v2851_v54  ;;  %959 = vmatpush1.bf16.msra.mxu1 %v2337_v34  ;;  %v3339_v54 = vld [vmem:[#allocation43_spill] sm:$0xff] }
  0xda   :  { %1088 = vmatpush1.bf16.msra.mxu0 %v2856_v38  ;;  %961 = vmatmul.mubr.bf16.vlgmr.msra.gmra.mrb[0].mxu1 %v208_v32  ;;  %v3340_v38 = vld [vmem:[#allocation44_spill] sm:$0xff] }
  0xdb   :  { %1100 = vmatprep.subr.bf16.mxu0 %v2859_v40  ;;  %v3341_v40 = vld [vmem:[#allocation39_spill] sm:$0xff] }
  0xdd   :  { %1090 = vmatmul.mubr.bf16.vlgmr.msra.gmra.mrb[0].mxu0 %v2828_v36  ;;  %v3338_v36 = vld [vmem:[#allocation42_spill] sm:$0xff] }
  0xde   :  { %1101 = vmatpush1.bf16.msra.mxu0 %v2865_v26  ;;  %1132 = vmatprep.mubr.bf16.mxu0 %v2907_v43  ;;  %v3342_v26 = vld [vmem:[#allocation45_spill] sm:$0xff]  ;;  %v3353_v43 = vld [vmem:[#allocation55_spill] sm:$0xff] }
  0xdf   :  { %1102 = vmatprep.subr.bf16.mxu0 %v2868_v27  ;;  %v3343_v27 = vmov 0  }
  0xe2   :  { %1103 = vmatpush1.bf16.msra.mxu0 %v2873_v17  ;;  %v3344_v17 = vld [vmem:[#allocation46_spill] sm:$0xff] }
  0xe3   :  { %1104 = vmatprep.subr.bf16.mxu0 %v2876_v22  ;;  %v3345_v22 = vld [vmem:[#allocation47_spill] sm:$0xff] }
  0xe6   :  { %1105 = vmatpush1.bf16.msra.mxu0 %v2881_v23  ;;  %v3346_v23 = vld [vmem:[#allocation48_spill] sm:$0xff] }
  0xe7   :  { %1106 = vmatprep.subr.bf16.mxu0 %v2884_v28  ;;  %v3347_v28 = vld [vmem:[#allocation49_spill] sm:$0xff] }
  0xea   :  { %1107 = vmatpush1.bf16.msra.mxu0 %v2889_v29  ;;  %v3348_v29 = vld [vmem:[#allocation50_spill] sm:$0xff] }
  0xeb   :  { %1108 = vmatprep.subr.bf16.mxu0 %v2892_v30  ;;  %v3349_v30 = vld [vmem:[#allocation51_spill] sm:$0xff] }
  0xee   :  { %1109 = vmatpush1.bf16.msra.mxu0 %v2897_v31  ;;  %v3350_v31 = vld [vmem:[#allocation52_spill] sm:$0xff] }
  0xef   :  { %1110 = vmatprep.subr.bf16.mxu0 %v2900_v33  ;;  %v3351_v33 = vld [vmem:[#allocation53_spill] sm:$0xff] }
  0xf2   :  { %1111 = vmatpush1.bf16.msra.mxu0 %v2905_v39  ;;  %v3352_v39 = vld [vmem:[#allocation54_spill] sm:$0xff] }
  0xf3   :  { %1112 = vmatprep.subr.bf16.mxu0 %v2910_v45  ;;  %v3354_v45 = vld [vmem:[#allocation57_spill] sm:$0xff] }
  0xf6   :  { %1113 = vmatpush1.bf16.msra.mxu0 %v2917_v49  ;;  %v3355_v49 = vld [vmem:[#allocation56_spill] sm:$0xff] }
  0xf7   :  { %1114 = vmatprep.subr.bf16.mxu0 %v2920_v55 }
  0xfa   :  { %1115 = vmatpush1.bf16.msra.mxu0 %v2925_v59 }
  0xfb   :  { %1116 = vmatprep.subr.bf16.mxu0 %v2928_v14 }
  0xfe   :  { %1117 = vmatpush1.bf16.msra.mxu0 %v2933_v19 }
  0xff   :  { %1118 = vmatprep.subr.bf16.mxu0 %v2936_v13 }
 0x102   :  { %1119 = vmatpush1.bf16.msra.mxu0 %v2941_v47 }
 0x103   :  { %1120 = vmatprep.subr.bf16.mxu0 %v2944_v53 }
 0x106   :  { %1121 = vmatpush1.bf16.msra.mxu0 %v2949_v61 }
 0x107   :  { %1122 = vmatprep.subr.bf16.mxu0 %v2327_v63 }
 0x10a   :  { %1123 = vmatpush1.bf16.msra.mxu0 %v2325_v21 }
 0x10b   :  { %1124 = vmatprep.subr.bf16.mxu0 %v2330_v41 }
 0x10e   :  { %1125 = vmatpush1.bf16.msra.mxu0 %v2328_v62 }
 0x10f   :  { %1126 = vmatprep.subr.bf16.mxu0 %v2333_v56 }
 0x112   :  { %1127 = vmatpush1.bf16.msra.mxu0 %v2331_v18 }
 0x113   :  { %1128 = vmatprep.subr.bf16.mxu0 %v2336_v20 }
 0x116   :  { %1129 = vmatpush1.bf16.msra.mxu0 %v2334_v42 }
 0x117   :  { %1130 = vmatprep.subr.bf16.mxu0 %v2339_v44 }
 0x11a   :  { %1131 = vmatpush1.bf16.msra.mxu0 %v2337_v34 }
 0x11b   :  { %1143 = vmatprep.subr.bf16.mxu0 %v2598_v0  ;;  %v3322_v0 = vld [vmem:[#allocation25_spill] sm:$0xff] }
 0x11d   :  { %1133 = vmatmul.mubr.bf16.vlgmr.msra.gmra.mrb[0].mxu0 %v173_v37 }
 0x11e   :  { %1144 = vmatpush1.bf16.msra.mxu0 %v2600_v1  ;;  %1175 = vmatprep.mubr.bf16.mxu0 %v2635_v15  ;;  %v3323_v1 = vld [vmem:[#allocation26_spill] sm:$0xff] }
 0x11f   :  { %1145 = vmatprep.subr.bf16.mxu0 %v2603_v2  ;;  %v3324_v2 = vld [vmem:[#allocation27_spill] sm:$0xff]  ;;  %v3335_v15 = vld [vmem:[#allocation38_spill] sm:$0xff] }
 0x122   :  { %1146 = vmatpush1.bf16.msra.mxu0 %v2606_v3  ;;  %v3325_v3 = vld [vmem:[#allocation28_spill] sm:$0xff] }
 0x123   :  { %1147 = vmatprep.subr.bf16.mxu0 %v2609_v4  ;;  %v3326_v4 = vld [vmem:[#allocation29_spill] sm:$0xff] }
 0x126   :  { %1148 = vmatpush1.bf16.msra.mxu0 %v2612_v5  ;;  %v3327_v5 = vld [vmem:[#allocation30_spill] sm:$0xff] }
 0x127   :  { %1149 = vmatprep.subr.bf16.mxu0 %v2615_v6  ;;  %v3328_v6 = vld [vmem:[#allocation31_spill] sm:$0xff] }
 0x12a   :  { %1150 = vmatpush1.bf16.msra.mxu0 %v2618_v7  ;;  %v3329_v7 = vld [vmem:[#allocation32_spill] sm:$0xff] }
 0x12b   :  { %1151 = vmatprep.subr.bf16.mxu0 %v2621_v8  ;;  %v3330_v8 = vld [vmem:[#allocation33_spill] sm:$0xff] }
 0x12e   :  { %1152 = vmatpush1.bf16.msra.mxu0 %v2624_v9  ;;  %v3331_v9 = vld [vmem:[#allocation34_spill] sm:$0xff] }
 0x12f   :  { %1153 = vmatprep.subr.bf16.mxu0 %v2627_v10  ;;  %v3332_v10 = vld [vmem:[#allocation35_spill] sm:$0xff] }
 0x132   :  { %1154 = vmatpush1.bf16.msra.mxu0 %v2630_v11  ;;  %v3333_v11 = vld [vmem:[#allocation36_spill] sm:$0xff] }
 0x133   :  { %1155 = vmatprep.subr.bf16.mxu0 %v2633_v12  ;;  %v3334_v12 = vld [vmem:[#allocation37_spill] sm:$0xff] }
 0x136   :  { %1156 = vmatpush1.bf16.msra.mxu0 %v2638_v16  ;;  %v3336_v16 = vld [vmem:[#allocation40_spill] sm:$0xff] }
 0x137   :  { %1157 = vmatprep.subr.bf16.mxu0 %v3322_v0 }
 0x13a   :  { %1158 = vmatpush1.bf16.msra.mxu0 %v3323_v1 }
 0x13b   :  { %1159 = vmatprep.subr.bf16.mxu0 %v3324_v2 }
 0x13e   :  { %1160 = vmatpush1.bf16.msra.mxu0 %v3325_v3 }
 0x13f   :  { %1161 = vmatprep.subr.bf16.mxu0 %v3326_v4 }
 0x142   :  { %1162 = vmatpush1.bf16.msra.mxu0 %v3327_v5 }
 0x143   :  { %1163 = vmatprep.subr.bf16.mxu0 %v3328_v6 }
 0x146   :  { %1164 = vmatpush1.bf16.msra.mxu0 %v3329_v7 }
 0x147   :  { %1165 = vmatprep.subr.bf16.mxu0 %v3330_v8 }
 0x14a   :  { %1166 = vmatpush1.bf16.msra.mxu0 %v3331_v9 }
 0x14b   :  { %1167 = vmatprep.subr.bf16.mxu0 %v3332_v10 }
 0x14e   :  { %1168 = vmatpush1.bf16.msra.mxu0 %v3333_v11 }
 0x14f   :  { %1169 = vmatprep.subr.bf16.mxu0 %v3334_v12 }
 0x152   :  { %1170 = vmatpush1.bf16.msra.mxu0 %v3335_v15 }
 0x153   :  { %1171 = vmatprep.subr.bf16.mxu0 %v3336_v16 }
 0x156   :  { %1172 = vmatpush1.bf16.msra.mxu0 %v3337_v25 }
 0x157   :  { %1173 = vmatprep.subr.bf16.mxu0 %v3338_v36 }
 0x15a   :  { %1174 = vmatpush1.bf16.msra.mxu0 %v3339_v54 }
 0x15b   :  { %1186 = vmatprep.subr.bf16.mxu0 %v3340_v38 }
 0x15d   :  { %1176 = vmatmul.mubr.bf16.vlgmr.msra.gmra.mrb[0].mxu0 %v3341_v40 }
 0x15e   :  { %1187 = vmatpush1.bf16.msra.mxu0 %v3342_v26  ;;  %1218 = vmatprep.mubr.bf16.mxu0 %v3343_v27 }
 0x15f   :  { %1188 = vmatprep.subr.bf16.mxu0 %v3344_v17 }
 0x162   :  { %1189 = vmatpush1.bf16.msra.mxu0 %v3345_v22 }
 0x163   :  { %1190 = vmatprep.subr.bf16.mxu0 %v3346_v23 }
 0x166   :  { %1191 = vmatpush1.bf16.msra.mxu0 %v3347_v28 }
 0x167   :  { %1192 = vmatprep.subr.bf16.mxu0 %v3348_v29 }
 0x16a   :  { %1193 = vmatpush1.bf16.msra.mxu0 %v3349_v30 }
 0x16b   :  { %1194 = vmatprep.subr.bf16.mxu0 %v3350_v31 }
 0x16e   :  { %1195 = vmatpush1.bf16.msra.mxu0 %v3351_v33 }
 0x16f   :  { %1196 = vmatprep.subr.bf16.mxu0 %v3352_v39 }
 0x172   :  { %1197 = vmatpush1.bf16.msra.mxu0 %v3353_v43 }
 0x173   :  { %1198 = vmatprep.subr.bf16.mxu0 %v3354_v45 }
 0x176   :  { %1199 = vmatpush1.bf16.msra.mxu0 %v2832_v24 }
 0x177   :  { %1200 = vmatprep.subr.bf16.mxu0 %v2837_v60 }
 0x17a   :  { %1201 = vmatpush1.bf16.msra.mxu0 %v2846_v52 }
 0x17d   :  { %1219 = vmatmul.mubr.bf16.vlgmr.msra.gmra.mrb[0].mxu0 %v3355_v49 }
 0x1ad   :  { %v962_v55 = vpop.f32.mrb[0].mxu1 }
 0x1ae   :  { %v964_v58 = vpop.f32.mrb[1].mxu1 }
 0x1af   :  { %v966_v59 = vpop.f32.mrb[2].mxu1 }
 0x1b0   :  { %v968_v14 = vpop.f32.mrb[3].mxu1 }
 0x1b1   :  { %2413 = shalt.err (!%p2410_p4)  }
 0x1b2   :  { %s2414_s24 = scalar_lea.vmem %s154_s9, 2048  ;;  %p2419_p6 = scmp.lt.s32.totalorder %s154_s9, %s154_s9 }
 0x1b3   :  { %p2415_p5 = scmp.ne.s32.totalorder %s154_s9, %s2414_s24  ;;  %p2420_p7 = scmp.lt.s32.totalorder %s2414_s24, %s2414_s24 }
 0x1b5   :  { %p2421_p8 = por %p2420_p7, %p2419_p6 }
 0x1b7   :  { %p2422_p9 = pnand %p2421_p8, %p2415_p5 }
 0x1b9   :  { %2425 = shalt.err (!%p2422_p9)  }
 0x1ba   :  { %156 = dma.hbm_to_vmem [thread:$0]  %s3251_s13, 2048, %s154_s9, [#allocation4 + $0x2]  ;;  %v1231_v52 = vlaneseq  ;;  %v1229_v19 = vld [vmem:[%s3240_s2] sm:$0x3] }
 0x1bc   :  { %v3050_v60 = vshrl.u32 %v1231_v52, 7 }
 0x1be   :  { %v3053_v24 = vsub.s32 0, %v3050_v60  ;;  %v3059_v13 = vsub.s32 1, %v3050_v60 }
 0x1c0   :  { %v1234_v47 = vrot.slane %v1229_v19, %v3053_v24  ;;  %v1238_v61 = vrot.slane %v1229_v19, %v3059_v13 }
 0x250   :  { %v1220_v53 = vpop.f32.mrb[0].mxu0 }
 0x251   :  { %v2123_v63 = vadd.f32 %v1220_v53, %v962_v55  ;;  %v1222_v21 = vpop.f32.mrb[1].mxu0 }
 0x252   :  { %v2124_v41 = vadd.f32 %v1222_v21, %v964_v58  ;;  %v1224_v62 = vpop.f32.mrb[2].mxu0 }
 0x253   :  { %v1241_v57 = vadd.f32 %v2123_v63, %v1234_v47  ;;  %v2125_v35 = vadd.f32 %v1224_v62, %v966_v59  ;;  %v1226_v56 = vpop.f32.mrb[3].mxu0 }
 0x254   :  { %v1242_v37 = vadd.f32 %v2124_v41, %v1238_v61  ;;  %v2126_v18 = vadd.f32 %v1226_v56, %v968_v14 }
 0x255   :  { %v3063_v20 = vmax.f32 %v1241_v57, 0.0  ;;  %v1243_v46 = vadd.f32 %v2125_v35, %v1234_v47 }
 0x256   :  { %v3065_v48 = vmax.f32 %v1242_v37, 0.0  ;;  %v1244_v42 = vadd.f32 %v2126_v18, %v1238_v61  ;;  %v2478_v61 = vmov 1966171168  }
 0x257   :  { %v3067_v44 = vmax.f32 %v1243_v46, 0.0  ;;  %v1263_v51 = vmul.f32 %v3063_v20, %v3063_v20  ;;  %v1312_v63 = vunpack.c.l.s4 %v2478_v61 }
 0x258   :  { %v3069_v50 = vmax.f32 %v1244_v42, 0.0  ;;  %v1264_v0 = vmul.f32 %v3065_v48, %v3065_v48 }
 0x259   :  { %v1249_v34 = vadd.f32 %v3067_v44, %v3063_v20  ;;  %v1265_v32 = vmul.f32 %v3067_v44, %v3067_v44  ;;  %v1313_v21 = vunpack.c.0.s8 %v1312_v63 }
 0x25a   :  { %v1256_v1 = vadd.f32 %v3069_v50, %v3065_v48  ;;  %v1266_v2 = vmul.f32 %v3069_v50, %v3069_v50 }
 0x25b   :  { %v1250_v3 = vrot.slane %v1249_v34, 4  ;;  %v1267_v4 = vadd.f32 %v1265_v32, %v1263_v51  ;;  %v3084_v62 = vsub.s32 %v1313_v21, %v3050_v60  ;;  %v1327_v60 = vld [vmem:[%s3241_s3] sm:$0x3] }
 0x25c   :  { %v1257_v5 = vrot.slane %v1256_v1, 4  ;;  %v1274_v6 = vadd.f32 %v1266_v2, %v1264_v0 }
 0x25d   :  { %v1251_v7 = vadd.f32 %v1250_v3, %v1249_v34  ;;  %v1268_v8 = vrot.slane %v1267_v4, 4  ;;  %v1291_v3 = vld [vmem:[%s3242_s4] sm:$0x3] }
 0x25e   :  { %v1258_v9 = vadd.f32 %v1257_v5, %v1256_v1  ;;  %v1275_v10 = vrot.slane %v1274_v6, 4  ;;  %v1352_v5 = vrot.slane %v1327_v60, %v3053_v24 }
 0x25f   :  { %v1252_v11 = vrot.slane %v1251_v7, 2  ;;  %v1269_v12 = vadd.f32 %v1268_v8, %v1267_v4 }
 0x260   :  { %v1259_v15 = vrot.slane %v1258_v9, 2  ;;  %v1276_v16 = vadd.f32 %v1275_v10, %v1274_v6  ;;  %v1356_v6 = vrot.slane %v1327_v60, %v3059_v13  ;;  %v1359_v10 = vmul.f32 %v1352_v5, %v3063_v20 }
 0x261   :  { %v1253_v25 = vadd.f32 %v1252_v11, %v1251_v7  ;;  %v1270_v36 = vrot.slane %v1269_v12, 2 }
 0x262   :  { %v1260_v54 = vadd.f32 %v1259_v15, %v1258_v9  ;;  %v1277_v38 = vrot.slane %v1276_v16, 2  ;;  %v1360_v11 = vmul.f32 %v1356_v6, %v3065_v48  ;;  %v1362_v15 = vmul.f32 %v1356_v6, %v3069_v50 }
 0x263   :  { %v1254_v40 = vrot.slane %v1253_v25, 1  ;;  %v1271_v26 = vadd.f32 %v1270_v36, %v1269_v12  ;;  %v1361_v12 = vmul.f32 %v1352_v5, %v3067_v44 }
 0x264   :  { %v1261_v27 = vrot.slane %v1260_v54, 1  ;;  %v1278_v17 = vadd.f32 %v1277_v38, %v1276_v16 }
 0x265   :  { %v1255_v22 = vadd.f32 %v1254_v40, %v1253_v25  ;;  %v1272_v23 = vrot.slane %v1271_v26, 1 }
 0x266   :  { %v1262_v28 = vadd.f32 %v1261_v27, %v1260_v54  ;;  %v1279_v29 = vrot.slane %v1278_v17, 1 }
 0x267   :  { %v1273_v30 = vadd.f32 %v1272_v23, %v1271_v26  ;;  %v1281_v31 = vmul.f32 0.0625, %v1255_v22  ;;  %v2479_v26 = vmov -1.0  }
 0x268   :  { %v1280_v33 = vadd.f32 %v1279_v29, %v1278_v17  ;;  %v1282_v39 = vmul.f32 0.0625, %v1262_v28 }
 0x269   :  { %v1283_v43 = vmul.f32 0.0625, %v1273_v30  ;;  %v1285_v45 = vmul.f32 %v1281_v31, %v1281_v31 }
 0x26a   :  { %v1284_v49 = vmul.f32 0.0625, %v1280_v33  ;;  %v1286_v55 = vmul.f32 %v1282_v39, %v1282_v39  ;;  %v1330_v58 = vcombine.low %v1281_v31, %v1282_v39 }
 0x26b   :  { %v1287_v59 = vsub.f32 %v1283_v43, %v1285_v45 }
 0x26c   :  { %v1288_v14 = vsub.f32 %v1284_v49, %v1286_v55  ;;  %v1337_v34 = vrot.slane %v1330_v58, %v3084_v62 }
 0x26d   :  { %v1289_v52 = vmax.f32 %v1287_v59, 0.0 }
 0x26e   :  { %v1290_v19 = vmax.f32 %v1288_v14, 0.0  ;;  %v1344_v2 = vrot.slane %v1337_v34, %v3084_v62 }
 0x26f   :  { %v1292_v47 = vadd.f32 0.0001, %v1289_v52 }
 0x270   :  { %v1293_v53 = vadd.f32 0.0001, %v1290_v19  ;;  %v1346_v8 = vmul.f32 %v1344_v2, %v1327_v60 }
 0x271   :  { %2340 = vrsqrt.f32 %v1292_v47  ;;  %vm1296_vm0 = vcmp.eq.f32.partialorder %v1292_v47, inf  ;;  %v1299_v56 = vand.u32 2147483648, %v1292_v47  ;;  %vm1298_vm1 = vcmp.eq.f32.partialorder %v1292_v47, 0.0 }
 0x272   :  { %2342 = vrsqrt.f32 %v1293_v53  ;;  %vm1303_vm2 = vcmp.eq.f32.partialorder %v1293_v53, inf  ;;  %v1306_v46 = vand.u32 2147483648, %v1293_v53  ;;  %vm1305_vm3 = vcmp.eq.f32.partialorder %v1293_v53, 0.0 }
 0x27b   :  { %v2341_v41 = vpop.eup %2340 }
 0x27c   :  { %v2343_v57 = vpop.eup %2342  ;;  %v1295_v35 = vmul.f32 %v2341_v41, %v1292_v47 }
 0x27d   :  { %v1302_v37 = vmul.f32 %v2343_v57, %v1293_v53 }
 0x27e   :  { %v1297_v18 = vsel %vm1296_vm0, %v1292_v47, %v1295_v35 }
 0x27f   :  { %v1300_v42 = vsel %vm1298_vm1, %v1299_v56, %v1297_v18  ;;  %v1304_v51 = vsel %vm1303_vm2, %v1293_v53, %v1302_v37 }
 0x280   :  { %v1307_v32 = vsel %vm1305_vm3, %v1306_v46, %v1304_v51 }
 0x281   :  { %v1310_v0 = vcombine.low %v1300_v42, %v1307_v32 }
 0x283   :  { %v1317_v1 = vrot.slane %v1310_v0, %v3084_v62 }
 0x285   :  { %v1324_v4 = vrot.slane %v1317_v1, %v3084_v62 }
 0x287   :  { %v1326_v7 = vmul.f32 %v1324_v4, %v1291_v3 }
 0x289   :  { %v1347_v9 = vsub.f32 %v1326_v7, %v1346_v8 }
 0x28b   :  { %v1367_v16 = vrot.slane %v1347_v9, %v3053_v24  ;;  %v1371_v25 = vrot.slane %v1347_v9, %v3059_v13 }
 0x28d   :  { %v1374_v36 = vadd.f32 %v1367_v16, %v1359_v10  ;;  %v1375_v54 = vadd.f32 %v1371_v25, %v1360_v11  ;;  %v1376_v38 = vadd.f32 %v1367_v16, %v1361_v12  ;;  %v1377_v40 = vadd.f32 %v1371_v25, %v1362_v15 }
 0x28f   :  { %vm1378_vm4 = vcmp.ge.f32.partialorder %v1374_v36, 0.0  ;;  %vm1379_vm5 = vcmp.ge.f32.partialorder %v1375_v54, 0.0  ;;  %vm1380_vm6 = vcmp.ge.f32.partialorder %v1376_v38, 0.0  ;;  %vm1381_vm7 = vcmp.ge.f32.partialorder %v1377_v40, 0.0 }
 0x290   :  { %v3105_v20 = vsel %vm1378_vm4, 1.0, %v2479_v26  ;;  %v1383_v48 = vsel %vm1379_vm5, 1.0, %v2479_v26  ;;  %v3109_v44 = vsel %vm1380_vm6, 1.0, %v2479_v26  ;;  %v1385_v50 = vsel %vm1381_vm7, 1.0, %v2479_v26 }
 0x291   :  { %v1386_v27 = vpack.c.bf16 %v3109_v44, %v3105_v20  ;;  %v1387_v17 = vpack.c.bf16 %v1385_v50, %v1383_v48 }
 0x292   :  { %2452 = dma.done.wait [#allocation4], 4096 }
 0x293   :  { %2453 = vsyncadd [#allocation4], 4294963200  ;;  %1468 = vmatprep.mubr.bf16.mxu1 %v1387_v17  ;;  %v1393_v22 = vld [vmem:[#allocation2 + $0x8] sm:$0xff]  ;;  %v1392_v23 = vld [vmem:[#allocation2] sm:$0xff] }
 0x294   :  { %v1395_v28 = vld [vmem:[#allocation2 + $0x18] sm:$0xff]  ;;  %1436 = vmatprep.subr.bf16.mxu1 %v1393_v22  ;;  %v1394_v29 = vld [vmem:[#allocation2 + $0x10] sm:$0xff]  ;;  %v1397_v30 = vld [vmem:[#allocation2 + $0x28] sm:$0xff] }
 0x295   :  { %1437 = vmatpush1.bf16.msra.mxu1 %v1392_v23  ;;  %v1396_v31 = vld [vmem:[#allocation2 + $0x20] sm:$0xff]  ;;  %v1399_v33 = vld [vmem:[#allocation2 + $0x38] sm:$0xff]  ;;  %v1398_v39 = vld [vmem:[#allocation2 + $0x30] sm:$0xff] }
 0x296   :  { %1438 = vmatprep.subr.bf16.mxu1 %v1395_v28  ;;  %v1401_v43 = vld [vmem:[#allocation2 + $0x48] sm:$0xff]  ;;  %v1400_v45 = vld [vmem:[#allocation2 + $0x40] sm:$0xff]  ;;  %v1403_v49 = vld [vmem:[#allocation2 + $0x58] sm:$0xff] }
 0x297   :  { %v1402_v55 = vld [vmem:[#allocation2 + $0x50] sm:$0xff]  ;;  %v1405_v58 = vld [vmem:[#allocation2 + $0x68] sm:$0xff]  ;;  %v1404_v59 = vld [vmem:[#allocation2 + $0x60] sm:$0xff] }
 0x298   :  { %v1407_v14 = vld [vmem:[#allocation2 + $0x78] sm:$0xff]  ;;  %v1406_v52 = vld [vmem:[#allocation2 + $0x70] sm:$0xff]  ;;  %v1409_v19 = vld [vmem:[#allocation2 + $0x88] sm:$0xff] }
 0x299   :  { %1439 = vmatpush1.bf16.msra.mxu1 %v1394_v29  ;;  %v1408_v47 = vld [vmem:[#allocation2 + $0x80] sm:$0xff]  ;;  %v1411_v53 = vld [vmem:[#allocation2 + $0x98] sm:$0xff]  ;;  %v1410_v61 = vld [vmem:[#allocation2 + $0x90] sm:$0xff] }
 0x29a   :  { %1440 = vmatprep.subr.bf16.mxu1 %v1397_v30  ;;  %v1413_v63 = vld [vmem:[#allocation2 + $0xa8] sm:$0xff]  ;;  %v1412_v21 = vld [vmem:[#allocation2 + $0xa0] sm:$0xff]  ;;  %v1415_v41 = vld [vmem:[#allocation2 + $0xb8] sm:$0xff] }
 0x29b   :  { %v1414_v57 = vld [vmem:[#allocation2 + $0xb0] sm:$0xff]  ;;  %v1417_v35 = vld [vmem:[#allocation2 + $0xc8] sm:$0xff]  ;;  %v1416_v56 = vld [vmem:[#allocation2 + $0xc0] sm:$0xff] }
 0x29c   :  { %v1419_v37 = vld [vmem:[#allocation2 + $0xd8] sm:$0xff]  ;;  %v1418_v18 = vld [vmem:[#allocation2 + $0xd0] sm:$0xff]  ;;  %v1421_v46 = vld [vmem:[#allocation2 + $0xe8] sm:$0xff] }
 0x29d   :  { %1441 = vmatpush1.bf16.msra.mxu1 %v1396_v31  ;;  %v1420_v42 = vld [vmem:[#allocation2 + $0xe0] sm:$0xff]  ;;  %v1423_v51 = vld [vmem:[#allocation2 + $0xf8] sm:$0xff]  ;;  %v1422_v34 = vld [vmem:[#allocation2 + $0xf0] sm:$0xff] }
 0x29e   :  { %1442 = vmatprep.subr.bf16.mxu1 %v1399_v33  ;;  %v1424_v32 = vld [vmem:[%s3244_s6] sm:$0x3] }
 0x29f   :  { %v1429_v0 = vrot.slane %v1424_v32, %v3053_v24  ;;  %v1433_v60 = vrot.slane %v1424_v32, %v3059_v13 }
 0x2a1   :  { %1443 = vmatpush1.bf16.msra.mxu1 %v1398_v39 }
 0x2a2   :  { %1444 = vmatprep.subr.bf16.mxu1 %v1401_v43 }
 0x2a5   :  { %1445 = vmatpush1.bf16.msra.mxu1 %v1400_v45 }
 0x2a6   :  { %1446 = vmatprep.subr.bf16.mxu1 %v1403_v49 }
 0x2a9   :  { %1447 = vmatpush1.bf16.msra.mxu1 %v1402_v55 }
 0x2aa   :  { %1448 = vmatprep.subr.bf16.mxu1 %v1405_v58 }
 0x2ad   :  { %1449 = vmatpush1.bf16.msra.mxu1 %v1404_v59 }
 0x2ae   :  { %1450 = vmatprep.subr.bf16.mxu1 %v1407_v14 }
 0x2b1   :  { %1451 = vmatpush1.bf16.msra.mxu1 %v1406_v52 }
 0x2b2   :  { %1452 = vmatprep.subr.bf16.mxu1 %v1409_v19 }
 0x2b5   :  { %1453 = vmatpush1.bf16.msra.mxu1 %v1408_v47 }
 0x2b6   :  { %1454 = vmatprep.subr.bf16.mxu1 %v1411_v53 }
 0x2b9   :  { %1455 = vmatpush1.bf16.msra.mxu1 %v1410_v61 }
 0x2ba   :  { %1456 = vmatprep.subr.bf16.mxu1 %v1413_v63 }
 0x2bd   :  { %1457 = vmatpush1.bf16.msra.mxu1 %v1412_v21 }
 0x2be   :  { %1458 = vmatprep.subr.bf16.mxu1 %v1415_v41 }
 0x2c1   :  { %1459 = vmatpush1.bf16.msra.mxu1 %v1414_v57 }
 0x2c2   :  { %1460 = vmatprep.subr.bf16.mxu1 %v1417_v35 }
 0x2c5   :  { %1461 = vmatpush1.bf16.msra.mxu1 %v1416_v56 }
 0x2c6   :  { %1462 = vmatprep.subr.bf16.mxu1 %v1419_v37 }
 0x2c9   :  { %1463 = vmatpush1.bf16.msra.mxu1 %v1418_v18 }
 0x2ca   :  { %1464 = vmatprep.subr.bf16.mxu1 %v1421_v46 }
 0x2cd   :  { %1465 = vmatpush1.bf16.msra.mxu1 %v1420_v42 }
 0x2ce   :  { %1466 = vmatprep.subr.bf16.mxu1 %v1423_v51 }
 0x2d1   :  { %1467 = vmatpush1.bf16.msra.mxu1 %v1422_v34 }
 0x2d4   :  { %1469 = vmatmul.mubr.bf16.vlgmr.msra.gmra.mrb[4].mxu1 %v1386_v27 }
 0x3a7   :  { %v1470_v1 = vpop.f32.mrb[4].mxu1 }
 0x3a8   :  { %v1471_v2 = vadd.f32 %v1470_v1, %v1429_v0  ;;  %v1472_v3 = vpop.f32.mrb[5].mxu1 }
 0x3a9   :  { %v1473_v4 = vadd.f32 %v1472_v3, %v1433_v60  ;;  %v1474_v5 = vpop.f32.mrb[6].mxu1 }
 0x3aa   :  { %v3122_v6 = vmax.f32 %v1471_v2, 0.0  ;;  %v1475_v7 = vadd.f32 %v1474_v5, %v1429_v0  ;;  %v1476_v8 = vpop.f32.mrb[7].mxu1 }
 0x3ab   :  { %v3124_v9 = vmax.f32 %v1473_v4, 0.0  ;;  %v1477_v10 = vadd.f32 %v1476_v8, %v1433_v60 }
 0x3ac   :  { %v3126_v11 = vmax.f32 %v1475_v7, 0.0  ;;  %v1497_v15 = vmul.f32 %v3122_v6, %v3122_v6 }
 0x3ad   :  { %v3128_v12 = vmax.f32 %v1477_v10, 0.0  ;;  %v1498_v36 = vmul.f32 %v3124_v9, %v3124_v9 }
 0x3ae   :  { %v1483_v16 = vadd.f32 %v3126_v11, %v3122_v6  ;;  %v1499_v25 = vmul.f32 %v3126_v11, %v3126_v11 }
 0x3af   :  { %v1490_v54 = vadd.f32 %v3128_v12, %v3124_v9  ;;  %v1500_v38 = vmul.f32 %v3128_v12, %v3128_v12 }
 0x3b0   :  { %v1484_v40 = vrot.slane %v1483_v16, 4  ;;  %v1501_v20 = vadd.f32 %v1499_v25, %v1497_v15 }
 0x3b1   :  { %v1491_v48 = vrot.slane %v1490_v54, 4  ;;  %v1508_v44 = vadd.f32 %v1500_v38, %v1498_v36 }
 0x3b2   :  { %v1485_v50 = vadd.f32 %v1484_v40, %v1483_v16  ;;  %v1502_v27 = vrot.slane %v1501_v20, 4  ;;  %v1561_v16 = vld [vmem:[%s3245_s7] sm:$0x3] }
 0x3b3   :  { %v1492_v17 = vadd.f32 %v1491_v48, %v1490_v54  ;;  %v1509_v22 = vrot.slane %v1508_v44, 4  ;;  %v1525_v54 = vld [vmem:[%s3246_s8] sm:$0x3]  ;;  %v1586_v40 = vrot.slane %v1561_v16, %v3053_v24 }
 0x3b4   :  { %v1486_v23 = vrot.slane %v1485_v50, 2  ;;  %v1503_v28 = vadd.f32 %v1502_v27, %v1501_v20  ;;  %v1590_v20 = vrot.slane %v1561_v16, %v3059_v13 }
 0x3b5   :  { %v1493_v29 = vrot.slane %v1492_v17, 2  ;;  %v1510_v30 = vadd.f32 %v1509_v22, %v1508_v44  ;;  %v1593_v27 = vmul.f32 %v1586_v40, %v3122_v6  ;;  %v1595_v22 = vmul.f32 %v1586_v40, %v3126_v11 }
 0x3b6   :  { %v1487_v31 = vadd.f32 %v1486_v23, %v1485_v50  ;;  %v1504_v33 = vrot.slane %v1503_v28, 2  ;;  %v1596_v23 = vmul.f32 %v1590_v20, %v3128_v12 }
 0x3b7   :  { %v1494_v39 = vadd.f32 %v1493_v29, %v1492_v17  ;;  %v1511_v43 = vrot.slane %v1510_v30, 2  ;;  %v1594_v17 = vmul.f32 %v1590_v20, %v3124_v9 }
 0x3b8   :  { %v1488_v45 = vrot.slane %v1487_v31, 1  ;;  %v1505_v49 = vadd.f32 %v1504_v33, %v1503_v28 }
 0x3b9   :  { %v1495_v55 = vrot.slane %v1494_v39, 1  ;;  %v1512_v58 = vadd.f32 %v1511_v43, %v1510_v30 }
 0x3ba   :  { %v1489_v59 = vadd.f32 %v1488_v45, %v1487_v31  ;;  %v1506_v14 = vrot.slane %v1505_v49, 1 }
 0x3bb   :  { %v1496_v52 = vadd.f32 %v1495_v55, %v1494_v39  ;;  %v1513_v19 = vrot.slane %v1512_v58, 1 }
 0x3bc   :  { %v1507_v47 = vadd.f32 %v1506_v14, %v1505_v49  ;;  %v1515_v53 = vmul.f32 0.0625, %v1489_v59 }
 0x3bd   :  { %v1514_v61 = vadd.f32 %v1513_v19, %v1512_v58  ;;  %v1516_v63 = vmul.f32 0.0625, %v1496_v52 }
 0x3be   :  { %v1517_v21 = vmul.f32 0.0625, %v1507_v47  ;;  %v1519_v41 = vmul.f32 %v1515_v53, %v1515_v53 }
 0x3bf   :  { %v1518_v57 = vmul.f32 0.0625, %v1514_v61  ;;  %v1520_v35 = vmul.f32 %v1516_v63, %v1516_v63  ;;  %v1564_v56 = vcombine.low %v1515_v53, %v1516_v63 }
 0x3c0   :  { %v1521_v37 = vsub.f32 %v1517_v21, %v1519_v41 }
 0x3c1   :  { %v1522_v18 = vsub.f32 %v1518_v57, %v1520_v35  ;;  %v1571_v8 = vrot.slane %v1564_v56, %v3084_v62 }
 0x3c2   :  { %v1523_v46 = vmax.f32 %v1521_v37, 0.0 }
 0x3c3   :  { %v1524_v42 = vmax.f32 %v1522_v18, 0.0  ;;  %v1578_v36 = vrot.slane %v1571_v8, %v3084_v62 }
 0x3c4   :  { %v1526_v51 = vadd.f32 0.0001, %v1523_v46 }
 0x3c5   :  { %v1527_v34 = vadd.f32 0.0001, %v1524_v42  ;;  %v1580_v44 = vmul.f32 %v1578_v36, %v1561_v16 }
 0x3c6   :  { %2344 = vrsqrt.f32 %v1526_v51  ;;  %vm1530_vm8 = vcmp.eq.f32.partialorder %v1526_v51, inf  ;;  %v1533_v1 = vand.u32 2147483648, %v1526_v51  ;;  %vm1532_vm9 = vcmp.eq.f32.partialorder %v1526_v51, 0.0 }
 0x3c7   :  { %2346 = vrsqrt.f32 %v1527_v34  ;;  %vm1537_vm10 = vcmp.eq.f32.partialorder %v1527_v34, inf  ;;  %v1540_v4 = vand.u32 2147483648, %v1527_v34  ;;  %vm1539_vm11 = vcmp.eq.f32.partialorder %v1527_v34, 0.0 }
 0x3d0   :  { %v2345_v32 = vpop.eup %2344 }
 0x3d1   :  { %v2347_v0 = vpop.eup %2346  ;;  %v1529_v60 = vmul.f32 %v2345_v32, %v1526_v51 }
 0x3d2   :  { %v1536_v2 = vmul.f32 %v2347_v0, %v1527_v34 }
 0x3d3   :  { %v1531_v3 = vsel %vm1530_vm8, %v1526_v51, %v1529_v60 }
 0x3d4   :  { %v1534_v5 = vsel %vm1532_vm9, %v1533_v1, %v1531_v3  ;;  %v1538_v7 = vsel %vm1537_vm10, %v1527_v34, %v1536_v2 }
 0x3d5   :  { %v1541_v10 = vsel %vm1539_vm11, %v1540_v4, %v1538_v7 }
 0x3d6   :  { %v1544_v15 = vcombine.low %v1534_v5, %v1541_v10 }
 0x3d8   :  { %v1551_v25 = vrot.slane %v1544_v15, %v3084_v62 }
 0x3da   :  { %v1558_v38 = vrot.slane %v1551_v25, %v3084_v62 }
 0x3dc   :  { %v1560_v48 = vmul.f32 %v1558_v38, %v1525_v54 }
 0x3de   :  { %v1581_v50 = vsub.f32 %v1560_v48, %v1580_v44 }
 0x3e0   :  { %v1601_v28 = vrot.slane %v1581_v50, %v3053_v24  ;;  %v1605_v29 = vrot.slane %v1581_v50, %v3059_v13 }
 0x3e2   :  { %v1608_v30 = vadd.f32 %v1601_v28, %v1593_v27  ;;  %v1609_v31 = vadd.f32 %v1605_v29, %v1594_v17  ;;  %v1610_v33 = vadd.f32 %v1601_v28, %v1595_v22  ;;  %v1611_v39 = vadd.f32 %v1605_v29, %v1596_v23 }
 0x3e4   :  { %vm1612_vm12 = vcmp.ge.f32.partialorder %v1608_v30, 0.0  ;;  %vm1613_vm13 = vcmp.ge.f32.partialorder %v1609_v31, 0.0  ;;  %vm1614_vm14 = vcmp.ge.f32.partialorder %v1610_v33, 0.0  ;;  %vm1615_vm15 = vcmp.ge.f32.partialorder %v1611_v39, 0.0 }
 0x3e5   :  { %v3161_v6 = vsel %vm1612_vm12, 1.0, %v2479_v26  ;;  %v1617_v9 = vsel %vm1613_vm13, 1.0, %v2479_v26  ;;  %v3165_v11 = vsel %vm1614_vm14, 1.0, %v2479_v26  ;;  %v1619_v12 = vsel %vm1615_vm15, 1.0, %v2479_v26 }
 0x3e6   :  { %v1620_v43 = vpack.c.bf16 %v3165_v11, %v3161_v6  ;;  %v1621_v45 = vpack.c.bf16 %v1619_v12, %v1617_v9 }
 0x3e7   :  { %2454 = dma.done.wait [#allocation4 + $0x1], 4096 }
 0x3e8   :  { %2455 = vsyncadd [#allocation4 + $0x1], 4294963200  ;;  %1700 = vmatprep.mubr.bf16.mxu1 %v1621_v45  ;;  %v1625_v49 = vld [vmem:[#allocation2 + $0x108] sm:$0xff]  ;;  %v1624_v55 = vld [vmem:[#allocation2 + $0x100] sm:$0xff] }
 0x3e9   :  { %v1627_v58 = vld [vmem:[#allocation2 + $0x118] sm:$0xff]  ;;  %1668 = vmatprep.subr.bf16.mxu1 %v1625_v49  ;;  %v1626_v59 = vld [vmem:[#allocation2 + $0x110] sm:$0xff]  ;;  %v1629_v14 = vld [vmem:[#allocation2 + $0x128] sm:$0xff] }
 0x3ea   :  { %1669 = vmatpush1.bf16.msra.mxu1 %v1624_v55  ;;  %v1628_v52 = vld [vmem:[#allocation2 + $0x120] sm:$0xff]  ;;  %v1631_v19 = vld [vmem:[#allocation2 + $0x138] sm:$0xff]  ;;  %v1630_v47 = vld [vmem:[#allocation2 + $0x130] sm:$0xff] }
 0x3eb   :  { %1670 = vmatprep.subr.bf16.mxu1 %v1627_v58  ;;  %v1633_v53 = vld [vmem:[#allocation2 + $0x148] sm:$0xff]  ;;  %v1632_v61 = vld [vmem:[#allocation2 + $0x140] sm:$0xff]  ;;  %v1635_v63 = vld [vmem:[#allocation2 + $0x158] sm:$0xff] }
 0x3ec   :  { %v1634_v21 = vld [vmem:[#allocation2 + $0x150] sm:$0xff]  ;;  %v1637_v41 = vld [vmem:[#allocation2 + $0x168] sm:$0xff]  ;;  %v1636_v57 = vld [vmem:[#allocation2 + $0x160] sm:$0xff] }
 0x3ed   :  { %v1639_v35 = vld [vmem:[#allocation2 + $0x178] sm:$0xff]  ;;  %v1638_v56 = vld [vmem:[#allocation2 + $0x170] sm:$0xff]  ;;  %v1641_v37 = vld [vmem:[#allocation2 + $0x188] sm:$0xff] }
 0x3ee   :  { %1671 = vmatpush1.bf16.msra.mxu1 %v1626_v59  ;;  %v1640_v18 = vld [vmem:[#allocation2 + $0x180] sm:$0xff]  ;;  %v1643_v46 = vld [vmem:[#allocation2 + $0x198] sm:$0xff]  ;;  %v1642_v42 = vld [vmem:[#allocation2 + $0x190] sm:$0xff] }
 0x3ef   :  { %1672 = vmatprep.subr.bf16.mxu1 %v1629_v14  ;;  %v1645_v51 = vld [vmem:[#allocation2 + $0x1a8] sm:$0xff]  ;;  %v1644_v34 = vld [vmem:[#allocation2 + $0x1a0] sm:$0xff]  ;;  %v1647_v32 = vld [vmem:[#allocation2 + $0x1b8] sm:$0xff] }
 0x3f0   :  { %v1646_v0 = vld [vmem:[#allocation2 + $0x1b0] sm:$0xff]  ;;  %v1649_v60 = vld [vmem:[#allocation2 + $0x1c8] sm:$0xff]  ;;  %v1648_v1 = vld [vmem:[#allocation2 + $0x1c0] sm:$0xff] }
 0x3f1   :  { %v1651_v2 = vld [vmem:[#allocation2 + $0x1d8] sm:$0xff]  ;;  %v1650_v3 = vld [vmem:[#allocation2 + $0x1d0] sm:$0xff]  ;;  %v1653_v4 = vld [vmem:[#allocation2 + $0x1e8] sm:$0xff] }
 0x3f2   :  { %1673 = vmatpush1.bf16.msra.mxu1 %v1628_v52  ;;  %v1652_v5 = vld [vmem:[#allocation2 + $0x1e0] sm:$0xff]  ;;  %v1655_v7 = vld [vmem:[#allocation2 + $0x1f8] sm:$0xff]  ;;  %v1654_v8 = vld [vmem:[#allocation2 + $0x1f0] sm:$0xff] }
 0x3f3   :  { %1674 = vmatprep.subr.bf16.mxu1 %v1631_v19  ;;  %v1656_v10 = vld [vmem:[%s3248_s10] sm:$0x3] }
 0x3f4   :  { %v1661_v15 = vrot.slane %v1656_v10, %v3053_v24  ;;  %v1665_v16 = vrot.slane %v1656_v10, %v3059_v13 }
 0x3f6   :  { %1675 = vmatpush1.bf16.msra.mxu1 %v1630_v47 }
 0x3f7   :  { %1676 = vmatprep.subr.bf16.mxu1 %v1633_v53 }
 0x3fa   :  { %1677 = vmatpush1.bf16.msra.mxu1 %v1632_v61 }
 0x3fb   :  { %1678 = vmatprep.subr.bf16.mxu1 %v1635_v63 }
 0x3fe   :  { %1679 = vmatpush1.bf16.msra.mxu1 %v1634_v21 }
 0x3ff   :  { %1680 = vmatprep.subr.bf16.mxu1 %v1637_v41 }
 0x402   :  { %1681 = vmatpush1.bf16.msra.mxu1 %v1636_v57 }
 0x403   :  { %1682 = vmatprep.subr.bf16.mxu1 %v1639_v35 }
 0x406   :  { %1683 = vmatpush1.bf16.msra.mxu1 %v1638_v56 }
 0x407   :  { %1684 = vmatprep.subr.bf16.mxu1 %v1641_v37 }
 0x40a   :  { %1685 = vmatpush1.bf16.msra.mxu1 %v1640_v18 }
 0x40b   :  { %1686 = vmatprep.subr.bf16.mxu1 %v1643_v46 }
 0x40e   :  { %1687 = vmatpush1.bf16.msra.mxu1 %v1642_v42 }
 0x40f   :  { %1688 = vmatprep.subr.bf16.mxu1 %v1645_v51 }
 0x412   :  { %1689 = vmatpush1.bf16.msra.mxu1 %v1644_v34 }
 0x413   :  { %1690 = vmatprep.subr.bf16.mxu1 %v1647_v32 }
 0x416   :  { %1691 = vmatpush1.bf16.msra.mxu1 %v1646_v0 }
 0x417   :  { %1692 = vmatprep.subr.bf16.mxu1 %v1649_v60 }
 0x41a   :  { %1693 = vmatpush1.bf16.msra.mxu1 %v1648_v1 }
 0x41b   :  { %1694 = vmatprep.subr.bf16.mxu1 %v1651_v2 }
 0x41e   :  { %1695 = vmatpush1.bf16.msra.mxu1 %v1650_v3 }
 0x41f   :  { %1696 = vmatprep.subr.bf16.mxu1 %v1653_v4 }
 0x422   :  { %1697 = vmatpush1.bf16.msra.mxu1 %v1652_v5 }
 0x423   :  { %1698 = vmatprep.subr.bf16.mxu1 %v1655_v7 }
 0x426   :  { %1699 = vmatpush1.bf16.msra.mxu1 %v1654_v8 }
 0x429   :  { %1701 = vmatmul.mubr.bf16.vlgmr.msra.gmra.mrb[8].mxu1 %v1620_v43 }
 0x4fc   :  { %v1702_v25 = vpop.f32.mrb[8].mxu1 }
 0x4fd   :  { %v1703_v36 = vadd.f32 %v1702_v25, %v1661_v15  ;;  %v1704_v54 = vpop.f32.mrb[9].mxu1 }
 0x4fe   :  { %v1705_v38 = vadd.f32 %v1704_v54, %v1665_v16  ;;  %v1706_v40 = vpop.f32.mrb[10].mxu1 }
 0x4ff   :  { %v3178_v20 = vmax.f32 %v1703_v36, 0.0  ;;  %v1707_v48 = vadd.f32 %v1706_v40, %v1661_v15  ;;  %v1708_v44 = vpop.f32.mrb[11].mxu1 }
 0x500   :  { %v3180_v50 = vmax.f32 %v1705_v38, 0.0  ;;  %v1709_v27 = vadd.f32 %v1708_v44, %v1665_v16 }
 0x501   :  { %v3182_v17 = vmax.f32 %v1707_v48, 0.0  ;;  %v1729_v23 = vmul.f32 %v3178_v20, %v3178_v20 }
 0x502   :  { %v3184_v22 = vmax.f32 %v1709_v27, 0.0  ;;  %v1730_v30 = vmul.f32 %v3180_v50, %v3180_v50 }
 0x503   :  { %v1715_v28 = vadd.f32 %v3182_v17, %v3178_v20  ;;  %v1731_v29 = vmul.f32 %v3182_v17, %v3182_v17 }
 0x504   :  { %v1722_v31 = vadd.f32 %v3184_v22, %v3180_v50  ;;  %v1732_v33 = vmul.f32 %v3184_v22, %v3184_v22 }
 0x505   :  { %v1716_v39 = vrot.slane %v1715_v28, 4  ;;  %v1733_v6 = vadd.f32 %v1731_v29, %v1729_v23 }
 0x506   :  { %v1723_v9 = vrot.slane %v1722_v31, 4  ;;  %v1740_v11 = vadd.f32 %v1732_v33, %v1730_v30 }
 0x507   :  { %v1717_v12 = vadd.f32 %v1716_v39, %v1715_v28  ;;  %v1734_v43 = vrot.slane %v1733_v6, 4  ;;  %v1793_v28 = vld [vmem:[%s3249_s11] sm:$0x3] }
 0x508   :  { %v1724_v45 = vadd.f32 %v1723_v9, %v1722_v31  ;;  %v1741_v49 = vrot.slane %v1740_v11, 4  ;;  %v1757_v31 = vld [vmem:[%s3250_s12] sm:$0x3]  ;;  %v1818_v39 = vrot.slane %v1793_v28, %v3053_v24 }
 0x509   :  { %v1718_v55 = vrot.slane %v1717_v12, 2  ;;  %v1735_v58 = vadd.f32 %v1734_v43, %v1733_v6  ;;  %v1822_v6 = vrot.slane %v1793_v28, %v3059_v13 }
 0x50a   :  { %v1725_v59 = vrot.slane %v1724_v45, 2  ;;  %v1742_v14 = vadd.f32 %v1741_v49, %v1740_v11  ;;  %v1825_v43 = vmul.f32 %v1818_v39, %v3178_v20  ;;  %v1827_v49 = vmul.f32 %v1818_v39, %v3182_v17 }
 0x50b   :  { %v1719_v52 = vadd.f32 %v1718_v55, %v1717_v12  ;;  %v1736_v19 = vrot.slane %v1735_v58, 2  ;;  %v1828_v55 = vmul.f32 %v1822_v6, %v3184_v22 }
 0x50c   :  { %v1726_v47 = vadd.f32 %v1725_v59, %v1724_v45  ;;  %v1743_v53 = vrot.slane %v1742_v14, 2  ;;  %v1826_v45 = vmul.f32 %v1822_v6, %v3180_v50 }
 0x50d   :  { %v1720_v61 = vrot.slane %v1719_v52, 1  ;;  %v1737_v63 = vadd.f32 %v1736_v19, %v1735_v58 }
 0x50e   :  { %v1727_v21 = vrot.slane %v1726_v47, 1  ;;  %v1744_v41 = vadd.f32 %v1743_v53, %v1742_v14 }
 0x50f   :  { %v1721_v57 = vadd.f32 %v1720_v61, %v1719_v52  ;;  %v1738_v35 = vrot.slane %v1737_v63, 1 }
 0x510   :  { %v1728_v56 = vadd.f32 %v1727_v21, %v1726_v47  ;;  %v1745_v37 = vrot.slane %v1744_v41, 1 }
 0x511   :  { %v1739_v18 = vadd.f32 %v1738_v35, %v1737_v63  ;;  %v1747_v46 = vmul.f32 0.0625, %v1721_v57 }
 0x512   :  { %v1746_v42 = vadd.f32 %v1745_v37, %v1744_v41  ;;  %v1748_v51 = vmul.f32 0.0625, %v1728_v56 }
 0x513   :  { %v1749_v34 = vmul.f32 0.0625, %v1739_v18  ;;  %v1751_v32 = vmul.f32 %v1747_v46, %v1747_v46 }
 0x514   :  { %v1750_v0 = vmul.f32 0.0625, %v1746_v42  ;;  %v1752_v60 = vmul.f32 %v1748_v51, %v1748_v51  ;;  %v1796_v1 = vcombine.low %v1747_v46, %v1748_v51 }
 0x515   :  { %v1753_v2 = vsub.f32 %v1749_v34, %v1751_v32 }
 0x516   :  { %v1754_v3 = vsub.f32 %v1750_v0, %v1752_v60  ;;  %v1803_v44 = vrot.slane %v1796_v1, %v3084_v62 }
 0x517   :  { %v1755_v4 = vmax.f32 %v1753_v2, 0.0 }
 0x518   :  { %v1756_v5 = vmax.f32 %v1754_v3, 0.0  ;;  %v1810_v30 = vrot.slane %v1803_v44, %v3084_v62 }
 0x519   :  { %v1758_v7 = vadd.f32 0.0001, %v1755_v4 }
 0x51a   :  { %v1759_v8 = vadd.f32 0.0001, %v1756_v5  ;;  %v1812_v11 = vmul.f32 %v1810_v30, %v1793_v28 }
 0x51b   :  { %2348 = vrsqrt.f32 %v1758_v7  ;;  %vm1762_vm0 = vcmp.eq.f32.partialorder %v1758_v7, inf  ;;  %v1765_v25 = vand.u32 2147483648, %v1758_v7  ;;  %vm1764_vm1 = vcmp.eq.f32.partialorder %v1758_v7, 0.0 }
 0x51c   :  { %2350 = vrsqrt.f32 %v1759_v8  ;;  %vm1769_vm2 = vcmp.eq.f32.partialorder %v1759_v8, inf  ;;  %v1772_v38 = vand.u32 2147483648, %v1759_v8  ;;  %vm1771_vm3 = vcmp.eq.f32.partialorder %v1759_v8, 0.0 }
 0x525   :  { %v2349_v10 = vpop.eup %2348 }
 0x526   :  { %v2351_v15 = vpop.eup %2350  ;;  %v1761_v16 = vmul.f32 %v2349_v10, %v1758_v7 }
 0x527   :  { %v1768_v36 = vmul.f32 %v2351_v15, %v1759_v8 }
 0x528   :  { %v1763_v54 = vsel %vm1762_vm0, %v1758_v7, %v1761_v16 }
 0x529   :  { %v1766_v40 = vsel %vm1764_vm1, %v1765_v25, %v1763_v54  ;;  %v1770_v48 = vsel %vm1769_vm2, %v1759_v8, %v1768_v36 }
 0x52a   :  { %v1773_v27 = vsel %vm1771_vm3, %v1772_v38, %v1770_v48 }
 0x52b   :  { %v1776_v23 = vcombine.low %v1766_v40, %v1773_v27 }
 0x52d   :  { %v1783_v29 = vrot.slane %v1776_v23, %v3084_v62 }
 0x52f   :  { %v1790_v33 = vrot.slane %v1783_v29, %v3084_v62 }
 0x531   :  { %v1792_v9 = vmul.f32 %v1790_v33, %v1757_v31 }
 0x533   :  { %v1813_v12 = vsub.f32 %v1792_v9, %v1812_v11 }
 0x535   :  { %v1833_v58 = vrot.slane %v1813_v12, %v3053_v24  ;;  %v1837_v59 = vrot.slane %v1813_v12, %v3059_v13 }
 0x537   :  { %v1840_v62 = vadd.f32 %v1833_v58, %v1825_v43  ;;  %v1841_v14 = vadd.f32 %v1837_v59, %v1826_v45  ;;  %v1842_v52 = vadd.f32 %v1833_v58, %v1827_v49  ;;  %v1843_v19 = vadd.f32 %v1837_v59, %v1828_v55 }
 0x539   :  { %vm1844_vm4 = vcmp.ge.f32.partialorder %v1840_v62, 0.0  ;;  %vm1845_vm5 = vcmp.ge.f32.partialorder %v1841_v14, 0.0  ;;  %vm1846_vm6 = vcmp.ge.f32.partialorder %v1842_v52, 0.0  ;;  %vm1847_vm7 = vcmp.ge.f32.partialorder %v1843_v19, 0.0 }
 0x53a   :  { %v1848_v20 = vsel %vm1844_vm4, 1.0, %v2479_v26  ;;  %v1849_v50 = vsel %vm1845_vm5, 1.0, %v2479_v26  ;;  %v1850_v17 = vsel %vm1846_vm6, 1.0, %v2479_v26  ;;  %v1851_v22 = vsel %vm1847_vm7, 1.0, %v2479_v26 }
 0x53b   :  { %v1852_v47 = vpack.c.bf16 %v1850_v17, %v1848_v20  ;;  %v1853_v24 = vpack.c.bf16 %v1851_v22, %v1849_v50 }
 0x53c   :  { %2456 = dma.done.wait [#allocation4 + $0x2], 2048 }
 0x53d   :  { %2457 = vsyncadd [#allocation4 + $0x2], 4294965248  ;;  %1912 = vmatprep.mubr.bf16.mxu1 %v1853_v24  ;;  %v1865_v13 = vld [vmem:[#allocation3 + $0x40] sm:$0xff]  ;;  %v1866_v61 = vld [vmem:[#allocation3 + $0x48] sm:$0xff] }
 0x53e   :  { %v1857_v53 = vld [vmem:[#allocation3] sm:$0xff]  ;;  %2101 = vmatprep.subr.bf16.mxu1 %v1865_v13  ;;  %v1858_v63 = vld [vmem:[#allocation3 + $0x8] sm:$0xff]  ;;  %v1867_v21 = vld [vmem:[#allocation3 + $0x50] sm:$0xff] }
 0x53f   :  { %2102 = vmatpush3.bf16.msra.mxu1 %v1857_v53  ;;  %v1859_v41 = vld [vmem:[#allocation3 + $0x10] sm:$0xff]  ;;  %v1868_v57 = vld [vmem:[#allocation3 + $0x58] sm:$0xff]  ;;  %v1869_v35 = vld [vmem:[#allocation3 + $0x60] sm:$0xff] }
 0x540   :  { %2103 = vmatprep.subr.bf16.mxu1 %v1866_v61  ;;  %v1860_v26 = vld [vmem:[#allocation3 + $0x18] sm:$0xff]  ;;  %v1861_v56 = vld [vmem:[#allocation3 + $0x20] sm:$0xff]  ;;  %v1870_v37 = vld [vmem:[#allocation3 + $0x68] sm:$0xff] }
 0x541   :  { %v1862_v18 = vld [vmem:[#allocation3 + $0x28] sm:$0xff]  ;;  %v1871_v46 = vld [vmem:[#allocation3 + $0x70] sm:$0xff]  ;;  %v1872_v51 = vld [vmem:[#allocation3 + $0x78] sm:$0xff] }
 0x542   :  { %v1863_v42 = vld [vmem:[#allocation3 + $0x30] sm:$0xff]  ;;  %v1864_v34 = vld [vmem:[#allocation3 + $0x38] sm:$0xff]  ;;  %v2097_v60 = vld [vmem:[%s3252_s14] ss:$0 sm:$0xff]  ;;  %s2480_s14 = smov [#allocation10]  }
 0x543   :  { %2104 = vmatpush3.bf16.msra.mxu1 %v1858_v63  ;;  %s1948_s20 = sshll.u32 %s2480_s14, 4  ;;  %s1949_s20 = int_to_ptr.vmem [resolvable:$true] %s1948_s20 }
 0x544   :  { %2105 = vmatprep.subr.bf16.mxu1 %v1867_v21  ;;  %s2426_s21 = scalar_lea.vmem %s1949_s20, 256  ;;  %p2431_p11 = scmp.lt.s32.totalorder %s1949_s20, %s1949_s20 }
 0x545   :  { %p2427_p10 = scmp.ne.s32.totalorder %s1949_s20, %s2426_s21  ;;  %p2432_p12 = scmp.lt.s32.totalorder %s2426_s21, %s2426_s21 }
 0x547   :  { %2106 = vmatpush3.bf16.msra.mxu1 %v1859_v41  ;;  %p2433_p13 = por %p2432_p12, %p2431_p11 }
 0x548   :  { %2107 = vmatprep.subr.bf16.mxu1 %v1868_v57 }
 0x549   :  { %p2434_p0 = pnand %p2433_p13, %p2427_p10 }
 0x54b   :  { %2108 = vmatpush3.bf16.msra.mxu1 %v1860_v26 }
 0x54c   :  { %2109 = vmatprep.subr.bf16.mxu1 %v1869_v35 }
 0x54f   :  { %2110 = vmatpush3.bf16.msra.mxu1 %v1861_v56 }
 0x550   :  { %2111 = vmatprep.subr.bf16.mxu1 %v1870_v37 }
 0x553   :  { %2112 = vmatpush3.bf16.msra.mxu1 %v1862_v18 }
 0x554   :  { %2113 = vmatprep.subr.bf16.mxu1 %v1871_v46 }
 0x557   :  { %2114 = vmatpush3.bf16.msra.mxu1 %v1863_v42 }
 0x558   :  { %2115 = vmatprep.subr.bf16.mxu1 %v1872_v51 }
 0x55b   :  { %2116 = vmatpush3.bf16.msra.mxu1 %v1864_v34 }
 0x55e   :  { %1913 = vmatmul.mubr.bf16.vlgmr.msra.gmra.mrb[12].mxu1 %v1852_v47 }
 0x631   :  { %v2117_v32 = vpop.f32.mrb[12].mxu1 }
 0x632   :  { %v2118_v0 = vpop.f32.mrb[13].mxu1 }
 0x633   :  { %v2119_v1 = vadd.f32 %v2118_v0, %v2117_v32  ;;  %v2120_v2 = vpop.f32.mrb[14].mxu1 }
 0x634   :  { %v2121_v3 = vpop.f32.mrb[15].mxu1 }
 0x635   :  { %v2122_v4 = vadd.f32 %v2121_v3, %v2120_v2  ;;  %v1915_v5 = vadd.f32 %v2119_v1, %v2097_v60 }
 0x637   :  { %1921 = vmax.xlane.f32.xlu0 %v1915_v5  ;;  %v1918_v7 = vadd.f32 %v2122_v4, %v2097_v60 }
 0x63b   :  { %1923 = vmax.xlane.f32.xlu0 %v1918_v7 }
 0x6c4   :  { %v1922_v8 = vpop.xlane.xlu0 %1921 }
 0x6c5   :  { %v1925_v10 = vsub.f32 %v1915_v5, %v1922_v8 }
 0x6c7   :  { %v1927_v15 = vmul.f32 1.442695, %v1925_v10 }
 0x6c8   :  { %v1924_v16 = vpop.xlane.xlu0 %1923 }
 0x6c9   :  { %v1926_v25 = vsub.f32 %v1918_v7, %v1924_v16  ;;  %2352 = vpow2.f32 %v1927_v15 }
 0x6cb   :  { %v1929_v36 = vmul.f32 1.442695, %v1926_v25 }
 0x6cd   :  { %2354 = vpow2.f32 %v1929_v36 }
 0x6d3   :  { %v2353_v54 = vpop.eup %2352 }
 0x6d4   :  { %1931 = vadd.xlane.f32.xlu1 %v2353_v54 }
 0x6d7   :  { %v2355_v38 = vpop.eup %2354 }
 0x6d8   :  { %1933 = vadd.xlane.f32.xlu1 %v2355_v38 }
 0x761   :  { %v1932_v40 = vpop.xlane.xlu1 %1931 }
 0x762   :  { %2356 = vlog2.f32 %v1932_v40 }
 0x765   :  { %v1934_v48 = vpop.xlane.xlu1 %1933 }
 0x766   :  { %2358 = vlog2.f32 %v1934_v48 }
 0x76c   :  { %v2357_v44 = vpop.eup %2356 }
 0x76d   :  { %v1936_v27 = vmul.f32 0.6931472, %v2357_v44 }
 0x76f   :  { %v1939_v23 = vsub.f32 %v1925_v10, %v1936_v27 }
 0x770   :  { %v2359_v28 = vpop.eup %2358 }
 0x771   :  { %1941 = vst [vmem:[#allocation10] sm:$0xff] %v1939_v23  ;;  %v1938_v29 = vmul.f32 0.6931472, %v2359_v28 }
 0x773   :  { %v1940_v30 = vsub.f32 %v1926_v25, %v1938_v29 }
 0x775   :  { %1942 = vst [vmem:[#allocation10 + $0x8] sm:$0xff] %v1940_v30 }
 0x776   :  { %2437 = shalt.err (!%p2434_p0)
}
 0x777   :  { %s2438_s23 = scalar_lea.hbm %s3253_s15, 256 }
 0x778   :  { %p2439_p1 = scmp.ne.s32.totalorder %s3253_s15, %s2438_s23  ;;  %p2442_p2 = scmp.lt.u32.totalorder %s2438_s23, %s3253_s15 }
 0x77a   :  { %p2444_p3 = pnand %p2442_p2, %p2439_p1 }
 0x77c   :  { %2447 = shalt.err (!%p2444_p3)
}
 0x77d   :  { %s3356_s28 = smov 8  }
 0x77e   :  { %1954 = dma.vmem_to_hbm [thread:$0]  %s1949_s20, 256, %s3253_s15, [#allocation7], %s2464_s0, %s2464_s0, %s3356_s28  }
 0x77f   :  { %2458 = dma.done.wait [#allocation7], 256  }
 0x780   :  { %2459 = vsyncadd [#allocation7], 4294967040 }
 0x781   :  { %1958 = vsyncpa [#allocation6], 1 }
 0x782   :  { %1959 = vsyncpa [#allocation9], 1 }
 0x783   :  { %1960 = vsyncpa [#allocation7], 1 }
 0x784   :  { %1961 = vsyncmov [#allocation4] }
 0x787   :  { %s1962_s29 = vpop.sfrf %1961 }
 0x788   :  { %p2098_p4 = scmp.ne.s32.totalorder %s1962_s29, 0 }
 0x78a   :  { %1966 = shalt.err (%p2098_p4)  }
 0x78b   :  { %1968 = vsyncmov [#allocation4 + $0x1] }
 0x78e   :  { %s1969_s30 = vpop.sfrf %1968 }
 0x78f   :  { %p2099_p5 = scmp.ne.s32.totalorder %s1969_s30, 0 }
 0x791   :  { %1973 = shalt.err (%p2099_p5)  }
 0x792   :  { %1975 = vsyncmov [#allocation4 + $0x2] }
 0x795   :  { %s1976_s3 = vpop.sfrf %1975 }
 0x796   :  { %p2100_p6 = scmp.ne.s32.totalorder %s1976_s3, 0 }
 0x798   :  { %1980 = shalt.err (%p2100_p6)  }

// kernel: tpu_custom_call.1
= control target key start
LH: loop header
LB: loop body
LE: loop exit
PB: predicated region body
PF: predicated region fallthrough
CT: control target
= control target key end

     0   :  { %20 = vsyncpa [#allocation6], 0  ;;  %s3238_s0 = inlined_call_operand.hbm [shape: f32[16,896], index: 0, kind: input, shape index: {}]   ;;  %s3239_s1 = inlined_call_operand.hbm [shape: bf16[896,256], index: 1, kind: input, shape index: {}]   ;;  %s3240_s2 = inlined_call_operand.vmem [shape: f32[1,256], index: 2, kind: input, shape index: {}]   ;;  %s3241_s3 = inlined_call_operand.vmem [shape: f32[1,256], index: 3, kind: input, shape index: {}]   ;;  %s3242_s4 = inlined_call_operand.vmem [shape: f32[1,256], index: 4, kind: input, shape index: {}]   ;;  %s3243_s5 = inlined_call_operand.hbm [shape: bf16[256,256], index: 5, kind: input, shape index: {}]   ;;  %s3244_s6 = inlined_call_operand.vmem [shape: f32[1,256], index: 6, kind: input, shape index: {}]   ;;  %s3245_s7 = inlined_call_operand.vmem [shape: f32[1,256], index: 7, kind: input, shape index: {}]   ;;  %s3246_s8 = inlined_call_operand.vmem [shape: f32[1,256], index: 8, kind: input, shape index: {}]   ;;  %s3247_s9 = inlined_call_operand.hbm [shape: bf16[256,256], index: 9, kind: input, shape index: {}]   ;;  %s3248_s10 = inlined_call_operand.vmem [shape: f32[1,256], index: 10, kind: input, shape index: {}]   ;;  %s3249_s11 = inlined_call_operand.vmem [shape: f32[1,256], index: 11, kind: input, shape index: {}]   ;;  %s3250_s12 = inlined_call_operand.vmem [shape: f32[1,256], index: 12, kind: input, shape index: {}]   ;;  %s3251_s13 = inlined_call_operand.hbm [shape: bf16[256,128], index: 13, kind: input, shape index: {}]   ;;  %s3252_s14 = inlined_call_operand.vmem [shape: f32[1,128], index: 14, kind: input, shape index: {}]   ;;  %s3253_s15 = inlined_call_operand.hbm [shape: f32[16,128], index: 15, kind: output, shape index: {}]  }
   0x1   :  { %21 = vsyncpa [#allocation9], 0 }
   0x2   :  { %22 = vsyncpa [#allocation7], 0  ;;  %s2460_s18 = smov [#allocation5]   ;;  %s2360_s22 = scalar_lea.hbm %s3238_s0, 1792 }
   0x3   :  { %s28_s19 = sshll.u32 %s2460_s18, 4  ;;  %p2361_p0 = scmp.ne.s32.totalorder %s3238_s0, %s2360_s22  ;;  %s29_s19 = int_to_ptr.vmem [resolvable:$true] %s28_s19 }
   0x4   :  { %p2364_p1 = scmp.lt.u32.totalorder %s2360_s22, %s3238_s0 }
   0x6   :  { %p2366_p2 = pnand %p2364_p1, %p2361_p0 }
   0x8   :  { %2369 = shalt.err (!%p2366_p2)
}
   0x9   :  { %s2370_s27 = scalar_lea.vmem %s29_s19, 1792  ;;  %p2375_p4 = scmp.lt.s32.totalorder %s29_s19, %s29_s19 }
   0xa   :  { %p2371_p3 = scmp.ne.s32.totalorder %s29_s19, %s2370_s27  ;;  %p2376_p5 = scmp.lt.s32.totalorder %s2370_s27, %s2370_s27 }
   0xc   :  { %p2377_p6 = por %p2376_p5, %p2375_p4 }
   0xe   :  { %p2378_p7 = pnand %p2377_p6, %p2371_p3 }
  0x10   :  { %2381 = shalt.err (!%p2378_p7)
}
  0x11   :  { %s2461_s28 = smov 896   ;;  %s2462_s29 = smov 56  }
  0x12   :  { %34 = dma.hbm_to_vmem [thread:$0]  %s3238_s0, 1792, %s29_s19, [#allocation6], %s2461_s28, %s2461_s28, %s2462_s29  }
  0x13   :  { %s2463_s17 = smov [#allocation8]   ;;  %s2382_s22 = scalar_lea.hbm %s3239_s1, 14336 }
  0x14   :  { %s40_s18 = sshll.u32 %s2463_s17, 4  ;;  %p2383_p8 = scmp.ne.s32.totalorder %s3239_s1, %s2382_s22  ;;  %s41_s18 = int_to_ptr.vmem [resolvable:$true] %s40_s18 }
  0x15   :  { %p2386_p9 = scmp.lt.u32.totalorder %s2382_s22, %s3239_s1 }
  0x17   :  { %p2388_p10 = pnand %p2386_p9, %p2383_p8 }
  0x19   :  { %2391 = shalt.err (!%p2388_p10)
}
  0x1a   :  { %s2392_s27 = scalar_lea.vmem %s41_s18, 14336  ;;  %p2397_p12 = scmp.lt.s32.totalorder %s41_s18, %s41_s18 }
  0x1b   :  { %p2393_p11 = scmp.ne.s32.totalorder %s41_s18, %s2392_s27  ;;  %p2398_p13 = scmp.lt.s32.totalorder %s2392_s27, %s2392_s27 }
  0x1d   :  { %p2399_p0 = por %p2398_p13, %p2397_p12 }
  0x1f   :  { %p2400_p1 = pnand %p2399_p0, %p2393_p11 }
  0x21   :  { %2403 = shalt.err (!%p2400_p1)
}
  0x22   :  { %s2464_s0 = smov 128   ;;  %s3254_s19 = smov 8  }
  0x23   :  { %46 = dma.hbm_to_vmem [thread:$0]  %s3239_s1, 14336, %s41_s18, [#allocation9], %s2464_s0, %s2464_s0, %s3254_s19  }
  0x24   :  { %2448 = dma.done.wait [#allocation6], 1792  }
  0x25   :  { %2449 = vsyncadd [#allocation6], 4294965504 }
  0x26   :  { %2450 = dma.done.wait [#allocation9], 14336  }
  0x27   :  { %2451 = vsyncadd [#allocation9], 4294952960  ;;  %s78_s30 = sld [smem:[#allocation0]]   ;;  %98 = sst [smem:[#allocation12 + $0x4]] %s2464_s0 }
  0x28   :  { %102 = sst [smem:[#allocation12 + $0x6]] %s2464_s0  ;;  %s2466_s16 = smov [#allocation2]  }
  0x29   :  { %s86_s17 = sshll.u32 %s2466_s16, 4  ;;  %s2467_s20 = smov 256   ;;  %s87_s17 = int_to_ptr.vmem [resolvable:$true] %s86_s17 }
  0x2a   :  { %90 = sst [smem:[#allocation12]] %s2467_s20  ;;  %s2468_s21 = smov 2  }
  0x2b   :  { %92 = sst [smem:[#allocation12 + $0x1]] %s2467_s20  ;;  %s2469_s22 = smov 64  }
  0x2c   :  { %94 = sst [smem:[#allocation12 + $0x2]] %s2468_s21  ;;  %s2470_s23 = smov 4  }
  0x2d   :  { %96 = sst [smem:[#allocation12 + $0x3]] %s2469_s22  ;;  %s1981_s1 = sshll.u32 %s78_s30, 26 }
  0x2e   :  { %100 = sst [smem:[#allocation12 + $0x5]] %s2468_s21  ;;  %s1982_s18 = sadd.s32 134217728, %s1981_s1 }
  0x2f   :  { %104 = sst [smem:[#allocation12 + $0x7]] %s2469_s22  ;;  %s2471_s24 = smov [#allocation4]  }
  0x30   :  { %106 = sst [smem:[#allocation12 + $0x8]] %s2470_s23  ;;  %s2472_s25 = smov [#allocation11]  }
  0x31   :  { %108 = dma.general %s3243_s5, 4096, %s87_s17, %s2471_s24, %s2472_s25, [#allocation12], %s1982_s18, 0  }
  0x32   :  { %126 = sst [smem:[#allocation14]] %s2467_s20  ;;  %s2473_s28 = smov [#allocation2 + $0x100]  }
  0x33   :  { %128 = sst [smem:[#allocation14 + $0x1]] %s2467_s20  ;;  %s122_s29 = sshll.u32 %s2473_s28, 4  ;;  %s123_s29 = int_to_ptr.vmem [resolvable:$true] %s122_s29 }
  0x34   :  { %130 = sst [smem:[#allocation14 + $0x2]] %s2468_s21  ;;  %s2474_s30 = smov [#allocation4 + $0x1]  }
  0x35   :  { %132 = sst [smem:[#allocation14 + $0x3]] %s2469_s22  ;;  %s2475_s16 = smov [#allocation13]  }
  0x36   :  { %134 = sst [smem:[#allocation14 + $0x4]] %s2464_s0  ;;  %s2477_s5 = smov [#allocation3]  }
  0x37   :  { %136 = sst [smem:[#allocation14 + $0x5]] %s2468_s21  ;;  %s2404_s20 = scalar_lea.hbm %s3251_s13, 2048 }
  0x38   :  { %138 = sst [smem:[#allocation14 + $0x6]] %s2464_s0  ;;  %p2405_p2 = scmp.ne.s32.totalorder %s3251_s13, %s2404_s20 }
  0x39   :  { %140 = sst [smem:[#allocation14 + $0x7]] %s2469_s22  ;;  %p2408_p3 = scmp.lt.u32.totalorder %s2404_s20, %s3251_s13 }
  0x3a   :  { %142 = sst [smem:[#allocation14 + $0x8]] %s2470_s23 }
  0x3b   :  { %144 = dma.general %s3247_s9, 4096, %s123_s29, %s2474_s30, %s2475_s16, [#allocation14], %s1982_s18, 0  }
  0x3c   :  { %v2598_v0 = vld [vmem:[#allocation8 + $0x204] ss:$8 sps:$4 sm:$0xff]   ;;  %v2600_v1 = vld [vmem:[#allocation8 + $0x200] ss:$8 sps:$4 sm:$0xff]   ;;  %v2603_v2 = vld [vmem:[#allocation8 + $0x214] ss:$8 sps:$4 sm:$0xff]   ;;  %p2410_p4 = pnand %p2408_p3, %p2405_p2 }
  0x3d   :  { %971 = vmatprep.subr.bf16.mxu0 %v2598_v0  ;;  %v2606_v3 = vld [vmem:[#allocation8 + $0x210] ss:$8 sps:$4 sm:$0xff]   ;;  %v2609_v4 = vld [vmem:[#allocation8 + $0x224] ss:$8 sps:$4 sm:$0xff]   ;;  %v2612_v5 = vld [vmem:[#allocation8 + $0x220] ss:$8 sps:$4 sm:$0xff]  }
  0x3e   :  { %972 = vmatpush1.bf16.msra.mxu0 %v2600_v1  ;;  %v2615_v6 = vld [vmem:[#allocation8 + $0x234] ss:$8 sps:$4 sm:$0xff]   ;;  %v2618_v7 = vld [vmem:[#allocation8 + $0x230] ss:$8 sps:$4 sm:$0xff]   ;;  %v2621_v8 = vld [vmem:[#allocation8 + $0x244] ss:$8 sps:$4 sm:$0xff]  }
  0x3f   :  { %973 = vmatprep.subr.bf16.mxu0 %v2603_v2  ;;  %v2624_v9 = vld [vmem:[#allocation8 + $0x240] ss:$8 sps:$4 sm:$0xff]   ;;  %v2627_v10 = vld [vmem:[#allocation8 + $0x254] ss:$8 sps:$4 sm:$0xff]   ;;  %v2630_v11 = vld [vmem:[#allocation8 + $0x250] ss:$8 sps:$4 sm:$0xff]  }
  0x40   :  { %v2633_v12 = vld [vmem:[#allocation8 + $0x264] ss:$8 sps:$4 sm:$0xff]   ;;  %v162_v13 = vld [vmem:[#allocation5 + $0x28] sm:$0xff]  ;;  %v169_v14 = vld [vmem:[#allocation5 + $0x60] sm:$0xff]  ;;  %s153_s9 = sshll.u32 %s2477_s5, 4  ;;  %s154_s9 = int_to_ptr.vmem [resolvable:$true] %s153_s9 }
  0x41   :  { %v2635_v15 = vpack.c.bf16 %v169_v14, %v162_v13  ;;  %v2638_v16 = vld [vmem:[#allocation8 + $0x260] ss:$8 sps:$4 sm:$0xff]   ;;  %v2641_v17 = vld [vmem:[#allocation8 + $0x274] ss:$8 sps:$4 sm:$0xff]   ;;  %v2646_v22 = vld [vmem:[#allocation8 + $0x270] ss:$8 sps:$4 sm:$0xff]  }
  0x42   :  { %974 = vmatpush1.bf16.msra.mxu0 %v2606_v3  ;;  %3289 = vst [vmem:[#allocation25_spill] sm:$0xff] %v2641_v17  ;;  %3290 = vst [vmem:[#allocation26_spill] sm:$0xff] %v2646_v22  ;;  %v2649_v23 = vld [vmem:[#allocation8 + $0x284] ss:$8 sps:$4 sm:$0xff]   ;;  %v2652_v25 = vld [vmem:[#allocation8 + $0x280] ss:$8 sps:$4 sm:$0xff]  }
  0x43   :  { %975 = vmatprep.subr.bf16.mxu0 %v2609_v4  ;;  %v183_v18 = vunpack.c.l.bf16 %v2635_v15  ;;  %v190_v19 = vunpack.c.h.bf16 %v2635_v15  ;;  %3291 = vst [vmem:[#allocation27_spill] sm:$0xff] %v2649_v23  ;;  %3292 = vst [vmem:[#allocation28_spill] sm:$0xff] %v2652_v25  ;;  %v2655_v26 = vld [vmem:[#allocation8 + $0x294] ss:$8 sps:$4 sm:$0xff]   ;;  %v2657_v27 = vld [vmem:[#allocation8 + $0x290] ss:$8 sps:$4 sm:$0xff]  }
  0x44   :  { %3293 = vst [vmem:[#allocation29_spill] sm:$0xff] %v2655_v26  ;;  %3294 = vst [vmem:[#allocation30_spill] sm:$0xff] %v2657_v27  ;;  %v2659_v28 = vld [vmem:[#allocation8 + $0x4] ss:$8 sps:$4 sm:$0xff]   ;;  %v2662_v29 = vld [vmem:[#allocation8] ss:$8 sps:$4 sm:$0xff]  }
  0x45   :  { %v197_v20 = vsub.f32 %v162_v13, %v183_v18  ;;  %v204_v21 = vsub.f32 %v169_v14, %v190_v19  ;;  %v2665_v30 = vld [vmem:[#allocation8 + $0x2a4] ss:$8 sps:$4 sm:$0xff]   ;;  %v2667_v31 = vld [vmem:[#allocation8 + $0x14] ss:$8 sps:$4 sm:$0xff]   ;;  %885 = vmatprep.subr.bf16.mxu1 %v2659_v28  ;;  %v2671_v32 = vld [vmem:[#allocation8 + $0x2a0] ss:$8 sps:$4 sm:$0xff]  }
  0x46   :  { %976 = vmatpush1.bf16.msra.mxu0 %v2612_v5  ;;  %3295 = vst [vmem:[#allocation31_spill] sm:$0xff] %v2665_v30  ;;  %886 = vmatpush1.bf16.msra.mxu1 %v2662_v29  ;;  %3296 = vst [vmem:[#allocation32_spill] sm:$0xff] %v2671_v32  ;;  %v2675_v33 = vld [vmem:[#allocation8 + $0x10] ss:$8 sps:$4 sm:$0xff]   ;;  %v2678_v34 = vld [vmem:[#allocation8 + $0x2b4] ss:$8 sps:$4 sm:$0xff]  }
  0x47   :  { %977 = vmatprep.subr.bf16.mxu0 %v2615_v6  ;;  %v211_v24 = vpack.c.bf16 %v204_v21, %v197_v20  ;;  %887 = vmatprep.subr.bf16.mxu1 %v2667_v31  ;;  %3297 = vst [vmem:[#allocation33_spill] sm:$0xff] %v2678_v34  ;;  %v2680_v35 = vld [vmem:[#allocation8 + $0x24] ss:$8 sps:$4 sm:$0xff]   ;;  %v2683_v36 = vld [vmem:[#allocation8 + $0x2b0] ss:$8 sps:$4 sm:$0xff]  }
  0x48   :  { %3298 = vst [vmem:[#allocation34_spill] sm:$0xff] %v2683_v36  ;;  %v2687_v37 = vld [vmem:[#allocation8 + $0x20] ss:$8 sps:$4 sm:$0xff]   ;;  %v2690_v38 = vld [vmem:[#allocation8 + $0x2c4] ss:$8 sps:$4 sm:$0xff]   ;;  %v161_v41 = vld [vmem:[#allocation5 + $0x20] sm:$0xff] }
  0x49   :  { %1003 = vmatprep.mubr.bf16.mxu0 %v211_v24  ;;  %3299 = vst [vmem:[#allocation35_spill] sm:$0xff] %v2690_v38  ;;  %v2692_v39 = vld [vmem:[#allocation8 + $0x34] ss:$8 sps:$4 sm:$0xff]   ;;  %v2694_v40 = vld [vmem:[#allocation8 + $0x2c0] ss:$8 sps:$4 sm:$0xff]  }
  0x4a   :  { %978 = vmatpush1.bf16.msra.mxu0 %v2618_v7  ;;  %888 = vmatpush1.bf16.msra.mxu1 %v2675_v33  ;;  %3300 = vst [vmem:[#allocation36_spill] sm:$0xff] %v2694_v40  ;;  %v168_v42 = vld [vmem:[#allocation5 + $0x58] sm:$0xff]  ;;  %v2699_v43 = vld [vmem:[#allocation8 + $0x30] ss:$8 sps:$4 sm:$0xff]   ;;  %v2702_v44 = vld [vmem:[#allocation8 + $0x2d4] ss:$8 sps:$4 sm:$0xff]  }
  0x4b   :  { %979 = vmatprep.subr.bf16.mxu0 %v2621_v8  ;;  %889 = vmatprep.subr.bf16.mxu1 %v2680_v35  ;;  %3301 = vst [vmem:[#allocation37_spill] sm:$0xff] %v2702_v44  ;;  %v2704_v45 = vld [vmem:[#allocation8 + $0x44] ss:$8 sps:$4 sm:$0xff]   ;;  %v2707_v46 = vld [vmem:[#allocation8 + $0x2d0] ss:$8 sps:$4 sm:$0xff]   ;;  %v2709_v47 = vpack.c.bf16 %v168_v42, %v161_v41 }
  0x4c   :  { %3302 = vst [vmem:[#allocation38_spill] sm:$0xff] %v2707_v46  ;;  %v2713_v48 = vld [vmem:[#allocation8 + $0x40] ss:$8 sps:$4 sm:$0xff]   ;;  %v2716_v49 = vld [vmem:[#allocation8 + $0x2e4] ss:$8 sps:$4 sm:$0xff]   ;;  %v158_v56 = vld [vmem:[#allocation5 + $0x8] sm:$0xff] }
  0x4d   :  { %3303 = vst [vmem:[#allocation39_spill] sm:$0xff] %v2709_v47  ;;  %3304 = vst [vmem:[#allocation40_spill] sm:$0xff] %v2716_v49  ;;  %v2718_v50 = vld [vmem:[#allocation8 + $0x54] ss:$8 sps:$4 sm:$0xff]   ;;  %v2720_v51 = vld [vmem:[#allocation8 + $0x2e0] ss:$8 sps:$4 sm:$0xff]   ;;  %v182_v53 = vunpack.c.l.bf16 %v2709_v47  ;;  %v189_v54 = vunpack.c.h.bf16 %v2709_v47 }
  0x4e   :  { %980 = vmatpush1.bf16.msra.mxu0 %v2624_v9  ;;  %890 = vmatpush1.bf16.msra.mxu1 %v2687_v37  ;;  %3305 = vst [vmem:[#allocation41_spill] sm:$0xff] %v2720_v51  ;;  %v2723_v52 = vld [vmem:[#allocation8 + $0x2f4] ss:$8 sps:$4 sm:$0xff]   ;;  %v2729_v55 = vld [vmem:[#allocation8 + $0x50] ss:$8 sps:$4 sm:$0xff]  }
  0x4f   :  { %981 = vmatprep.subr.bf16.mxu0 %v2627_v10  ;;  %891 = vmatprep.subr.bf16.mxu1 %v2692_v39  ;;  %3306 = vst [vmem:[#allocation42_spill] sm:$0xff] %v2723_v52  ;;  %v165_v57 = vld [vmem:[#allocation5 + $0x40] sm:$0xff]  ;;  %v2732_v58 = vld [vmem:[#allocation8 + $0x64] ss:$8 sps:$4 sm:$0xff]   ;;  %v196_v61 = vsub.f32 %v161_v41, %v182_v53  ;;  %v203_v62 = vsub.f32 %v168_v42, %v189_v54  ;;  %v2743_v14 = vld [vmem:[#allocation8 + $0x60] ss:$8 sps:$4 sm:$0xff]  }
  0x50   :  { %v2734_v59 = vpack.c.bf16 %v165_v57, %v158_v56  ;;  %v2737_v60 = vld [vmem:[#allocation8 + $0x2f0] ss:$8 sps:$4 sm:$0xff]   ;;  %v2746_v18 = vld [vmem:[#allocation8 + $0x304] ss:$8 sps:$4 sm:$0xff]   ;;  %v2748_v19 = vld [vmem:[#allocation8 + $0x74] ss:$8 sps:$4 sm:$0xff]  }
  0x51   :  { %3307 = vst [vmem:[#allocation43_spill] sm:$0xff] %v2737_v60  ;;  %3308 = vst [vmem:[#allocation44_spill] sm:$0xff] %v2746_v18  ;;  %v2751_v24 = vld [vmem:[#allocation8 + $0x300] ss:$8 sps:$4 sm:$0xff]   ;;  %v210_v41 = vpack.c.bf16 %v203_v62, %v196_v61  ;;  %v2755_v53 = vld [vmem:[#allocation8 + $0x70] ss:$8 sps:$4 sm:$0xff]  }
  0x52   :  { %982 = vmatpush1.bf16.msra.mxu0 %v2630_v11  ;;  %892 = vmatpush1.bf16.msra.mxu1 %v2699_v43  ;;  %v179_v63 = vunpack.c.l.bf16 %v2734_v59  ;;  %v186_v13 = vunpack.c.h.bf16 %v2734_v59  ;;  %3309 = vst [vmem:[#allocation45_spill] sm:$0xff] %v2751_v24  ;;  %v2758_v54 = vld [vmem:[#allocation8 + $0x314] ss:$8 sps:$4 sm:$0xff]   ;;  %v2760_v47 = vld [vmem:[#allocation8 + $0x84] ss:$8 sps:$4 sm:$0xff]  }
  0x53   :  { %983 = vmatprep.subr.bf16.mxu0 %v2633_v12  ;;  %893 = vmatprep.subr.bf16.mxu1 %v2704_v45  ;;  %3310 = vst [vmem:[#allocation46_spill] sm:$0xff] %v2758_v54  ;;  %v2768_v61 = vld [vmem:[#allocation8 + $0x80] ss:$8 sps:$4 sm:$0xff]   ;;  %v2771_v62 = vld [vmem:[#allocation8 + $0x324] ss:$8 sps:$4 sm:$0xff]  }
  0x54   :  { %v193_v20 = vsub.f32 %v158_v56, %v179_v63  ;;  %v200_v21 = vsub.f32 %v165_v57, %v186_v13  ;;  %v2763_v56 = vld [vmem:[#allocation8 + $0x310] ss:$8 sps:$4 sm:$0xff]   ;;  %v3256_v57 = vmov 0   ;;  %3312 = vst [vmem:[#allocation48_spill] sm:$0xff] %v2771_v62  ;;  %v2773_v63 = vld [vmem:[#allocation8 + $0x94] ss:$8 sps:$4 sm:$0xff]  }
  0x55   :  { %3311 = vst [vmem:[#allocation47_spill] sm:$0xff] %v2763_v56  ;;  %v2775_v13 = vld [vmem:[#allocation8 + $0x320] ss:$8 sps:$4 sm:$0xff]  }
  0x56   :  { %984 = vmatpush1.bf16.msra.mxu0 %v2638_v16  ;;  %894 = vmatpush1.bf16.msra.mxu1 %v2713_v48  ;;  %v207_v42 = vpack.c.bf16 %v200_v21, %v193_v20  ;;  %3313 = vst [vmem:[#allocation49_spill] sm:$0xff] %v2775_v13  ;;  %v2778_v20 = vld [vmem:[#allocation8 + $0x334] ss:$8 sps:$4 sm:$0xff]   ;;  %v2782_v21 = vld [vmem:[#allocation8 + $0x90] ss:$8 sps:$4 sm:$0xff]  }
  0x57   :  { %985 = vmatprep.subr.bf16.mxu0 %v2641_v17  ;;  %895 = vmatprep.subr.bf16.mxu1 %v2718_v50  ;;  %3314 = vst [vmem:[#allocation50_spill] sm:$0xff] %v2778_v20 }
  0x58   :  { %917 = vmatprep.mubr.bf16.mxu1 %v207_v42  ;;  %v2790_v42 = vld [vmem:[#allocation8 + $0x330] ss:$8 sps:$4 sm:$0xff]  }
  0x59   :  { %3315 = vst [vmem:[#allocation51_spill] sm:$0xff] %v2790_v42 }
  0x5a   :  { %986 = vmatpush1.bf16.msra.mxu0 %v2646_v22  ;;  %896 = vmatpush1.bf16.msra.mxu1 %v2729_v55 }
  0x5b   :  { %987 = vmatprep.subr.bf16.mxu0 %v2649_v23  ;;  %897 = vmatprep.subr.bf16.mxu1 %v2732_v58 }
  0x5e   :  { %988 = vmatpush1.bf16.msra.mxu0 %v2652_v25  ;;  %898 = vmatpush1.bf16.msra.mxu1 %v2743_v14  ;;  %v2848_v25 = vld [vmem:[#allocation8 + $0xe0] ss:$8 sps:$4 sm:$0xff]  }
  0x5f   :  { %989 = vmatprep.subr.bf16.mxu0 %v2655_v26  ;;  %899 = vmatprep.subr.bf16.mxu1 %v2748_v19 }
  0x62   :  { %990 = vmatpush1.bf16.msra.mxu0 %v2657_v27  ;;  %900 = vmatpush1.bf16.msra.mxu1 %v2755_v53 }
  0x63   :  { %991 = vmatprep.subr.bf16.mxu0 %v2665_v30  ;;  %901 = vmatprep.subr.bf16.mxu1 %v2760_v47 }
  0x66   :  { %992 = vmatpush1.bf16.msra.mxu0 %v2671_v32  ;;  %902 = vmatpush1.bf16.msra.mxu1 %v2768_v61  ;;  %v2839_v32 = vld [vmem:[#allocation8 + $0xe4] ss:$8 sps:$4 sm:$0xff]  }
  0x67   :  { %993 = vmatprep.subr.bf16.mxu0 %v2678_v34  ;;  %903 = vmatprep.subr.bf16.mxu1 %v2773_v63  ;;  %v2834_v34 = vld [vmem:[#allocation8 + $0xd0] ss:$8 sps:$4 sm:$0xff]  }
  0x6a   :  { %994 = vmatpush1.bf16.msra.mxu0 %v2683_v36  ;;  %904 = vmatpush1.bf16.msra.mxu1 %v2782_v21 }
  0x6b   :  { %995 = vmatprep.subr.bf16.mxu0 %v2690_v38 }
  0x6e   :  { %996 = vmatpush1.bf16.msra.mxu0 %v2694_v40 }
  0x6f   :  { %997 = vmatprep.subr.bf16.mxu0 %v2702_v44  ;;  %v2823_v44 = vld [vmem:[#allocation8 + $0xd4] ss:$8 sps:$4 sm:$0xff]  }
  0x72   :  { %998 = vmatpush1.bf16.msra.mxu0 %v2707_v46  ;;  %v164_v46 = vld [vmem:[#allocation5 + $0x38] sm:$0xff] }
  0x73   :  { %999 = vmatprep.subr.bf16.mxu0 %v2716_v49  ;;  %v157_v49 = vld [vmem:[#allocation5] sm:$0xff] }
  0x74   :  { %v2828_v36 = vpack.c.bf16 %v164_v46, %v157_v49 }
  0x76   :  { %1000 = vmatpush1.bf16.msra.mxu0 %v2720_v51  ;;  %v178_v30 = vunpack.c.l.bf16 %v2828_v36 }
  0x77   :  { %1001 = vmatprep.subr.bf16.mxu0 %v2723_v52  ;;  %v2812_v52 = vld [vmem:[#allocation8 + $0x350] ss:$8 sps:$4 sm:$0xff]  }
  0x78   :  { %3319 = vst [vmem:[#allocation55_spill] sm:$0xff] %v2812_v52  ;;  %v192_v23 = vsub.f32 %v157_v49, %v178_v30  ;;  %v2892_v30 = vld [vmem:[#allocation8 + $0x144] ss:$8 sps:$4 sm:$0xff]   ;;  %v2917_v49 = vld [vmem:[#allocation8 + $0x160] ss:$8 sps:$4 sm:$0xff]  }
  0x7a   :  { %1002 = vmatpush1.bf16.msra.mxu0 %v2737_v60  ;;  %v2807_v60 = vld [vmem:[#allocation8 + $0x354] ss:$8 sps:$4 sm:$0xff]  }
  0x7b   :  { %1014 = vmatprep.subr.bf16.mxu0 %v2746_v18  ;;  %v2804_v18 = vld [vmem:[#allocation8 + $0xb0] ss:$8 sps:$4 sm:$0xff]   ;;  %3318 = vst [vmem:[#allocation54_spill] sm:$0xff] %v2807_v60 }
  0x7d   :  { %1004 = vmatmul.mubr.bf16.vlgmr.msra.gmra.mrb[0].mxu0 %v210_v41  ;;  %v2784_v41 = vld [vmem:[#allocation8 + $0xa4] ss:$8 sps:$4 sm:$0xff]  }
  0x7e   :  { %1015 = vmatpush1.bf16.msra.mxu0 %v2751_v24  ;;  %1046 = vmatprep.mubr.bf16.mxu0 %v3256_v57  ;;  %v2792_v57 = vld [vmem:[#allocation8 + $0xa0] ss:$8 sps:$4 sm:$0xff]  }
  0x7f   :  { %1016 = vmatprep.subr.bf16.mxu0 %v2758_v54  ;;  %905 = vmatprep.subr.bf16.mxu1 %v2784_v41  ;;  %v2795_v54 = vld [vmem:[#allocation8 + $0x344] ss:$8 sps:$4 sm:$0xff]   ;;  %v2800_v24 = vld [vmem:[#allocation8 + $0x340] ss:$8 sps:$4 sm:$0xff]  }
  0x80   :  { %3316 = vst [vmem:[#allocation52_spill] sm:$0xff] %v2795_v54  ;;  %906 = vmatpush1.bf16.msra.mxu1 %v2792_v57  ;;  %3317 = vst [vmem:[#allocation53_spill] sm:$0xff] %v2800_v24 }
  0x82   :  { %1017 = vmatpush1.bf16.msra.mxu0 %v2763_v56  ;;  %v2797_v56 = vld [vmem:[#allocation8 + $0xb4] ss:$8 sps:$4 sm:$0xff]  }
  0x83   :  { %1018 = vmatprep.subr.bf16.mxu0 %v2771_v62  ;;  %907 = vmatprep.subr.bf16.mxu1 %v2797_v56  ;;  %v163_v62 = vld [vmem:[#allocation5 + $0x30] sm:$0xff] }
  0x84   :  { %908 = vmatpush1.bf16.msra.mxu1 %v2804_v18 }
  0x86   :  { %1019 = vmatpush1.bf16.msra.mxu0 %v2775_v13  ;;  %v170_v13 = vld [vmem:[#allocation5 + $0x68] sm:$0xff] }
  0x87   :  { %1020 = vmatprep.subr.bf16.mxu0 %v2778_v20  ;;  %v2809_v20 = vld [vmem:[#allocation8 + $0xc4] ss:$8 sps:$4 sm:$0xff]   ;;  %v2814_v51 = vpack.c.bf16 %v170_v13, %v163_v62 }
  0x88   :  { %909 = vmatprep.subr.bf16.mxu1 %v2809_v20 }
  0x89   :  { %3320 = vst [vmem:[#allocation56_spill] sm:$0xff] %v2814_v51  ;;  %v184_v40 = vunpack.c.l.bf16 %v2814_v51  ;;  %v191_v38 = vunpack.c.h.bf16 %v2814_v51  ;;  %v185_v51 = vunpack.c.h.bf16 %v2828_v36 }
  0x8a   :  { %1021 = vmatpush1.bf16.msra.mxu0 %v2790_v42  ;;  %v2818_v42 = vld [vmem:[#allocation8 + $0xc0] ss:$8 sps:$4 sm:$0xff]  }
  0x8b   :  { %1022 = vmatprep.subr.bf16.mxu0 %v2795_v54  ;;  %v2821_v54 = vld [vmem:[#allocation8 + $0x364] ss:$8 sps:$4 sm:$0xff]   ;;  %910 = vmatpush1.bf16.msra.mxu1 %v2818_v42  ;;  %v198_v27 = vsub.f32 %v163_v62, %v184_v40  ;;  %v205_v26 = vsub.f32 %v170_v13, %v191_v38  ;;  %v199_v22 = vsub.f32 %v164_v46, %v185_v51  ;;  %v2856_v38 = vld [vmem:[#allocation8 + $0xf0] ss:$8 sps:$4 sm:$0xff]   ;;  %v2936_v13 = vld [vmem:[#allocation8 + $0x194] ss:$8 sps:$4 sm:$0xff]  }
  0x8c   :  { %3321 = vst [vmem:[#allocation57_spill] sm:$0xff] %v2821_v54  ;;  %911 = vmatprep.subr.bf16.mxu1 %v2823_v44  ;;  %v2859_v40 = vld [vmem:[#allocation8 + $0x104] ss:$8 sps:$4 sm:$0xff]  }
  0x8d   :  { %v212_v17 = vpack.c.bf16 %v205_v26, %v198_v27  ;;  %v206_v62 = vpack.c.bf16 %v199_v22, %v192_v23  ;;  %v2865_v26 = vld [vmem:[#allocation8 + $0x100] ss:$8 sps:$4 sm:$0xff]   ;;  %v2868_v27 = vld [vmem:[#allocation8 + $0x114] ss:$8 sps:$4 sm:$0xff]   ;;  %v2876_v22 = vld [vmem:[#allocation8 + $0x124] ss:$8 sps:$4 sm:$0xff]  }
  0x8e   :  { %1023 = vmatpush1.bf16.msra.mxu0 %v2800_v24  ;;  %v2832_v24 = vld [vmem:[#allocation8 + $0x360] ss:$8 sps:$4 sm:$0xff]  }
  0x8f   :  { %1024 = vmatprep.subr.bf16.mxu0 %v2807_v60  ;;  %v2837_v60 = vld [vmem:[#allocation8 + $0x374] ss:$8 sps:$4 sm:$0xff]   ;;  %912 = vmatpush1.bf16.msra.mxu1 %v2834_v34  ;;  %v2881_v23 = vld [vmem:[#allocation8 + $0x120] ss:$8 sps:$4 sm:$0xff]  }
  0x90   :  { %913 = vmatprep.subr.bf16.mxu1 %v2839_v32 }
  0x92   :  { %1025 = vmatpush1.bf16.msra.mxu0 %v2812_v52  ;;  %v2846_v52 = vld [vmem:[#allocation8 + $0x370] ss:$8 sps:$4 sm:$0xff]  }
  0x93   :  { %1026 = vmatprep.subr.bf16.mxu0 %v2821_v54  ;;  %v2851_v54 = vld [vmem:[#allocation8 + $0xf4] ss:$8 sps:$4 sm:$0xff]   ;;  %914 = vmatpush1.bf16.msra.mxu1 %v2848_v25 }
  0x94   :  { %915 = vmatprep.subr.bf16.mxu1 %v2851_v54 }
  0x96   :  { %1027 = vmatpush1.bf16.msra.mxu0 %v2832_v24 }
  0x97   :  { %1028 = vmatprep.subr.bf16.mxu0 %v2837_v60  ;;  %916 = vmatpush1.bf16.msra.mxu1 %v2856_v38 }
  0x98   :  { %928 = vmatprep.subr.bf16.mxu1 %v2859_v40 }
  0x9a   :  { %1029 = vmatpush1.bf16.msra.mxu0 %v2846_v52  ;;  %918 = vmatmul.mubr.bf16.vlgmr.msra.gmra.mrb[0].mxu1 %v206_v62  ;;  %v2328_v62 = vld [vmem:[#allocation8 + $0x1c0] ss:$8 sps:$4 sm:$0xff]  }
  0x9b   :  { %1057 = vmatprep.subr.bf16.mxu0 %v2659_v28  ;;  %929 = vmatpush1.bf16.msra.mxu1 %v2865_v26  ;;  %v2884_v28 = vld [vmem:[#allocation8 + $0x134] ss:$8 sps:$4 sm:$0xff]  }
  0x9c   :  { %930 = vmatprep.subr.bf16.mxu1 %v2868_v27 }
  0x9d   :  { %1047 = vmatmul.mubr.bf16.vlgmr.msra.gmra.mrb[0].mxu0 %v212_v17  ;;  %v2873_v17 = vld [vmem:[#allocation8 + $0x110] ss:$8 sps:$4 sm:$0xff]  }
  0x9e   :  { %1058 = vmatpush1.bf16.msra.mxu0 %v2662_v29  ;;  %1089 = vmatprep.mubr.bf16.mxu0 %v2734_v59  ;;  %v2889_v29 = vld [vmem:[#allocation8 + $0x130] ss:$8 sps:$4 sm:$0xff]  }
  0x9f   :  { %1059 = vmatprep.subr.bf16.mxu0 %v2667_v31  ;;  %931 = vmatpush1.bf16.msra.mxu1 %v2873_v17  ;;  %v2897_v31 = vld [vmem:[#allocation8 + $0x140] ss:$8 sps:$4 sm:$0xff]   ;;  %v2925_v59 = vld [vmem:[#allocation8 + $0x170] ss:$8 sps:$4 sm:$0xff]  }
  0xa0   :  { %932 = vmatprep.subr.bf16.mxu1 %v2876_v22 }
  0xa2   :  { %1060 = vmatpush1.bf16.msra.mxu0 %v2675_v33  ;;  %v2900_v33 = vld [vmem:[#allocation8 + $0x154] ss:$8 sps:$4 sm:$0xff]  }
  0xa3   :  { %1061 = vmatprep.subr.bf16.mxu0 %v2680_v35  ;;  %933 = vmatpush1.bf16.msra.mxu1 %v2881_v23  ;;  %v160_v35 = vld [vmem:[#allocation5 + $0x18] sm:$0xff] }
  0xa4   :  { %934 = vmatprep.subr.bf16.mxu1 %v2884_v28 }
  0xa6   :  { %1062 = vmatpush1.bf16.msra.mxu0 %v2687_v37  ;;  %v167_v37 = vld [vmem:[#allocation5 + $0x50] sm:$0xff] }
  0xa7   :  { %1063 = vmatprep.subr.bf16.mxu0 %v2692_v39  ;;  %935 = vmatpush1.bf16.msra.mxu1 %v2889_v29  ;;  %v2905_v39 = vld [vmem:[#allocation8 + $0x150] ss:$8 sps:$4 sm:$0xff]  }
  0xa8   :  { %936 = vmatprep.subr.bf16.mxu1 %v2892_v30 }
  0xaa   :  { %1064 = vmatpush1.bf16.msra.mxu0 %v2699_v43  ;;  %v2907_v43 = vpack.c.bf16 %v167_v37, %v160_v35 }
  0xab   :  { %1065 = vmatprep.subr.bf16.mxu0 %v2704_v45  ;;  %937 = vmatpush1.bf16.msra.mxu1 %v2897_v31  ;;  %v2910_v45 = vld [vmem:[#allocation8 + $0x164] ss:$8 sps:$4 sm:$0xff]  }
  0xac   :  { %938 = vmatprep.subr.bf16.mxu1 %v2900_v33  ;;  %v181_v46 = vunpack.c.l.bf16 %v2907_v43 }
  0xae   :  { %1066 = vmatpush1.bf16.msra.mxu0 %v2713_v48  ;;  %v188_v48 = vunpack.c.h.bf16 %v2907_v43 }
  0xaf   :  { %1067 = vmatprep.subr.bf16.mxu0 %v2718_v50  ;;  %939 = vmatpush1.bf16.msra.mxu1 %v2905_v39  ;;  %v195_v50 = vsub.f32 %v160_v35, %v181_v46  ;;  %v166_v35 = vld [vmem:[#allocation5 + $0x48] sm:$0xff] }
  0xb0   :  { %940 = vmatprep.subr.bf16.mxu1 %v2910_v45  ;;  %v202_v51 = vsub.f32 %v167_v37, %v188_v48 }
  0xb2   :  { %1068 = vmatpush1.bf16.msra.mxu0 %v2729_v55  ;;  %v2920_v55 = vld [vmem:[#allocation8 + $0x174] ss:$8 sps:$4 sm:$0xff]  }
  0xb3   :  { %1069 = vmatprep.subr.bf16.mxu0 %v2732_v58  ;;  %941 = vmatpush1.bf16.msra.mxu1 %v2917_v49  ;;  %v209_v58 = vpack.c.bf16 %v202_v51, %v195_v50 }
  0xb4   :  { %942 = vmatprep.subr.bf16.mxu1 %v2920_v55 }
  0xb5   :  { %960 = vmatprep.mubr.bf16.mxu1 %v209_v58 }
  0xb6   :  { %1070 = vmatpush1.bf16.msra.mxu0 %v2743_v14  ;;  %v2928_v14 = vld [vmem:[#allocation8 + $0x184] ss:$8 sps:$4 sm:$0xff]  }
  0xb7   :  { %1071 = vmatprep.subr.bf16.mxu0 %v2748_v19  ;;  %943 = vmatpush1.bf16.msra.mxu1 %v2925_v59  ;;  %v2933_v19 = vld [vmem:[#allocation8 + $0x180] ss:$8 sps:$4 sm:$0xff]  }
  0xb8   :  { %944 = vmatprep.subr.bf16.mxu1 %v2928_v14 }
  0xba   :  { %1072 = vmatpush1.bf16.msra.mxu0 %v2755_v53  ;;  %v2944_v53 = vld [vmem:[#allocation8 + $0x1a4] ss:$8 sps:$4 sm:$0xff]  }
  0xbb   :  { %1073 = vmatprep.subr.bf16.mxu0 %v2760_v47  ;;  %945 = vmatpush1.bf16.msra.mxu1 %v2933_v19  ;;  %v2941_v47 = vld [vmem:[#allocation8 + $0x190] ss:$8 sps:$4 sm:$0xff]  }
  0xbc   :  { %946 = vmatprep.subr.bf16.mxu1 %v2936_v13 }
  0xbe   :  { %1074 = vmatpush1.bf16.msra.mxu0 %v2768_v61  ;;  %v2949_v61 = vld [vmem:[#allocation8 + $0x1a0] ss:$8 sps:$4 sm:$0xff]  }
  0xbf   :  { %1075 = vmatprep.subr.bf16.mxu0 %v2773_v63  ;;  %947 = vmatpush1.bf16.msra.mxu1 %v2941_v47  ;;  %v2327_v63 = vld [vmem:[#allocation8 + $0x1b4] ss:$8 sps:$4 sm:$0xff]  }
  0xc0   :  { %948 = vmatprep.subr.bf16.mxu1 %v2944_v53 }
  0xc2   :  { %1076 = vmatpush1.bf16.msra.mxu0 %v2782_v21  ;;  %v2325_v21 = vld [vmem:[#allocation8 + $0x1b0] ss:$8 sps:$4 sm:$0xff]  }
  0xc3   :  { %1077 = vmatprep.subr.bf16.mxu0 %v2784_v41  ;;  %949 = vmatpush1.bf16.msra.mxu1 %v2949_v61  ;;  %v2330_v41 = vld [vmem:[#allocation8 + $0x1c4] ss:$8 sps:$4 sm:$0xff]  }
  0xc4   :  { %950 = vmatprep.subr.bf16.mxu1 %v2327_v63 }
  0xc6   :  { %1078 = vmatpush1.bf16.msra.mxu0 %v2792_v57  ;;  %v159_v57 = vld [vmem:[#allocation5 + $0x10] sm:$0xff] }
  0xc7   :  { %1079 = vmatprep.subr.bf16.mxu0 %v2797_v56  ;;  %951 = vmatpush1.bf16.msra.mxu1 %v2325_v21  ;;  %v2333_v56 = vld [vmem:[#allocation8 + $0x1d4] ss:$8 sps:$4 sm:$0xff]   ;;  %v173_v37 = vpack.c.bf16 %v166_v35, %v159_v57 }
  0xc8   :  { %952 = vmatprep.subr.bf16.mxu1 %v2330_v41 }
  0xc9   :  { %v180_v46 = vunpack.c.l.bf16 %v173_v37  ;;  %v187_v48 = vunpack.c.h.bf16 %v173_v37 }
  0xca   :  { %1080 = vmatpush1.bf16.msra.mxu0 %v2804_v18  ;;  %v2331_v18 = vld [vmem:[#allocation8 + $0x1d0] ss:$8 sps:$4 sm:$0xff]  }
  0xcb   :  { %1081 = vmatprep.subr.bf16.mxu0 %v2809_v20  ;;  %953 = vmatpush1.bf16.msra.mxu1 %v2328_v62  ;;  %v2336_v20 = vld [vmem:[#allocation8 + $0x1e4] ss:$8 sps:$4 sm:$0xff]   ;;  %v194_v50 = vsub.f32 %v159_v57, %v180_v46  ;;  %v201_v51 = vsub.f32 %v166_v35, %v187_v48 }
  0xcc   :  { %954 = vmatprep.subr.bf16.mxu1 %v2333_v56 }
  0xce   :  { %1082 = vmatpush1.bf16.msra.mxu0 %v2818_v42  ;;  %v2334_v42 = vld [vmem:[#allocation8 + $0x1e0] ss:$8 sps:$4 sm:$0xff]  }
  0xcf   :  { %1083 = vmatprep.subr.bf16.mxu0 %v2823_v44  ;;  %955 = vmatpush1.bf16.msra.mxu1 %v2331_v18  ;;  %v2339_v44 = vld [vmem:[#allocation8 + $0x1f4] ss:$8 sps:$4 sm:$0xff]  }
  0xd0   :  { %956 = vmatprep.subr.bf16.mxu1 %v2336_v20 }
  0xd2   :  { %1084 = vmatpush1.bf16.msra.mxu0 %v2834_v34  ;;  %v2337_v34 = vld [vmem:[#allocation8 + $0x1f0] ss:$8 sps:$4 sm:$0xff]  }
  0xd3   :  { %1085 = vmatprep.subr.bf16.mxu0 %v2839_v32  ;;  %957 = vmatpush1.bf16.msra.mxu1 %v2334_v42  ;;  %v208_v32 = vpack.c.bf16 %v201_v51, %v194_v50 }
  0xd4   :  { %958 = vmatprep.subr.bf16.mxu1 %v2339_v44 }
  0xd6   :  { %1086 = vmatpush1.bf16.msra.mxu0 %v2848_v25  ;;  %v3337_v25 = vld [vmem:[#allocation41_spill] sm:$0xff] }
  0xd7   :  { %1087 = vmatprep.subr.bf16.mxu0 %v2851_v54  ;;  %959 = vmatpush1.bf16.msra.mxu1 %v2337_v34  ;;  %v3339_v54 = vld [vmem:[#allocation43_spill] sm:$0xff] }
  0xda   :  { %1088 = vmatpush1.bf16.msra.mxu0 %v2856_v38  ;;  %961 = vmatmul.mubr.bf16.vlgmr.msra.gmra.mrb[0].mxu1 %v208_v32  ;;  %v3340_v38 = vld [vmem:[#allocation44_spill] sm:$0xff] }
  0xdb   :  { %1100 = vmatprep.subr.bf16.mxu0 %v2859_v40  ;;  %v3341_v40 = vld [vmem:[#allocation39_spill] sm:$0xff] }
  0xdd   :  { %1090 = vmatmul.mubr.bf16.vlgmr.msra.gmra.mrb[0].mxu0 %v2828_v36  ;;  %v3338_v36 = vld [vmem:[#allocation42_spill] sm:$0xff] }
  0xde   :  { %1101 = vmatpush1.bf16.msra.mxu0 %v2865_v26  ;;  %1132 = vmatprep.mubr.bf16.mxu0 %v2907_v43  ;;  %v3342_v26 = vld [vmem:[#allocation45_spill] sm:$0xff]  ;;  %v3353_v43 = vld [vmem:[#allocation55_spill] sm:$0xff] }
  0xdf   :  { %1102 = vmatprep.subr.bf16.mxu0 %v2868_v27  ;;  %v3343_v27 = vmov 0  }
  0xe2   :  { %1103 = vmatpush1.bf16.msra.mxu0 %v2873_v17  ;;  %v3344_v17 = vld [vmem:[#allocation46_spill] sm:$0xff] }
  0xe3   :  { %1104 = vmatprep.subr.bf16.mxu0 %v2876_v22  ;;  %v3345_v22 = vld [vmem:[#allocation47_spill] sm:$0xff] }
  0xe6   :  { %1105 = vmatpush1.bf16.msra.mxu0 %v2881_v23  ;;  %v3346_v23 = vld [vmem:[#allocation48_spill] sm:$0xff] }
  0xe7   :  { %1106 = vmatprep.subr.bf16.mxu0 %v2884_v28  ;;  %v3347_v28 = vld [vmem:[#allocation49_spill] sm:$0xff] }
  0xea   :  { %1107 = vmatpush1.bf16.msra.mxu0 %v2889_v29  ;;  %v3348_v29 = vld [vmem:[#allocation50_spill] sm:$0xff] }
  0xeb   :  { %1108 = vmatprep.subr.bf16.mxu0 %v2892_v30  ;;  %v3349_v30 = vld [vmem:[#allocation51_spill] sm:$0xff] }
  0xee   :  { %1109 = vmatpush1.bf16.msra.mxu0 %v2897_v31  ;;  %v3350_v31 = vld [vmem:[#allocation52_spill] sm:$0xff] }
  0xef   :  { %1110 = vmatprep.subr.bf16.mxu0 %v2900_v33  ;;  %v3351_v33 = vld [vmem:[#allocation53_spill] sm:$0xff] }
  0xf2   :  { %1111 = vmatpush1.bf16.msra.mxu0 %v2905_v39  ;;  %v3352_v39 = vld [vmem:[#allocation54_spill] sm:$0xff] }
  0xf3   :  { %1112 = vmatprep.subr.bf16.mxu0 %v2910_v45  ;;  %v3354_v45 = vld [vmem:[#allocation57_spill] sm:$0xff] }
  0xf6   :  { %1113 = vmatpush1.bf16.msra.mxu0 %v2917_v49  ;;  %v3355_v49 = vld [vmem:[#allocation56_spill] sm:$0xff] }
  0xf7   :  { %1114 = vmatprep.subr.bf16.mxu0 %v2920_v55 }
  0xfa   :  { %1115 = vmatpush1.bf16.msra.mxu0 %v2925_v59 }
  0xfb   :  { %1116 = vmatprep.subr.bf16.mxu0 %v2928_v14 }
  0xfe   :  { %1117 = vmatpush1.bf16.msra.mxu0 %v2933_v19 }
  0xff   :  { %1118 = vmatprep.subr.bf16.mxu0 %v2936_v13 }
 0x102   :  { %1119 = vmatpush1.bf16.msra.mxu0 %v2941_v47 }
 0x103   :  { %1120 = vmatprep.subr.bf16.mxu0 %v2944_v53 }
 0x106   :  { %1121 = vmatpush1.bf16.msra.mxu0 %v2949_v61 }
 0x107   :  { %1122 = vmatprep.subr.bf16.mxu0 %v2327_v63 }
 0x10a   :  { %1123 = vmatpush1.bf16.msra.mxu0 %v2325_v21 }
 0x10b   :  { %1124 = vmatprep.subr.bf16.mxu0 %v2330_v41 }
 0x10e   :  { %1125 = vmatpush1.bf16.msra.mxu0 %v2328_v62 }
 0x10f   :  { %1126 = vmatprep.subr.bf16.mxu0 %v2333_v56 }
 0x112   :  { %1127 = vmatpush1.bf16.msra.mxu0 %v2331_v18 }
 0x113   :  { %1128 = vmatprep.subr.bf16.mxu0 %v2336_v20 }
 0x116   :  { %1129 = vmatpush1.bf16.msra.mxu0 %v2334_v42 }
 0x117   :  { %1130 = vmatprep.subr.bf16.mxu0 %v2339_v44 }
 0x11a   :  { %1131 = vmatpush1.bf16.msra.mxu0 %v2337_v34 }
 0x11b   :  { %1143 = vmatprep.subr.bf16.mxu0 %v2598_v0  ;;  %v3322_v0 = vld [vmem:[#allocation25_spill] sm:$0xff] }
 0x11d   :  { %1133 = vmatmul.mubr.bf16.vlgmr.msra.gmra.mrb[0].mxu0 %v173_v37 }
 0x11e   :  { %1144 = vmatpush1.bf16.msra.mxu0 %v2600_v1  ;;  %1175 = vmatprep.mubr.bf16.mxu0 %v2635_v15  ;;  %v3323_v1 = vld [vmem:[#allocation26_spill] sm:$0xff] }
 0x11f   :  { %1145 = vmatprep.subr.bf16.mxu0 %v2603_v2  ;;  %v3324_v2 = vld [vmem:[#allocation27_spill] sm:$0xff]  ;;  %v3335_v15 = vld [vmem:[#allocation38_spill] sm:$0xff] }
 0x122   :  { %1146 = vmatpush1.bf16.msra.mxu0 %v2606_v3  ;;  %v3325_v3 = vld [vmem:[#allocation28_spill] sm:$0xff] }
 0x123   :  { %1147 = vmatprep.subr.bf16.mxu0 %v2609_v4  ;;  %v3326_v4 = vld [vmem:[#allocation29_spill] sm:$0xff] }
 0x126   :  { %1148 = vmatpush1.bf16.msra.mxu0 %v2612_v5  ;;  %v3327_v5 = vld [vmem:[#allocation30_spill] sm:$0xff] }
 0x127   :  { %1149 = vmatprep.subr.bf16.mxu0 %v2615_v6  ;;  %v3328_v6 = vld [vmem:[#allocation31_spill] sm:$0xff] }
 0x12a   :  { %1150 = vmatpush1.bf16.msra.mxu0 %v2618_v7  ;;  %v3329_v7 = vld [vmem:[#allocation32_spill] sm:$0xff] }
 0x12b   :  { %1151 = vmatprep.subr.bf16.mxu0 %v2621_v8  ;;  %v3330_v8 = vld [vmem:[#allocation33_spill] sm:$0xff] }
 0x12e   :  { %1152 = vmatpush1.bf16.msra.mxu0 %v2624_v9  ;;  %v3331_v9 = vld [vmem:[#allocation34_spill] sm:$0xff] }
 0x12f   :  { %1153 = vmatprep.subr.bf16.mxu0 %v2627_v10  ;;  %v3332_v10 = vld [vmem:[#allocation35_spill] sm:$0xff] }
 0x132   :  { %1154 = vmatpush1.bf16.msra.mxu0 %v2630_v11  ;;  %v3333_v11 = vld [vmem:[#allocation36_spill] sm:$0xff] }
 0x133   :  { %1155 = vmatprep.subr.bf16.mxu0 %v2633_v12  ;;  %v3334_v12 = vld [vmem:[#allocation37_spill] sm:$0xff] }
 0x136   :  { %1156 = vmatpush1.bf16.msra.mxu0 %v2638_v16  ;;  %v3336_v16 = vld [vmem:[#allocation40_spill] sm:$0xff] }
 0x137   :  { %1157 = vmatprep.subr.bf16.mxu0 %v3322_v0 }
 0x13a   :  { %1158 = vmatpush1.bf16.msra.mxu0 %v3323_v1 }
 0x13b   :  { %1159 = vmatprep.subr.bf16.mxu0 %v3324_v2 }
 0x13e   :  { %1160 = vmatpush1.bf16.msra.mxu0 %v3325_v3 }
 0x13f   :  { %1161 = vmatprep.subr.bf16.mxu0 %v3326_v4 }
 0x142   :  { %1162 = vmatpush1.bf16.msra.mxu0 %v3327_v5 }
 0x143   :  { %1163 = vmatprep.subr.bf16.mxu0 %v3328_v6 }
 0x146   :  { %1164 = vmatpush1.bf16.msra.mxu0 %v3329_v7 }
 0x147   :  { %1165 = vmatprep.subr.bf16.mxu0 %v3330_v8 }
 0x14a   :  { %1166 = vmatpush1.bf16.msra.mxu0 %v3331_v9 }
 0x14b   :  { %1167 = vmatprep.subr.bf16.mxu0 %v3332_v10 }
 0x14e   :  { %1168 = vmatpush1.bf16.msra.mxu0 %v3333_v11 }
 0x14f   :  { %1169 = vmatprep.subr.bf16.mxu0 %v3334_v12 }
 0x152   :  { %1170 = vmatpush1.bf16.msra.mxu0 %v3335_v15 }
 0x153   :  { %1171 = vmatprep.subr.bf16.mxu0 %v3336_v16 }
 0x156   :  { %1172 = vmatpush1.bf16.msra.mxu0 %v3337_v25 }
 0x157   :  { %1173 = vmatprep.subr.bf16.mxu0 %v3338_v36 }
 0x15a   :  { %1174 = vmatpush1.bf16.msra.mxu0 %v3339_v54 }
 0x15b   :  { %1186 = vmatprep.subr.bf16.mxu0 %v3340_v38 }
 0x15d   :  { %1176 = vmatmul.mubr.bf16.vlgmr.msra.gmra.mrb[0].mxu0 %v3341_v40 }
 0x15e   :  { %1187 = vmatpush1.bf16.msra.mxu0 %v3342_v26  ;;  %1218 = vmatprep.mubr.bf16.mxu0 %v3343_v27 }
 0x15f   :  { %1188 = vmatprep.subr.bf16.mxu0 %v3344_v17 }
 0x162   :  { %1189 = vmatpush1.bf16.msra.mxu0 %v3345_v22 }
 0x163   :  { %1190 = vmatprep.subr.bf16.mxu0 %v3346_v23 }
 0x166   :  { %1191 = vmatpush1.bf16.msra.mxu0 %v3347_v28 }
 0x167   :  { %1192 = vmatprep.subr.bf16.mxu0 %v3348_v29 }
 0x16a   :  { %1193 = vmatpush1.bf16.msra.mxu0 %v3349_v30 }
 0x16b   :  { %1194 = vmatprep.subr.bf16.mxu0 %v3350_v31 }
 0x16e   :  { %1195 = vmatpush1.bf16.msra.mxu0 %v3351_v33 }
 0x16f   :  { %1196 = vmatprep.subr.bf16.mxu0 %v3352_v39 }
 0x172   :  { %1197 = vmatpush1.bf16.msra.mxu0 %v3353_v43 }
 0x173   :  { %1198 = vmatprep.subr.bf16.mxu0 %v3354_v45 }
 0x176   :  { %1199 = vmatpush1.bf16.msra.mxu0 %v2832_v24 }
 0x177   :  { %1200 = vmatprep.subr.bf16.mxu0 %v2837_v60 }
 0x17a   :  { %1201 = vmatpush1.bf16.msra.mxu0 %v2846_v52 }
 0x17d   :  { %1219 = vmatmul.mubr.bf16.vlgmr.msra.gmra.mrb[0].mxu0 %v3355_v49 }
 0x1ad   :  { %v962_v55 = vpop.f32.mrb[0].mxu1 }
 0x1ae   :  { %v964_v58 = vpop.f32.mrb[1].mxu1 }
 0x1af   :  { %v966_v59 = vpop.f32.mrb[2].mxu1 }
 0x1b0   :  { %v968_v14 = vpop.f32.mrb[3].mxu1 }
 0x1b1   :  { %2413 = shalt.err (!%p2410_p4)  }
 0x1b2   :  { %s2414_s24 = scalar_lea.vmem %s154_s9, 2048  ;;  %p2419_p6 = scmp.lt.s32.totalorder %s154_s9, %s154_s9 }
 0x1b3   :  { %p2415_p5 = scmp.ne.s32.totalorder %s154_s9, %s2414_s24  ;;  %p2420_p7 = scmp.lt.s32.totalorder %s2414_s24, %s2414_s24 }
 0x1b5   :  { %p2421_p8 = por %p2420_p7, %p2419_p6 }
 0x1b7   :  { %p2422_p9 = pnand %p2421_p8, %p2415_p5 }
 0x1b9   :  { %2425 = shalt.err (!%p2422_p9)  }
 0x1ba   :  { %156 = dma.hbm_to_vmem [thread:$0]  %s3251_s13, 2048, %s154_s9, [#allocation4 + $0x2]  ;;  %v1231_v52 = vlaneseq  ;;  %v1229_v19 = vld [vmem:[%s3240_s2] sm:$0x3] }
 0x1bc   :  { %v3050_v60 = vshrl.u32 %v1231_v52, 7 }
 0x1be   :  { %v3053_v24 = vsub.s32 0, %v3050_v60  ;;  %v3059_v13 = vsub.s32 1, %v3050_v60 }
 0x1c0   :  { %v1234_v47 = vrot.slane %v1229_v19, %v3053_v24  ;;  %v1238_v61 = vrot.slane %v1229_v19, %v3059_v13 }
 0x250   :  { %v1220_v53 = vpop.f32.mrb[0].mxu0 }
 0x251   :  { %v2123_v63 = vadd.f32 %v1220_v53, %v962_v55  ;;  %v1222_v21 = vpop.f32.mrb[1].mxu0 }
 0x252   :  { %v2124_v41 = vadd.f32 %v1222_v21, %v964_v58  ;;  %v1224_v62 = vpop.f32.mrb[2].mxu0 }
 0x253   :  { %v1241_v57 = vadd.f32 %v2123_v63, %v1234_v47  ;;  %v2125_v35 = vadd.f32 %v1224_v62, %v966_v59  ;;  %v1226_v56 = vpop.f32.mrb[3].mxu0 }
 0x254   :  { %v1242_v37 = vadd.f32 %v2124_v41, %v1238_v61  ;;  %v2126_v18 = vadd.f32 %v1226_v56, %v968_v14 }
 0x255   :  { %v3063_v20 = vmax.f32 %v1241_v57, 0.0  ;;  %v1243_v46 = vadd.f32 %v2125_v35, %v1234_v47 }
 0x256   :  { %v3065_v48 = vmax.f32 %v1242_v37, 0.0  ;;  %v1244_v42 = vadd.f32 %v2126_v18, %v1238_v61  ;;  %v2478_v61 = vmov 1966171168  }
 0x257   :  { %v3067_v44 = vmax.f32 %v1243_v46, 0.0  ;;  %v1263_v51 = vmul.f32 %v3063_v20, %v3063_v20  ;;  %v1312_v63 = vunpack.c.l.s4 %v2478_v61 }
 0x258   :  { %v3069_v50 = vmax.f32 %v1244_v42, 0.0  ;;  %v1264_v0 = vmul.f32 %v3065_v48, %v3065_v48 }
 0x259   :  { %v1249_v34 = vadd.f32 %v3067_v44, %v3063_v20  ;;  %v1265_v32 = vmul.f32 %v3067_v44, %v3067_v44  ;;  %v1313_v21 = vunpack.c.0.s8 %v1312_v63 }
 0x25a   :  { %v1256_v1 = vadd.f32 %v3069_v50, %v3065_v48  ;;  %v1266_v2 = vmul.f32 %v3069_v50, %v3069_v50 }
 0x25b   :  { %v1250_v3 = vrot.slane %v1249_v34, 4  ;;  %v1267_v4 = vadd.f32 %v1265_v32, %v1263_v51  ;;  %v3084_v62 = vsub.s32 %v1313_v21, %v3050_v60  ;;  %v1327_v60 = vld [vmem:[%s3241_s3] sm:$0x3] }
 0x25c   :  { %v1257_v5 = vrot.slane %v1256_v1, 4  ;;  %v1274_v6 = vadd.f32 %v1266_v2, %v1264_v0 }
 0x25d   :  { %v1251_v7 = vadd.f32 %v1250_v3, %v1249_v34  ;;  %v1268_v8 = vrot.slane %v1267_v4, 4  ;;  %v1291_v3 = vld [vmem:[%s3242_s4] sm:$0x3] }
 0x25e   :  { %v1258_v9 = vadd.f32 %v1257_v5, %v1256_v1  ;;  %v1275_v10 = vrot.slane %v1274_v6, 4  ;;  %v1352_v5 = vrot.slane %v1327_v60, %v3053_v24 }
 0x25f   :  { %v1252_v11 = vrot.slane %v1251_v7, 2  ;;  %v1269_v12 = vadd.f32 %v1268_v8, %v1267_v4 }
 0x260   :  { %v1259_v15 = vrot.slane %v1258_v9, 2  ;;  %v1276_v16 = vadd.f32 %v1275_v10, %v1274_v6  ;;  %v1356_v6 = vrot.slane %v1327_v60, %v3059_v13  ;;  %v1359_v10 = vmul.f32 %v1352_v5, %v3063_v20 }
 0x261   :  { %v1253_v25 = vadd.f32 %v1252_v11, %v1251_v7  ;;  %v1270_v36 = vrot.slane %v1269_v12, 2 }
 0x262   :  { %v1260_v54 = vadd.f32 %v1259_v15, %v1258_v9  ;;  %v1277_v38 = vrot.slane %v1276_v16, 2  ;;  %v1360_v11 = vmul.f32 %v1356_v6, %v3065_v48  ;;  %v1362_v15 = vmul.f32 %v1356_v6, %v3069_v50 }
 0x263   :  { %v1254_v40 = vrot.slane %v1253_v25, 1  ;;  %v1271_v26 = vadd.f32 %v1270_v36, %v1269_v12  ;;  %v1361_v12 = vmul.f32 %v1352_v5, %v3067_v44 }
 0x264   :  { %v1261_v27 = vrot.slane %v1260_v54, 1  ;;  %v1278_v17 = vadd.f32 %v1277_v38, %v1276_v16 }
 0x265   :  { %v1255_v22 = vadd.f32 %v1254_v40, %v1253_v25  ;;  %v1272_v23 = vrot.slane %v1271_v26, 1 }
 0x266   :  { %v1262_v28 = vadd.f32 %v1261_v27, %v1260_v54  ;;  %v1279_v29 = vrot.slane %v1278_v17, 1 }
 0x267   :  { %v1273_v30 = vadd.f32 %v1272_v23, %v1271_v26  ;;  %v1281_v31 = vmul.f32 0.0625, %v1255_v22  ;;  %v2479_v26 = vmov -1.0  }
 0x268   :  { %v1280_v33 = vadd.f32 %v1279_v29, %v1278_v17  ;;  %v1282_v39 = vmul.f32 0.0625, %v1262_v28 }
 0x269   :  { %v1283_v43 = vmul.f32 0.0625, %v1273_v30  ;;  %v1285_v45 = vmul.f32 %v1281_v31, %v1281_v31 }
 0x26a   :  { %v1284_v49 = vmul.f32 0.0625, %v1280_v33  ;;  %v1286_v55 = vmul.f32 %v1282_v39, %v1282_v39  ;;  %v1330_v58 = vcombine.low %v1281_v31, %v1282_v39 }
 0x26b   :  { %v1287_v59 = vsub.f32 %v1283_v43, %v1285_v45 }
 0x26c   :  { %v1288_v14 = vsub.f32 %v1284_v49, %v1286_v55  ;;  %v1337_v34 = vrot.slane %v1330_v58, %v3084_v62 }
 0x26d   :  { %v1289_v52 = vmax.f32 %v1287_v59, 0.0 }
 0x26e   :  { %v1290_v19 = vmax.f32 %v1288_v14, 0.0  ;;  %v1344_v2 = vrot.slane %v1337_v34, %v3084_v62 }
 0x26f   :  { %v1292_v47 = vadd.f32 0.0001, %v1289_v52 }
 0x270   :  { %v1293_v53 = vadd.f32 0.0001, %v1290_v19  ;;  %v1346_v8 = vmul.f32 %v1344_v2, %v1327_v60 }
 0x271   :  { %2340 = vrsqrt.f32 %v1292_v47  ;;  %vm1296_vm0 = vcmp.eq.f32.partialorder %v1292_v47, inf  ;;  %v1299_v56 = vand.u32 2147483648, %v1292_v47  ;;  %vm1298_vm1 = vcmp.eq.f32.partialorder %v1292_v47, 0.0 }
 0x272   :  { %2342 = vrsqrt.f32 %v1293_v53  ;;  %vm1303_vm2 = vcmp.eq.f32.partialorder %v1293_v53, inf  ;;  %v1306_v46 = vand.u32 2147483648, %v1293_v53  ;;  %vm1305_vm3 = vcmp.eq.f32.partialorder %v1293_v53, 0.0 }
 0x27b   :  { %v2341_v41 = vpop.eup %2340 }
 0x27c   :  { %v2343_v57 = vpop.eup %2342  ;;  %v1295_v35 = vmul.f32 %v2341_v41, %v1292_v47 }
 0x27d   :  { %v1302_v37 = vmul.f32 %v2343_v57, %v1293_v53 }
 0x27e   :  { %v1297_v18 = vsel %vm1296_vm0, %v1292_v47, %v1295_v35 }
 0x27f   :  { %v1300_v42 = vsel %vm1298_vm1, %v1299_v56, %v1297_v18  ;;  %v1304_v51 = vsel %vm1303_vm2, %v1293_v53, %v1302_v37 }
 0x280   :  { %v1307_v32 = vsel %vm1305_vm3, %v1306_v46, %v1304_v51 }
 0x281   :  { %v1310_v0 = vcombine.low %v1300_v42, %v1307_v32 }
 0x283   :  { %v1317_v1 = vrot.slane %v1310_v0, %v3084_v62 }
 0x285   :  { %v1324_v4 = vrot.slane %v1317_v1, %v3084_v62 }
 0x287   :  { %v1326_v7 = vmul.f32 %v1324_v4, %v1291_v3 }
 0x289   :  { %v1347_v9 = vsub.f32 %v1326_v7, %v1346_v8 }
 0x28b   :  { %v1367_v16 = vrot.slane %v1347_v9, %v3053_v24  ;;  %v1371_v25 = vrot.slane %v1347_v9, %v3059_v13 }
 0x28d   :  { %v1374_v36 = vadd.f32 %v1367_v16, %v1359_v10  ;;  %v1375_v54 = vadd.f32 %v1371_v25, %v1360_v11  ;;  %v1376_v38 = vadd.f32 %v1367_v16, %v1361_v12  ;;  %v1377_v40 = vadd.f32 %v1371_v25, %v1362_v15 }
 0x28f   :  { %vm1378_vm4 = vcmp.ge.f32.partialorder %v1374_v36, 0.0  ;;  %vm1379_vm5 = vcmp.ge.f32.partialorder %v1375_v54, 0.0  ;;  %vm1380_vm6 = vcmp.ge.f32.partialorder %v1376_v38, 0.0  ;;  %vm1381_vm7 = vcmp.ge.f32.partialorder %v1377_v40, 0.0 }
 0x290   :  { %v3105_v20 = vsel %vm1378_vm4, 1.0, %v2479_v26  ;;  %v1383_v48 = vsel %vm1379_vm5, 1.0, %v2479_v26  ;;  %v3109_v44 = vsel %vm1380_vm6, 1.0, %v2479_v26  ;;  %v1385_v50 = vsel %vm1381_vm7, 1.0, %v2479_v26 }
 0x291   :  { %v1386_v27 = vpack.c.bf16 %v3109_v44, %v3105_v20  ;;  %v1387_v17 = vpack.c.bf16 %v1385_v50, %v1383_v48 }
 0x292   :  { %2452 = dma.done.wait [#allocation4], 4096 }
 0x293   :  { %2453 = vsyncadd [#allocation4], 4294963200  ;;  %1468 = vmatprep.mubr.bf16.mxu1 %v1387_v17  ;;  %v1393_v22 = vld [vmem:[#allocation2 + $0x8] sm:$0xff]  ;;  %v1392_v23 = vld [vmem:[#allocation2] sm:$0xff] }
 0x294   :  { %v1395_v28 = vld [vmem:[#allocation2 + $0x18] sm:$0xff]  ;;  %1436 = vmatprep.subr.bf16.mxu1 %v1393_v22  ;;  %v1394_v29 = vld [vmem:[#allocation2 + $0x10] sm:$0xff]  ;;  %v1397_v30 = vld [vmem:[#allocation2 + $0x28] sm:$0xff] }
 0x295   :  { %1437 = vmatpush1.bf16.msra.mxu1 %v1392_v23  ;;  %v1396_v31 = vld [vmem:[#allocation2 + $0x20] sm:$0xff]  ;;  %v1399_v33 = vld [vmem:[#allocation2 + $0x38] sm:$0xff]  ;;  %v1398_v39 = vld [vmem:[#allocation2 + $0x30] sm:$0xff] }
 0x296   :  { %1438 = vmatprep.subr.bf16.mxu1 %v1395_v28  ;;  %v1401_v43 = vld [vmem:[#allocation2 + $0x48] sm:$0xff]  ;;  %v1400_v45 = vld [vmem:[#allocation2 + $0x40] sm:$0xff]  ;;  %v1403_v49 = vld [vmem:[#allocation2 + $0x58] sm:$0xff] }
 0x297   :  { %v1402_v55 = vld [vmem:[#allocation2 + $0x50] sm:$0xff]  ;;  %v1405_v58 = vld [vmem:[#allocation2 + $0x68] sm:$0xff]  ;;  %v1404_v59 = vld [vmem:[#allocation2 + $0x60] sm:$0xff] }
 0x298   :  { %v1407_v14 = vld [vmem:[#allocation2 + $0x78] sm:$0xff]  ;;  %v1406_v52 = vld [vmem:[#allocation2 + $0x70] sm:$0xff]  ;;  %v1409_v19 = vld [vmem:[#allocation2 + $0x88] sm:$0xff] }
 0x299   :  { %1439 = vmatpush1.bf16.msra.mxu1 %v1394_v29  ;;  %v1408_v47 = vld [vmem:[#allocation2 + $0x80] sm:$0xff]  ;;  %v1411_v53 = vld [vmem:[#allocation2 + $0x98] sm:$0xff]  ;;  %v1410_v61 = vld [vmem:[#allocation2 + $0x90] sm:$0xff] }
 0x29a   :  { %1440 = vmatprep.subr.bf16.mxu1 %v1397_v30  ;;  %v1413_v63 = vld [vmem:[#allocation2 + $0xa8] sm:$0xff]  ;;  %v1412_v21 = vld [vmem:[#allocation2 + $0xa0] sm:$0xff]  ;;  %v1415_v41 = vld [vmem:[#allocation2 + $0xb8] sm:$0xff] }
 0x29b   :  { %v1414_v57 = vld [vmem:[#allocation2 + $0xb0] sm:$0xff]  ;;  %v1417_v35 = vld [vmem:[#allocation2 + $0xc8] sm:$0xff]  ;;  %v1416_v56 = vld [vmem:[#allocation2 + $0xc0] sm:$0xff] }
 0x29c   :  { %v1419_v37 = vld [vmem:[#allocation2 + $0xd8] sm:$0xff]  ;;  %v1418_v18 = vld [vmem:[#allocation2 + $0xd0] sm:$0xff]  ;;  %v1421_v46 = vld [vmem:[#allocation2 + $0xe8] sm:$0xff] }
 0x29d   :  { %1441 = vmatpush1.bf16.msra.mxu1 %v1396_v31  ;;  %v1420_v42 = vld [vmem:[#allocation2 + $0xe0] sm:$0xff]  ;;  %v1423_v51 = vld [vmem:[#allocation2 + $0xf8] sm:$0xff]  ;;  %v1422_v34 = vld [vmem:[#allocation2 + $0xf0] sm:$0xff] }
 0x29e   :  { %1442 = vmatprep.subr.bf16.mxu1 %v1399_v33  ;;  %v1424_v32 = vld [vmem:[%s3244_s6] sm:$0x3] }
 0x29f   :  { %v1429_v0 = vrot.slane %v1424_v32, %v3053_v24  ;;  %v1433_v60 = vrot.slane %v1424_v32, %v3059_v13 }
 0x2a1   :  { %1443 = vmatpush1.bf16.msra.mxu1 %v1398_v39 }
 0x2a2   :  { %1444 = vmatprep.subr.bf16.mxu1 %v1401_v43 }
 0x2a5   :  { %1445 = vmatpush1.bf16.msra.mxu1 %v1400_v45 }
 0x2a6   :  { %1446 = vmatprep.subr.bf16.mxu1 %v1403_v49 }
 0x2a9   :  { %1447 = vmatpush1.bf16.msra.mxu1 %v1402_v55 }
 0x2aa   :  { %1448 = vmatprep.subr.bf16.mxu1 %v1405_v58 }
 0x2ad   :  { %1449 = vmatpush1.bf16.msra.mxu1 %v1404_v59 }
 0x2ae   :  { %1450 = vmatprep.subr.bf16.mxu1 %v1407_v14 }
 0x2b1   :  { %1451 = vmatpush1.bf16.msra.mxu1 %v1406_v52 }
 0x2b2   :  { %1452 = vmatprep.subr.bf16.mxu1 %v1409_v19 }
 0x2b5   :  { %1453 = vmatpush1.bf16.msra.mxu1 %v1408_v47 }
 0x2b6   :  { %1454 = vmatprep.subr.bf16.mxu1 %v1411_v53 }
 0x2b9   :  { %1455 = vmatpush1.bf16.msra.mxu1 %v1410_v61 }
 0x2ba   :  { %1456 = vmatprep.subr.bf16.mxu1 %v1413_v63 }
 0x2bd   :  { %1457 = vmatpush1.bf16.msra.mxu1 %v1412_v21 }
 0x2be   :  { %1458 = vmatprep.subr.bf16.mxu1 %v1415_v41 }
 0x2c1   :  { %1459 = vmatpush1.bf16.msra.mxu1 %v1414_v57 }
 0x2c2   :  { %1460 = vmatprep.subr.bf16.mxu1 %v1417_v35 }
 0x2c5   :  { %1461 = vmatpush1.bf16.msra.mxu1 %v1416_v56 }
 0x2c6   :  { %1462 = vmatprep.subr.bf16.mxu1 %v1419_v37 }
 0x2c9   :  { %1463 = vmatpush1.bf16.msra.mxu1 %v1418_v18 }
 0x2ca   :  { %1464 = vmatprep.subr.bf16.mxu1 %v1421_v46 }
 0x2cd   :  { %1465 = vmatpush1.bf16.msra.mxu1 %v1420_v42 }
 0x2ce   :  { %1466 = vmatprep.subr.bf16.mxu1 %v1423_v51 }
 0x2d1   :  { %1467 = vmatpush1.bf16.msra.mxu1 %v1422_v34 }
 0x2d4   :  { %1469 = vmatmul.mubr.bf16.vlgmr.msra.gmra.mrb[4].mxu1 %v1386_v27 }
 0x3a7   :  { %v1470_v1 = vpop.f32.mrb[4].mxu1 }
 0x3a8   :  { %v1471_v2 = vadd.f32 %v1470_v1, %v1429_v0  ;;  %v1472_v3 = vpop.f32.mrb[5].mxu1 }
 0x3a9   :  { %v1473_v4 = vadd.f32 %v1472_v3, %v1433_v60  ;;  %v1474_v5 = vpop.f32.mrb[6].mxu1 }
 0x3aa   :  { %v3122_v6 = vmax.f32 %v1471_v2, 0.0  ;;  %v1475_v7 = vadd.f32 %v1474_v5, %v1429_v0  ;;  %v1476_v8 = vpop.f32.mrb[7].mxu1 }
 0x3ab   :  { %v3124_v9 = vmax.f32 %v1473_v4, 0.0  ;;  %v1477_v10 = vadd.f32 %v1476_v8, %v1433_v60 }
 0x3ac   :  { %v3126_v11 = vmax.f32 %v1475_v7, 0.0  ;;  %v1497_v15 = vmul.f32 %v3122_v6, %v3122_v6 }
 0x3ad   :  { %v3128_v12 = vmax.f32 %v1477_v10, 0.0  ;;  %v1498_v36 = vmul.f32 %v3124_v9, %v3124_v9 }
 0x3ae   :  { %v1483_v16 = vadd.f32 %v3126_v11, %v3122_v6  ;;  %v1499_v25 = vmul.f32 %v3126_v11, %v3126_v11 }
 0x3af   :  { %v1490_v54 = vadd.f32 %v3128_v12, %v3124_v9  ;;  %v1500_v38 = vmul.f32 %v3128_v12, %v3128_v12 }
 0x3b0   :  { %v1484_v40 = vrot.slane %v1483_v16, 4  ;;  %v1501_v20 = vadd.f32 %v1499_v25, %v1497_v15 }
 0x3b1   :  { %v1491_v48 = vrot.slane %v1490_v54, 4  ;;  %v1508_v44 = vadd.f32 %v1500_v38, %v1498_v36 }
 0x3b2   :  { %v1485_v50 = vadd.f32 %v1484_v40, %v1483_v16  ;;  %v1502_v27 = vrot.slane %v1501_v20, 4  ;;  %v1561_v16 = vld [vmem:[%s3245_s7] sm:$0x3] }
 0x3b3   :  { %v1492_v17 = vadd.f32 %v1491_v48, %v1490_v54  ;;  %v1509_v22 = vrot.slane %v1508_v44, 4  ;;  %v1525_v54 = vld [vmem:[%s3246_s8] sm:$0x3]  ;;  %v1586_v40 = vrot.slane %v1561_v16, %v3053_v24 }
 0x3b4   :  { %v1486_v23 = vrot.slane %v1485_v50, 2  ;;  %v1503_v28 = vadd.f32 %v1502_v27, %v1501_v20  ;;  %v1590_v20 = vrot.slane %v1561_v16, %v3059_v13 }
 0x3b5   :  { %v1493_v29 = vrot.slane %v1492_v17, 2  ;;  %v1510_v30 = vadd.f32 %v1509_v22, %v1508_v44  ;;  %v1593_v27 = vmul.f32 %v1586_v40, %v3122_v6  ;;  %v1595_v22 = vmul.f32 %v1586_v40, %v3126_v11 }
 0x3b6   :  { %v1487_v31 = vadd.f32 %v1486_v23, %v1485_v50  ;;  %v1504_v33 = vrot.slane %v1503_v28, 2  ;;  %v1596_v23 = vmul.f32 %v1590_v20, %v3128_v12 }
 0x3b7   :  { %v1494_v39 = vadd.f32 %v1493_v29, %v1492_v17  ;;  %v1511_v43 = vrot.slane %v1510_v30, 2  ;;  %v1594_v17 = vmul.f32 %v1590_v20, %v3124_v9 }
 0x3b8   :  { %v1488_v45 = vrot.slane %v1487_v31, 1  ;;  %v1505_v49 = vadd.f32 %v1504_v33, %v1503_v28 }
 0x3b9   :  { %v1495_v55 = vrot.slane %v1494_v39, 1  ;;  %v1512_v58 = vadd.f32 %v1511_v43, %v1510_v30 }
 0x3ba   :  { %v1489_v59 = vadd.f32 %v1488_v45, %v1487_v31  ;;  %v1506_v14 = vrot.slane %v1505_v49, 1 }
 0x3bb   :  { %v1496_v52 = vadd.f32 %v1495_v55, %v1494_v39  ;;  %v1513_v19 = vrot.slane %v1512_v58, 1 }
 0x3bc   :  { %v1507_v47 = vadd.f32 %v1506_v14, %v1505_v49  ;;  %v1515_v53 = vmul.f32 0.0625, %v1489_v59 }
 0x3bd   :  { %v1514_v61 = vadd.f32 %v1513_v19, %v1512_v58  ;;  %v1516_v63 = vmul.f32 0.0625, %v1496_v52 }
 0x3be   :  { %v1517_v21 = vmul.f32 0.0625, %v1507_v47  ;;  %v1519_v41 = vmul.f32 %v1515_v53, %v1515_v53 }
 0x3bf   :  { %v1518_v57 = vmul.f32 0.0625, %v1514_v61  ;;  %v1520_v35 = vmul.f32 %v1516_v63, %v1516_v63  ;;  %v1564_v56 = vcombine.low %v1515_v53, %v1516_v63 }
 0x3c0   :  { %v1521_v37 = vsub.f32 %v1517_v21, %v1519_v41 }
 0x3c1   :  { %v1522_v18 = vsub.f32 %v1518_v57, %v1520_v35  ;;  %v1571_v8 = vrot.slane %v1564_v56, %v3084_v62 }
 0x3c2   :  { %v1523_v46 = vmax.f32 %v1521_v37, 0.0 }
 0x3c3   :  { %v1524_v42 = vmax.f32 %v1522_v18, 0.0  ;;  %v1578_v36 = vrot.slane %v1571_v8, %v3084_v62 }
 0x3c4   :  { %v1526_v51 = vadd.f32 0.0001, %v1523_v46 }
 0x3c5   :  { %v1527_v34 = vadd.f32 0.0001, %v1524_v42  ;;  %v1580_v44 = vmul.f32 %v1578_v36, %v1561_v16 }
 0x3c6   :  { %2344 = vrsqrt.f32 %v1526_v51  ;;  %vm1530_vm8 = vcmp.eq.f32.partialorder %v1526_v51, inf  ;;  %v1533_v1 = vand.u32 2147483648, %v1526_v51  ;;  %vm1532_vm9 = vcmp.eq.f32.partialorder %v1526_v51, 0.0 }
 0x3c7   :  { %2346 = vrsqrt.f32 %v1527_v34  ;;  %vm1537_vm10 = vcmp.eq.f32.partialorder %v1527_v34, inf  ;;  %v1540_v4 = vand.u32 2147483648, %v1527_v34  ;;  %vm1539_vm11 = vcmp.eq.f32.partialorder %v1527_v34, 0.0 }
 0x3d0   :  { %v2345_v32 = vpop.eup %2344 }
 0x3d1   :  { %v2347_v0 = vpop.eup %2346  ;;  %v1529_v60 = vmul.f32 %v2345_v32, %v1526_v51 }
 0x3d2   :  { %v1536_v2 = vmul.f32 %v2347_v0, %v1527_v34 }
 0x3d3   :  { %v1531_v3 = vsel %vm1530_vm8, %v1526_v51, %v1529_v60 }
 0x3d4   :  { %v1534_v5 = vsel %vm1532_vm9, %v1533_v1, %v1531_v3  ;;  %v1538_v7 = vsel %vm1537_vm10, %v1527_v34, %v1536_v2 }
 0x3d5   :  { %v1541_v10 = vsel %vm1539_vm11, %v1540_v4, %v1538_v7 }
 0x3d6   :  { %v1544_v15 = vcombine.low %v1534_v5, %v1541_v10 }
 0x3d8   :  { %v1551_v25 = vrot.slane %v1544_v15, %v3084_v62 }
 0x3da   :  { %v1558_v38 = vrot.slane %v1551_v25, %v3084_v62 }
 0x3dc   :  { %v1560_v48 = vmul.f32 %v1558_v38, %v1525_v54 }
 0x3de   :  { %v1581_v50 = vsub.f32 %v1560_v48, %v1580_v44 }
 0x3e0   :  { %v1601_v28 = vrot.slane %v1581_v50, %v3053_v24  ;;  %v1605_v29 = vrot.slane %v1581_v50, %v3059_v13 }
 0x3e2   :  { %v1608_v30 = vadd.f32 %v1601_v28, %v1593_v27  ;;  %v1609_v31 = vadd.f32 %v1605_v29, %v1594_v17  ;;  %v1610_v33 = vadd.f32 %v1601_v28, %v1595_v22  ;;  %v1611_v39 = vadd.f32 %v1605_v29, %v1596_v23 }
 0x3e4   :  { %vm1612_vm12 = vcmp.ge.f32.partialorder %v1608_v30, 0.0  ;;  %vm1613_vm13 = vcmp.ge.f32.partialorder %v1609_v31, 0.0  ;;  %vm1614_vm14 = vcmp.ge.f32.partialorder %v1610_v33, 0.0  ;;  %vm1615_vm15 = vcmp.ge.f32.partialorder %v1611_v39, 0.0 }
 0x3e5   :  { %v3161_v6 = vsel %vm1612_vm12, 1.0, %v2479_v26  ;;  %v1617_v9 = vsel %vm1613_vm13, 1.0, %v2479_v26  ;;  %v3165_v11 = vsel %vm1614_vm14, 1.0, %v2479_v26  ;;  %v1619_v12 = vsel %vm1615_vm15, 1.0, %v2479_v26 }
 0x3e6   :  { %v1620_v43 = vpack.c.bf16 %v3165_v11, %v3161_v6  ;;  %v1621_v45 = vpack.c.bf16 %v1619_v12, %v1617_v9 }
 0x3e7   :  { %2454 = dma.done.wait [#allocation4 + $0x1], 4096 }
 0x3e8   :  { %2455 = vsyncadd [#allocation4 + $0x1], 4294963200  ;;  %1700 = vmatprep.mubr.bf16.mxu1 %v1621_v45  ;;  %v1625_v49 = vld [vmem:[#allocation2 + $0x108] sm:$0xff]  ;;  %v1624_v55 = vld [vmem:[#allocation2 + $0x100] sm:$0xff] }
 0x3e9   :  { %v1627_v58 = vld [vmem:[#allocation2 + $0x118] sm:$0xff]  ;;  %1668 = vmatprep.subr.bf16.mxu1 %v1625_v49  ;;  %v1626_v59 = vld [vmem:[#allocation2 + $0x110] sm:$0xff]  ;;  %v1629_v14 = vld [vmem:[#allocation2 + $0x128] sm:$0xff] }
 0x3ea   :  { %1669 = vmatpush1.bf16.msra.mxu1 %v1624_v55  ;;  %v1628_v52 = vld [vmem:[#allocation2 + $0x120] sm:$0xff]  ;;  %v1631_v19 = vld [vmem:[#allocation2 + $0x138] sm:$0xff]  ;;  %v1630_v47 = vld [vmem:[#allocation2 + $0x130] sm:$0xff] }
 0x3eb   :  { %1670 = vmatprep.subr.bf16.mxu1 %v1627_v58  ;;  %v1633_v53 = vld [vmem:[#allocation2 + $0x148] sm:$0xff]  ;;  %v1632_v61 = vld [vmem:[#allocation2 + $0x140] sm:$0xff]  ;;  %v1635_v63 = vld [vmem:[#allocation2 + $0x158] sm:$0xff] }
 0x3ec   :  { %v1634_v21 = vld [vmem:[#allocation2 + $0x150] sm:$0xff]  ;;  %v1637_v41 = vld [vmem:[#allocation2 + $0x168] sm:$0xff]  ;;  %v1636_v57 = vld [vmem:[#allocation2 + $0x160] sm:$0xff] }
 0x3ed   :  { %v1639_v35 = vld [vmem:[#allocation2 + $0x178] sm:$0xff]  ;;  %v1638_v56 = vld [vmem:[#allocation2 + $0x170] sm:$0xff]  ;;  %v1641_v37 = vld [vmem:[#allocation2 + $0x188] sm:$0xff] }
 0x3ee   :  { %1671 = vmatpush1.bf16.msra.mxu1 %v1626_v59  ;;  %v1640_v18 = vld [vmem:[#allocation2 + $0x180] sm:$0xff]  ;;  %v1643_v46 = vld [vmem:[#allocation2 + $0x198] sm:$0xff]  ;;  %v1642_v42 = vld [vmem:[#allocation2 + $0x190] sm:$0xff] }
 0x3ef   :  { %1672 = vmatprep.subr.bf16.mxu1 %v1629_v14  ;;  %v1645_v51 = vld [vmem:[#allocation2 + $0x1a8] sm:$0xff]  ;;  %v1644_v34 = vld [vmem:[#allocation2 + $0x1a0] sm:$0xff]  ;;  %v1647_v32 = vld [vmem:[#allocation2 + $0x1b8] sm:$0xff] }
 0x3f0   :  { %v1646_v0 = vld [vmem:[#allocation2 + $0x1b0] sm:$0xff]  ;;  %v1649_v60 = vld [vmem:[#allocation2 + $0x1c8] sm:$0xff]  ;;  %v1648_v1 = vld [vmem:[#allocation2 + $0x1c0] sm:$0xff] }
 0x3f1   :  { %v1651_v2 = vld [vmem:[#allocation2 + $0x1d8] sm:$0xff]  ;;  %v1650_v3 = vld [vmem:[#allocation2 + $0x1d0] sm:$0xff]  ;;  %v1653_v4 = vld [vmem:[#allocation2 + $0x1e8] sm:$0xff] }
 0x3f2   :  { %1673 = vmatpush1.bf16.msra.mxu1 %v1628_v52  ;;  %v1652_v5 = vld [vmem:[#allocation2 + $0x1e0] sm:$0xff]  ;;  %v1655_v7 = vld [vmem:[#allocation2 + $0x1f8] sm:$0xff]  ;;  %v1654_v8 = vld [vmem:[#allocation2 + $0x1f0] sm:$0xff] }
 0x3f3   :  { %1674 = vmatprep.subr.bf16.mxu1 %v1631_v19  ;;  %v1656_v10 = vld [vmem:[%s3248_s10] sm:$0x3] }
 0x3f4   :  { %v1661_v15 = vrot.slane %v1656_v10, %v3053_v24  ;;  %v1665_v16 = vrot.slane %v1656_v10, %v3059_v13 }
 0x3f6   :  { %1675 = vmatpush1.bf16.msra.mxu1 %v1630_v47 }
 0x3f7   :  { %1676 = vmatprep.subr.bf16.mxu1 %v1633_v53 }
 0x3fa   :  { %1677 = vmatpush1.bf16.msra.mxu1 %v1632_v61 }
 0x3fb   :  { %1678 = vmatprep.subr.bf16.mxu1 %v1635_v63 }
 0x3fe   :  { %1679 = vmatpush1.bf16.msra.mxu1 %v1634_v21 }
 0x3ff   :  { %1680 = vmatprep.subr.bf16.mxu1 %v1637_v41 }
 0x402   :  { %1681 = vmatpush1.bf16.msra.mxu1 %v1636_v57 }
 0x403   :  { %1682 = vmatprep.subr.bf16.mxu1 %v1639_v35 }
 0x406   :  { %1683 = vmatpush1.bf16.msra.mxu1 %v1638_v56 }
 0x407   :  { %1684 = vmatprep.subr.bf16.mxu1 %v1641_v37 }
 0x40a   :  { %1685 = vmatpush1.bf16.msra.mxu1 %v1640_v18 }
 0x40b   :  { %1686 = vmatprep.subr.bf16.mxu1 %v1643_v46 }
 0x40e   :  { %1687 = vmatpush1.bf16.msra.mxu1 %v1642_v42 }
 0x40f   :  { %1688 = vmatprep.subr.bf16.mxu1 %v1645_v51 }
 0x412   :  { %1689 = vmatpush1.bf16.msra.mxu1 %v1644_v34 }
 0x413   :  { %1690 = vmatprep.subr.bf16.mxu1 %v1647_v32 }
 0x416   :  { %1691 = vmatpush1.bf16.msra.mxu1 %v1646_v0 }
 0x417   :  { %1692 = vmatprep.subr.bf16.mxu1 %v1649_v60 }
 0x41a   :  { %1693 = vmatpush1.bf16.msra.mxu1 %v1648_v1 }
 0x41b   :  { %1694 = vmatprep.subr.bf16.mxu1 %v1651_v2 }
 0x41e   :  { %1695 = vmatpush1.bf16.msra.mxu1 %v1650_v3 }
 0x41f   :  { %1696 = vmatprep.subr.bf16.mxu1 %v1653_v4 }
 0x422   :  { %1697 = vmatpush1.bf16.msra.mxu1 %v1652_v5 }
 0x423   :  { %1698 = vmatprep.subr.bf16.mxu1 %v1655_v7 }
 0x426   :  { %1699 = vmatpush1.bf16.msra.mxu1 %v1654_v8 }
 0x429   :  { %1701 = vmatmul.mubr.bf16.vlgmr.msra.gmra.mrb[8].mxu1 %v1620_v43 }
 0x4fc   :  { %v1702_v25 = vpop.f32.mrb[8].mxu1 }
 0x4fd   :  { %v1703_v36 = vadd.f32 %v1702_v25, %v1661_v15  ;;  %v1704_v54 = vpop.f32.mrb[9].mxu1 }
 0x4fe   :  { %v1705_v38 = vadd.f32 %v1704_v54, %v1665_v16  ;;  %v1706_v40 = vpop.f32.mrb[10].mxu1 }
 0x4ff   :  { %v3178_v20 = vmax.f32 %v1703_v36, 0.0  ;;  %v1707_v48 = vadd.f32 %v1706_v40, %v1661_v15  ;;  %v1708_v44 = vpop.f32.mrb[11].mxu1 }
 0x500   :  { %v3180_v50 = vmax.f32 %v1705_v38, 0.0  ;;  %v1709_v27 = vadd.f32 %v1708_v44, %v1665_v16 }
 0x501   :  { %v3182_v17 = vmax.f32 %v1707_v48, 0.0  ;;  %v1729_v23 = vmul.f32 %v3178_v20, %v3178_v20 }
 0x502   :  { %v3184_v22 = vmax.f32 %v1709_v27, 0.0  ;;  %v1730_v30 = vmul.f32 %v3180_v50, %v3180_v50 }
 0x503   :  { %v1715_v28 = vadd.f32 %v3182_v17, %v3178_v20  ;;  %v1731_v29 = vmul.f32 %v3182_v17, %v3182_v17 }
 0x504   :  { %v1722_v31 = vadd.f32 %v3184_v22, %v3180_v50  ;;  %v1732_v33 = vmul.f32 %v3184_v22, %v3184_v22 }
 0x505   :  { %v1716_v39 = vrot.slane %v1715_v28, 4  ;;  %v1733_v6 = vadd.f32 %v1731_v29, %v1729_v23 }
 0x506   :  { %v1723_v9 = vrot.slane %v1722_v31, 4  ;;  %v1740_v11 = vadd.f32 %v1732_v33, %v1730_v30 }
 0x507   :  { %v1717_v12 = vadd.f32 %v1716_v39, %v1715_v28  ;;  %v1734_v43 = vrot.slane %v1733_v6, 4  ;;  %v1793_v28 = vld [vmem:[%s3249_s11] sm:$0x3] }
 0x508   :  { %v1724_v45 = vadd.f32 %v1723_v9, %v1722_v31  ;;  %v1741_v49 = vrot.slane %v1740_v11, 4  ;;  %v1757_v31 = vld [vmem:[%s3250_s12] sm:$0x3]  ;;  %v1818_v39 = vrot.slane %v1793_v28, %v3053_v24 }
 0x509   :  { %v1718_v55 = vrot.slane %v1717_v12, 2  ;;  %v1735_v58 = vadd.f32 %v1734_v43, %v1733_v6  ;;  %v1822_v6 = vrot.slane %v1793_v28, %v3059_v13 }
 0x50a   :  { %v1725_v59 = vrot.slane %v1724_v45, 2  ;;  %v1742_v14 = vadd.f32 %v1741_v49, %v1740_v11  ;;  %v1825_v43 = vmul.f32 %v1818_v39, %v3178_v20  ;;  %v1827_v49 = vmul.f32 %v1818_v39, %v3182_v17 }
 0x50b   :  { %v1719_v52 = vadd.f32 %v1718_v55, %v1717_v12  ;;  %v1736_v19 = vrot.slane %v1735_v58, 2  ;;  %v1828_v55 = vmul.f32 %v1822_v6, %v3184_v22 }
 0x50c   :  { %v1726_v47 = vadd.f32 %v1725_v59, %v1724_v45  ;;  %v1743_v53 = vrot.slane %v1742_v14, 2  ;;  %v1826_v45 = vmul.f32 %v1822_v6, %v3180_v50 }
 0x50d   :  { %v1720_v61 = vrot.slane %v1719_v52, 1  ;;  %v1737_v63 = vadd.f32 %v1736_v19, %v1735_v58 }
 0x50e   :  { %v1727_v21 = vrot.slane %v1726_v47, 1  ;;  %v1744_v41 = vadd.f32 %v1743_v53, %v1742_v14 }
 0x50f   :  { %v1721_v57 = vadd.f32 %v1720_v61, %v1719_v52  ;;  %v1738_v35 = vrot.slane %v1737_v63, 1 }
 0x510   :  { %v1728_v56 = vadd.f32 %v1727_v21, %v1726_v47  ;;  %v1745_v37 = vrot.slane %v1744_v41, 1 }
 0x511   :  { %v1739_v18 = vadd.f32 %v1738_v35, %v1737_v63  ;;  %v1747_v46 = vmul.f32 0.0625, %v1721_v57 }
 0x512   :  { %v1746_v42 = vadd.f32 %v1745_v37, %v1744_v41  ;;  %v1748_v51 = vmul.f32 0.0625, %v1728_v56 }
 0x513   :  { %v1749_v34 = vmul.f32 0.0625, %v1739_v18  ;;  %v1751_v32 = vmul.f32 %v1747_v46, %v1747_v46 }
 0x514   :  { %v1750_v0 = vmul.f32 0.0625, %v1746_v42  ;;  %v1752_v60 = vmul.f32 %v1748_v51, %v1748_v51  ;;  %v1796_v1 = vcombine.low %v1747_v46, %v1748_v51 }
 0x515   :  { %v1753_v2 = vsub.f32 %v1749_v34, %v1751_v32 }
 0x516   :  { %v1754_v3 = vsub.f32 %v1750_v0, %v1752_v60  ;;  %v1803_v44 = vrot.slane %v1796_v1, %v3084_v62 }
 0x517   :  { %v1755_v4 = vmax.f32 %v1753_v2, 0.0 }
 0x518   :  { %v1756_v5 = vmax.f32 %v1754_v3, 0.0  ;;  %v1810_v30 = vrot.slane %v1803_v44, %v3084_v62 }
 0x519   :  { %v1758_v7 = vadd.f32 0.0001, %v1755_v4 }
 0x51a   :  { %v1759_v8 = vadd.f32 0.0001, %v1756_v5  ;;  %v1812_v11 = vmul.f32 %v1810_v30, %v1793_v28 }
 0x51b   :  { %2348 = vrsqrt.f32 %v1758_v7  ;;  %vm1762_vm0 = vcmp.eq.f32.partialorder %v1758_v7, inf  ;;  %v1765_v25 = vand.u32 2147483648, %v1758_v7  ;;  %vm1764_vm1 = vcmp.eq.f32.partialorder %v1758_v7, 0.0 }
 0x51c   :  { %2350 = vrsqrt.f32 %v1759_v8  ;;  %vm1769_vm2 = vcmp.eq.f32.partialorder %v1759_v8, inf  ;;  %v1772_v38 = vand.u32 2147483648, %v1759_v8  ;;  %vm1771_vm3 = vcmp.eq.f32.partialorder %v1759_v8, 0.0 }
 0x525   :  { %v2349_v10 = vpop.eup %2348 }
 0x526   :  { %v2351_v15 = vpop.eup %2350  ;;  %v1761_v16 = vmul.f32 %v2349_v10, %v1758_v7 }
 0x527   :  { %v1768_v36 = vmul.f32 %v2351_v15, %v1759_v8 }
 0x528   :  { %v1763_v54 = vsel %vm1762_vm0, %v1758_v7, %v1761_v16 }
 0x529   :  { %v1766_v40 = vsel %vm1764_vm1, %v1765_v25, %v1763_v54  ;;  %v1770_v48 = vsel %vm1769_vm2, %v1759_v8, %v1768_v36 }
 0x52a   :  { %v1773_v27 = vsel %vm1771_vm3, %v1772_v38, %v1770_v48 }
 0x52b   :  { %v1776_v23 = vcombine.low %v1766_v40, %v1773_v27 }
 0x52d   :  { %v1783_v29 = vrot.slane %v1776_v23, %v3084_v62 }
 0x52f   :  { %v1790_v33 = vrot.slane %v1783_v29, %v3084_v62 }
 0x531   :  { %v1792_v9 = vmul.f32 %v1790_v33, %v1757_v31 }
 0x533   :  { %v1813_v12 = vsub.f32 %v1792_v9, %v1812_v11 }
 0x535   :  { %v1833_v58 = vrot.slane %v1813_v12, %v3053_v24  ;;  %v1837_v59 = vrot.slane %v1813_v12, %v3059_v13 }
 0x537   :  { %v1840_v62 = vadd.f32 %v1833_v58, %v1825_v43  ;;  %v1841_v14 = vadd.f32 %v1837_v59, %v1826_v45  ;;  %v1842_v52 = vadd.f32 %v1833_v58, %v1827_v49  ;;  %v1843_v19 = vadd.f32 %v1837_v59, %v1828_v55 }
 0x539   :  { %vm1844_vm4 = vcmp.ge.f32.partialorder %v1840_v62, 0.0  ;;  %vm1845_vm5 = vcmp.ge.f32.partialorder %v1841_v14, 0.0  ;;  %vm1846_vm6 = vcmp.ge.f32.partialorder %v1842_v52, 0.0  ;;  %vm1847_vm7 = vcmp.ge.f32.partialorder %v1843_v19, 0.0 }
 0x53a   :  { %v1848_v20 = vsel %vm1844_vm4, 1.0, %v2479_v26  ;;  %v1849_v50 = vsel %vm1845_vm5, 1.0, %v2479_v26  ;;  %v1850_v17 = vsel %vm1846_vm6, 1.0, %v2479_v26  ;;  %v1851_v22 = vsel %vm1847_vm7, 1.0, %v2479_v26 }
 0x53b   :  { %v1852_v47 = vpack.c.bf16 %v1850_v17, %v1848_v20  ;;  %v1853_v24 = vpack.c.bf16 %v1851_v22, %v1849_v50 }
 0x53c   :  { %2456 = dma.done.wait [#allocation4 + $0x2], 2048 }
 0x53d   :  { %2457 = vsyncadd [#allocation4 + $0x2], 4294965248  ;;  %1912 = vmatprep.mubr.bf16.mxu1 %v1853_v24  ;;  %v1865_v13 = vld [vmem:[#allocation3 + $0x40] sm:$0xff]  ;;  %v1866_v61 = vld [vmem:[#allocation3 + $0x48] sm:$0xff] }
 0x53e   :  { %v1857_v53 = vld [vmem:[#allocation3] sm:$0xff]  ;;  %2101 = vmatprep.subr.bf16.mxu1 %v1865_v13  ;;  %v1858_v63 = vld [vmem:[#allocation3 + $0x8] sm:$0xff]  ;;  %v1867_v21 = vld [vmem:[#allocation3 + $0x50] sm:$0xff] }
 0x53f   :  { %2102 = vmatpush3.bf16.msra.mxu1 %v1857_v53  ;;  %v1859_v41 = vld [vmem:[#allocation3 + $0x10] sm:$0xff]  ;;  %v1868_v57 = vld [vmem:[#allocation3 + $0x58] sm:$0xff]  ;;  %v1869_v35 = vld [vmem:[#allocation3 + $0x60] sm:$0xff] }
 0x540   :  { %2103 = vmatprep.subr.bf16.mxu1 %v1866_v61  ;;  %v1860_v26 = vld [vmem:[#allocation3 + $0x18] sm:$0xff]  ;;  %v1861_v56 = vld [vmem:[#allocation3 + $0x20] sm:$0xff]  ;;  %v1870_v37 = vld [vmem:[#allocation3 + $0x68] sm:$0xff] }
 0x541   :  { %v1862_v18 = vld [vmem:[#allocation3 + $0x28] sm:$0xff]  ;;  %v1871_v46 = vld [vmem:[#allocation3 + $0x70] sm:$0xff]  ;;  %v1872_v51 = vld [vmem:[#allocation3 + $0x78] sm:$0xff] }
 0x542   :  { %v1863_v42 = vld [vmem:[#allocation3 + $0x30] sm:$0xff]  ;;  %v1864_v34 = vld [vmem:[#allocation3 + $0x38] sm:$0xff]  ;;  %v2097_v60 = vld [vmem:[%s3252_s14] ss:$0 sm:$0xff]  ;;  %s2480_s14 = smov [#allocation10]  }
 0x543   :  { %2104 = vmatpush3.bf16.msra.mxu1 %v1858_v63  ;;  %s1948_s20 = sshll.u32 %s2480_s14, 4  ;;  %s1949_s20 = int_to_ptr.vmem [resolvable:$true] %s1948_s20 }
 0x544   :  { %2105 = vmatprep.subr.bf16.mxu1 %v1867_v21  ;;  %s2426_s21 = scalar_lea.vmem %s1949_s20, 256  ;;  %p2431_p11 = scmp.lt.s32.totalorder %s1949_s20, %s1949_s20 }
 0x545   :  { %p2427_p10 = scmp.ne.s32.totalorder %s1949_s20, %s2426_s21  ;;  %p2432_p12 = scmp.lt.s32.totalorder %s2426_s21, %s2426_s21 }
 0x547   :  { %2106 = vmatpush3.bf16.msra.mxu1 %v1859_v41  ;;  %p2433_p13 = por %p2432_p12, %p2431_p11 }
 0x548   :  { %2107 = vmatprep.subr.bf16.mxu1 %v1868_v57 }
 0x549   :  { %p2434_p0 = pnand %p2433_p13, %p2427_p10 }
 0x54b   :  { %2108 = vmatpush3.bf16.msra.mxu1 %v1860_v26 }
 0x54c   :  { %2109 = vmatprep.subr.bf16.mxu1 %v1869_v35 }
 0x54f   :  { %2110 = vmatpush3.bf16.msra.mxu1 %v1861_v56 }
 0x550   :  { %2111 = vmatprep.subr.bf16.mxu1 %v1870_v37 }
 0x553   :  { %2112 = vmatpush3.bf16.msra.mxu1 %v1862_v18 }
 0x554   :  { %2113 = vmatprep.subr.bf16.mxu1 %v1871_v46 }
 0x557   :  { %2114 = vmatpush3.bf16.msra.mxu1 %v1863_v42 }
 0x558   :  { %2115 = vmatprep.subr.bf16.mxu1 %v1872_v51 }
 0x55b   :  { %2116 = vmatpush3.bf16.msra.mxu1 %v1864_v34 }
 0x55e   :  { %1913 = vmatmul.mubr.bf16.vlgmr.msra.gmra.mrb[12].mxu1 %v1852_v47 }
 0x631   :  { %v2117_v32 = vpop.f32.mrb[12].mxu1 }
 0x632   :  { %v2118_v0 = vpop.f32.mrb[13].mxu1 }
 0x633   :  { %v2119_v1 = vadd.f32 %v2118_v0, %v2117_v32  ;;  %v2120_v2 = vpop.f32.mrb[14].mxu1 }
 0x634   :  { %v2121_v3 = vpop.f32.mrb[15].mxu1 }
 0x635   :  { %v2122_v4 = vadd.f32 %v2121_v3, %v2120_v2  ;;  %v1915_v5 = vadd.f32 %v2119_v1, %v2097_v60 }
 0x637   :  { %1921 = vmax.xlane.f32.xlu0 %v1915_v5  ;;  %v1918_v7 = vadd.f32 %v2122_v4, %v2097_v60 }
 0x63b   :  { %1923 = vmax.xlane.f32.xlu0 %v1918_v7 }
 0x6c4   :  { %v1922_v8 = vpop.xlane.xlu0 %1921 }
 0x6c5   :  { %v1925_v10 = vsub.f32 %v1915_v5, %v1922_v8 }
 0x6c7   :  { %v1927_v15 = vmul.f32 1.442695, %v1925_v10 }
 0x6c8   :  { %v1924_v16 = vpop.xlane.xlu0 %1923 }
 0x6c9   :  { %v1926_v25 = vsub.f32 %v1918_v7, %v1924_v16  ;;  %2352 = vpow2.f32 %v1927_v15 }
 0x6cb   :  { %v1929_v36 = vmul.f32 1.442695, %v1926_v25 }
 0x6cd   :  { %2354 = vpow2.f32 %v1929_v36 }
 0x6d3   :  { %v2353_v54 = vpop.eup %2352 }
 0x6d4   :  { %1931 = vadd.xlane.f32.xlu1 %v2353_v54 }
 0x6d7   :  { %v2355_v38 = vpop.eup %2354 }
 0x6d8   :  { %1933 = vadd.xlane.f32.xlu1 %v2355_v38 }
 0x761   :  { %v1932_v40 = vpop.xlane.xlu1 %1931 }
 0x762   :  { %2356 = vlog2.f32 %v1932_v40 }
 0x765   :  { %v1934_v48 = vpop.xlane.xlu1 %1933 }
 0x766   :  { %2358 = vlog2.f32 %v1934_v48 }
 0x76c   :  { %v2357_v44 = vpop.eup %2356 }
 0x76d   :  { %v1936_v27 = vmul.f32 0.6931472, %v2357_v44 }
 0x76f   :  { %v1939_v23 = vsub.f32 %v1925_v10, %v1936_v27 }
 0x770   :  { %v2359_v28 = vpop.eup %2358 }
 0x771   :  { %1941 = vst [vmem:[#allocation10] sm:$0xff] %v1939_v23  ;;  %v1938_v29 = vmul.f32 0.6931472, %v2359_v28 }
 0x773   :  { %v1940_v30 = vsub.f32 %v1926_v25, %v1938_v29 }
 0x775   :  { %1942 = vst [vmem:[#allocation10 + $0x8] sm:$0xff] %v1940_v30 }
 0x776   :  { %2437 = shalt.err (!%p2434_p0)
}
 0x777   :  { %s2438_s23 = scalar_lea.hbm %s3253_s15, 256 }
 0x778   :  { %p2439_p1 = scmp.ne.s32.totalorder %s3253_s15, %s2438_s23  ;;  %p2442_p2 = scmp.lt.u32.totalorder %s2438_s23, %s3253_s15 }
 0x77a   :  { %p2444_p3 = pnand %p2442_p2, %p2439_p1 }
 0x77c   :  { %2447 = shalt.err (!%p2444_p3)
}
 0x77d   :  { %s3356_s28 = smov 8  }
 0x77e   :  { %1954 = dma.vmem_to_hbm [thread:$0]  %s1949_s20, 256, %s3253_s15, [#allocation7], %s2464_s0, %s2464_s0, %s3356_s28  }
 0x77f   :  { %2458 = dma.done.wait [#allocation7], 256  }
 0x780   :  { %2459 = vsyncadd [#allocation7], 4294967040 }
 0x781   :  { %1958 = vsyncpa [#allocation6], 1 }
 0x782   :  { %1959 = vsyncpa [#allocation9], 1 }
 0x783   :  { %1960 = vsyncpa [#allocation7], 1 }
 0x784   :  { %1961 = vsyncmov [#allocation4] }
 0x787   :  { %s1962_s29 = vpop.sfrf %1961 }
 0x788   :  { %p2098_p4 = scmp.ne.s32.totalorder %s1962_s29, 0 }
 0x78a   :  { %1966 = shalt.err (%p2098_p4)  }
 0x78b   :  { %1968 = vsyncmov [#allocation4 + $0x1] }
 0x78e   :  { %s1969_s30 = vpop.sfrf %1968 }
 0x78f   :  { %p2099_p5 = scmp.ne.s32.totalorder %s1969_s30, 0 }
 0x791   :  { %1973 = shalt.err (%p2099_p5)  }
 0x792   :  { %1975 = vsyncmov [#allocation4 + $0x2] }
 0x795   :  { %s1976_s3 = vpop.sfrf %1975 }
 0x796   :  { %p2100_p6 = scmp.ne.s32.totalorder %s1976_s3, 0 }
 0x798   :  { %1980 = shalt.err (%p2100_p6)  }

</bundles_post_ra>
